<compile_context>
chip_gen: v7x
topology: tpu7x:2x2x1
jax: 0.10.0
libtpu: 0.0.40
codegen_flags: <defaults>
</compile_context>

<pallas_src>
import jax
import jax.numpy as jnp
from jax import lax
from jax.experimental import pallas as pl
from jax.experimental.pallas import tpu as pltpu

HIDDEN = 32          # hidden_size (real module default is 256; must be 128-aligned in prod)
NUM_LAYERS = 2
EMB_DIM = 768        # BERT-base embedding width (frozen)
VOCAB = 128          # synthetic small vocab (bert-base-chinese uses 21128)

MIB = 1024 * 1024


def _round_up(x, m):
    return ((x + m - 1) // m) * m


def _cparams(dims, vmem_mb):
    return pltpu.CompilerParams(dimension_semantics=dims,
                                vmem_limit_bytes=vmem_mb * MIB)


# ---------------------------------------------------------------------------
# Kernel 1: stacked dense  out[g] = x @ W[g] + b[g], tiled over M.
# grid = (M/tm, G) with G innermost -> the x tile stays resident across the
# inner G loop; f32 accumulation, output dtype configurable (bf16 intermediates).
# ---------------------------------------------------------------------------
def _dense_stack_kernel(x_ref, w_ref, b_ref, o_ref):
    w = w_ref[0]                                    # (K, N), bf16 or f32
    x = x_ref[...].astype(w.dtype)                  # cast activations at the MXU boundary
    acc = jnp.dot(x, w, preferred_element_type=jnp.float32)
    o_ref[0] = (acc + b_ref[0].astype(jnp.float32)).astype(o_ref.dtype)


def dense_stack(x, w_stack, b_stack, out_dtype=jnp.float32, tm=512):
    # TODO(synk): at production vocab (N=21128) also tile over N (grid=(M/tm, N/tn, G)).
    M, K = x.shape
    G, _, N = w_stack.shape
    tm = min(tm, _round_up(M, 8))                   # sublane-aligned M tile
    Mp = _round_up(M, tm)
    if Mp != M:
        x = jnp.pad(x, ((0, Mp - M), (0, 0)))
    out = pl.pallas_call(
        _dense_stack_kernel,
        out_shape=jax.ShapeDtypeStruct((G, Mp, N), out_dtype),
        grid=(Mp // tm, G),                         # G innermost -> x tile resident
        in_specs=[pl.BlockSpec((tm, K), lambda m, g: (m, 0)),
                  pl.BlockSpec((1, K, N), lambda m, g: (g, 0, 0)),
                  pl.BlockSpec((1, 1, N), lambda m, g: (g, 0, 0))],
        out_specs=pl.BlockSpec((1, tm, N), lambda m, g: (g, m, 0)),
        compiler_params=_cparams(("parallel", "arbitrary"), 32),
    )(x, w_stack, b_stack)
    if Mp != M:
        out = out[:, :M, :]
    return out


# ---------------------------------------------------------------------------
# Kernel 2: one fused bidirectional LSTM layer (encoder).
# grid = (2 directions, S/Tc time chunks); gx streamed chunk-by-chunk (bf16),
# Whh resident, h/c carried in VMEM scratch, pack_padded masking in-kernel.
# ---------------------------------------------------------------------------
def _enc_bilstm_kernel(gx_ref, whh_ref, mask_ref, out_ref, hf_ref, cf_ref,
                       h_sc, c_sc):
    d = pl.program_id(0)                     # 0 = forward, 1 = backward direction
    c = pl.program_id(1)                     # chunk index (already reversed for bwd)
    Tc = gx_ref.shape[0]
    H = h_sc.shape[-1]

    @pl.when(c == 0)
    def _():
        h_sc[...] = jnp.zeros_like(h_sc)
        c_sc[...] = jnp.zeros_like(c_sc)

    whh = whh_ref[...]                       # (H, 4H) bf16, resident

    def step(t, carry):
        tt = t + d * (Tc - 1 - 2 * t)        # fwd: t ; bwd: Tc-1-t (within chunk)
        h = h_sc[...]
        c_prev = c_sc[...]
        gates = gx_ref[tt].astype(jnp.float32) + jnp.dot(
            h.astype(whh.dtype), whh, preferred_element_type=jnp.float32)
        i = jax.nn.sigmoid(gates[:, 0 * H:1 * H])
        f = jax.nn.sigmoid(gates[:, 1 * H:2 * H])
        g = jnp.tanh(gates[:, 2 * H:3 * H])
        o = jax.nn.sigmoid(gates[:, 3 * H:4 * H])
        c_new = f * c_prev + i * g
        h_new = o * jnp.tanh(c_new)
        valid = mask_ref[tt]                 # (B, 1): 1 = valid, 0 = pad
        # pack_padded_sequence semantics: state frozen / output zero at pads
        h_upd = valid * h_new + (1.0 - valid) * h
        c_upd = valid * c_new + (1.0 - valid) * c_prev
        h_sc[...] = h_upd
        c_sc[...] = c_upd
        out_ref[tt] = (valid * h_upd).astype(out_ref.dtype)
        return carry

    # bounded unroll (full unroll explodes program size / vreg pressure at prod S)
    lax.fori_loop(0, Tc, step, 0, unroll=min(Tc, 8))
    hf_ref[...] = h_sc[...]
    cf_ref[...] = c_sc[...]


def enc_bilstm_layer(gx, whh, mask_sb):
    # gx: (2, S, B, 4H) bf16   whh: (2, H, 4H) bf16   mask_sb: (S, B, 1) f32
    _, S, B, G4 = gx.shape
    H = G4 // 4
    tc = min(128, S)
    while S % tc:                            # largest chunk size <=128 dividing S
        tc -= 1
    nc = S // tc

    def chunk(d, c):                         # bwd direction walks chunks back-to-front
        return c + d * (nc - 1 - 2 * c)

    return pl.pallas_call(
        _enc_bilstm_kernel,
        out_shape=(jax.ShapeDtypeStruct((2, S, B, H), jnp.bfloat16),
                   jax.ShapeDtypeStruct((2, B, H), jnp.float32),
                   jax.ShapeDtypeStruct((2, B, H), jnp.float32)),
        grid=(2, nc),
        in_specs=[pl.BlockSpec((None, tc, B, G4), lambda d, c: (d, chunk(d, c), 0, 0)),
                  pl.BlockSpec((None, H, G4), lambda d, c: (d, 0, 0)),
                  pl.BlockSpec((tc, B, 1), lambda d, c: (chunk(d, c), 0, 0))],
        out_specs=(pl.BlockSpec((None, tc, B, H), lambda d, c: (d, chunk(d, c), 0, 0)),
                   pl.BlockSpec((None, B, H), lambda d, c: (d, 0, 0)),
                   pl.BlockSpec((None, B, H), lambda d, c: (d, 0, 0))),
        scratch_shapes=[pltpu.VMEM((B, H), jnp.float32),
                        pltpu.VMEM((B, H), jnp.float32)],
        # directions independent -> one per TensorCore on v7x (no-op on v5e/v6e)
        compiler_params=_cparams(("parallel", "arbitrary"), 32),
    )(gx, whh, mask_sb)


# ---------------------------------------------------------------------------
# Kernel 3: fused decoder loop (attention + stacked LSTM cells per step).
# grid = (T,) "arbitrary"; hidden/cell carried in VMEM scratch; vocab projection
# hoisted out (kernel emits (T, B, 3H) features + attention weights).
# ---------------------------------------------------------------------------
def _decoder_kernel(gxe_ref, parte_ref, enc_ref, mask_ref, h0_ref, c0_ref,
                    wh_ref, v_ref, w0_ref, wup_ref, bup_ref,
                    feat_ref, attn_ref, h_sc, c_sc):
    t = pl.program_id(0)

    @pl.when(t == 0)
    def _():
        h_sc[...] = h0_ref[...]
        c_sc[...] = c0_ref[...]

    L, B, H = h_sc.shape
    enc = enc_ref[...]                                            # (B, S, 2H) bf16, resident
    S = enc.shape[1]

    # ---- attention (encoder part of the energy linear pre-hoisted into part_e) ----
    wh = wh_ref[...]
    h_top = h_sc[L - 1]                                           # hidden[-1], (B, H)
    part_h = jnp.dot(h_top.astype(wh.dtype), wh,
                     preferred_element_type=jnp.float32)          # (B, H)
    energy = jnp.tanh(parte_ref[...].astype(jnp.float32) + part_h[:, None, :])  # (B,S,H)
    # score / context reductions on the MXU (idle in the decoder) instead of VPU+XLU
    scores = jnp.dot(energy.reshape(B * S, H), v_ref[...],
                     preferred_element_type=jnp.float32).reshape(B, S)
    # large finite fill instead of -inf: avoids NaN on fully-masked rows
    scores = jnp.where(mask_ref[...] == 0.0, -1e30, scores)
    m = jnp.max(scores, axis=-1, keepdims=True)
    e = jnp.exp(scores - m)
    attn = e / jnp.sum(e, axis=-1, keepdims=True)                 # exact softmax, (B, S)
    ctx = jnp.einsum('bqs,bsd->bqd', attn[:, None, :].astype(enc.dtype), enc,
                     preferred_element_type=jnp.float32)[:, 0]    # (B, 2H)

    # ---- stacked decoder LSTM cells (one matmul per cell via [x‖h] concat weights) ----
    def lstm_gate_math(gates, c_prev):
        i = jax.nn.sigmoid(gates[:, 0 * H:1 * H])
        f = jax.nn.sigmoid(gates[:, 1 * H:2 * H])
        g = jnp.tanh(gates[:, 2 * H:3 * H])
        o = jax.nn.sigmoid(gates[:, 3 * H:4 * H])
        c_new = f * c_prev + i * g
        return o * jnp.tanh(c_new), c_new

    x = None
    new_h, new_c = [], []
    for layer in range(NUM_LAYERS):
        h_prev = h_sc[layer]
        c_prev = c_sc[layer]
        if layer == 0:
            # emb @ Wih_emb + (b_ih+b_hh) pre-hoisted for all T into gxe
            w0 = w0_ref[...]                                      # ([ctx‖h], 4H) bf16
            xin = jnp.concatenate([ctx, h_prev], axis=-1)
            gates = gxe_ref[...].astype(jnp.float32) + jnp.dot(
                xin.astype(w0.dtype), w0, preferred_element_type=jnp.float32)
        else:
            wu = wup_ref[layer - 1]                               # ([x‖h], 4H) bf16
            xin = jnp.concatenate([x, h_prev], axis=-1)
            gates = jnp.dot(xin.astype(wu.dtype), wu,
                            preferred_element_type=jnp.float32) + bup_ref[layer - 1]
        h_new, c_new = lstm_gate_math(gates, c_prev)
        new_h.append(h_new)
        new_c.append(c_new)
        x = h_new
    for layer in range(NUM_LAYERS):
        h_sc[layer] = new_h[layer]
        c_sc[layer] = new_c[layer]

    # ---- emit per-step features; fc_out / pointer projection hoisted out of the loop ----
    feat_ref[...] = jnp.concatenate([x, ctx], axis=-1).astype(feat_ref.dtype)  # (B, 3H)
    attn_ref[...] = attn


def decoder_run(gx_emb, part_e, enc_out, mask, h0, c0, p):
    T, B, G4 = gx_emb.shape
    H = G4 // 4
    _, S, D2 = enc_out.shape
    L = NUM_LAYERS

    def res(rank):                       # resident (same block every step)
        return lambda t: (0,) * rank

    # TODO(synk): set pipeline_mode=pl.Buffered(1) on the resident inputs below to halve
    #             their VMEM footprint on v7x once single-buffered pipelining is available.
    in_specs = [
        pl.BlockSpec((None, B, G4), lambda t: (t, 0, 0)),         # gx_emb (per-step block)
        pl.BlockSpec((B, S, H), res(3)),                          # part_e (bf16, resident)
        pl.BlockSpec((B, S, D2), res(3)),                         # enc_out (bf16, resident)
        pl.BlockSpec((B, S), res(2)),                             # mask
        pl.BlockSpec((L, B, H), res(3)),                          # h0
        pl.BlockSpec((L, B, H), res(3)),                          # c0
        pl.BlockSpec((H, H), res(2)),                             # attn_wh (bf16)
        pl.BlockSpec((H, 1), res(2)),                             # attn_v
        pl.BlockSpec((3 * H, G4), res(2)),                        # dec_w0 = [wih_ctx; whh0]
        pl.BlockSpec((L - 1, 2 * H, G4), res(3)),                 # dec_w_up = [wih_up; whh_up]
        pl.BlockSpec((L - 1, 1, G4), res(3)),                     # dec_b_up
    ]
    out_shapes = (jax.ShapeDtypeStruct((T, B, 3 * H), jnp.bfloat16),   # features [out ‖ ctx]
                  jax.ShapeDtypeStruct((T, B, S), jnp.float32))        # attention weights
    out_specs = (pl.BlockSpec((None, B, 3 * H), lambda t: (t, 0, 0)),
                 pl.BlockSpec((None, B, S), lambda t: (t, 0, 0)))
    return pl.pallas_call(
        _decoder_kernel,
        out_shape=out_shapes,
        grid=(T,),
        in_specs=in_specs,
        out_specs=out_specs,
        scratch_shapes=[pltpu.VMEM((L, B, H), jnp.float32),
                        pltpu.VMEM((L, B, H), jnp.float32)],
        compiler_params=_cparams(("arbitrary",), 48),
    )(gx_emb, part_e, enc_out, mask, h0, c0,
      p["attn_wh"], p["attn_v"], p["dec_w0"], p["dec_w_up"], p["dec_b_up"])


# ---------------------------------------------------------------------------
# Parameter init (deterministic, synthetic). Weights stored transposed
# (in_features, out_features); matmul weights in bf16 (f32 MXU accumulation).
# ---------------------------------------------------------------------------
def init_params(key):
    ks = iter(jax.random.split(key, 64))

    def u(shape, scale=0.1, dtype=jnp.float32):
        return jax.random.uniform(next(ks), shape, jnp.float32, -scale, scale).astype(dtype)

    H, G4 = HIDDEN, 4 * HIDDEN
    p = {}
    # TODO(synk): frozen BERT encoder replaced by a frozen embedding lookup with the same
    #             (B, S, 768) activation shape; the real 21128x768 table stays in HBM.
    p["embedding"] = (0.02 * jax.random.normal(next(ks), (VOCAB, EMB_DIM))).astype(jnp.bfloat16)

    enc = []
    for layer in range(NUM_LAYERS):
        in_dim = EMB_DIM if layer == 0 else 2 * H
        enc.append(dict(
            wih=u((2, in_dim, G4), dtype=jnp.bfloat16),   # stacked fwd/bwd directions
            whh=u((2, H, G4), dtype=jnp.bfloat16),
            b=u((2, 1, G4)),                              # combined b_ih + b_hh
        ))
    p["enc_lstm"] = enc

    # decoder LSTM: layer 0 input = [emb(768), ctx(2H)], layers >= 1 input = H.
    # The emb part is hoisted; the per-step matmuls use pre-concatenated [x‖h] weights.
    p["dec_wih_emb"] = u((EMB_DIM, G4), dtype=jnp.bfloat16)
    p["dec_b0"] = u((1, G4))                              # combined b_ih + b_hh, layer 0
    p["dec_w0"] = u((3 * H, G4), dtype=jnp.bfloat16)      # rows = [wih_ctx(2H); whh0(H)]
    p["dec_w_up"] = u((NUM_LAYERS - 1, 2 * H, G4), dtype=jnp.bfloat16)  # [wih_up(H); whh(H)]
    p["dec_b_up"] = u((NUM_LAYERS - 1, 1, G4))

    # Attention Linear(3H -> H) split: hidden part (H,H) + encoder part (2H,H) + bias
    p["attn_wh"] = u((H, H), dtype=jnp.bfloat16)
    p["attn_we"] = u((2 * H, H), dtype=jnp.bfloat16)
    p["attn_b"] = u((1, H))
    p["attn_v"] = jax.random.uniform(next(ks), (H, 1), jnp.float32)   # torch.rand

    # fused fc_out + pointer projection: columns [0:V) = vocab logits, column V = pointer
    p["w_outptr"] = u((3 * H, VOCAB + 1), dtype=jnp.bfloat16)
    p["b_outptr"] = u((1, VOCAB + 1))
    return p


# ---------------------------------------------------------------------------
# Model glue (embedding gathers, tiny reshapes; no large-activation transposes)
# ---------------------------------------------------------------------------
def encoder_forward(src, src_mask, params):
    B, S = src.shape
    # gather in (S, B) order so gx already lands in (S, B, ...) layout (no big transpose)
    emb = jnp.take(params["embedding"], src.T, axis=0)        # (S, B, 768), bf16
    mask_sb = src_mask.T[:, :, None].astype(jnp.float32)      # (S, B, 1)
    x = emb
    hs, cs = [], []
    for layer in range(NUM_LAYERS):
        lw = params["enc_lstm"][layer]
        in_dim = x.shape[-1]
        # hoisted input->gates projection: one MXU matmul over all S*B rows per direction
        gx = dense_stack(x.reshape(S * B, in_dim), lw["wih"], lw["b"],
                         out_dtype=jnp.bfloat16)              # (2, S*B, 4H) bf16
        gx = gx.reshape(2, S, B, 4 * HIDDEN)
        out, hf, cf = enc_bilstm_layer(gx, lw["whh"], mask_sb)  # out: (2,S,B,H) bf16
        # TODO(synk): at production H (multiple of 128) write fwd/bwd halves directly into a
        #             (S,B,2H) slab via a lane-offset out index map instead of this concat.
        x = jnp.concatenate([out[0], out[1]], axis=-1)        # (S, B, 2H), no transpose
        hs += [hf[0], hf[1]]
        cs += [cf[0], cf[1]]
        # inter-layer dropout omitted (inference semantics)
    enc_out = x.transpose(1, 0, 2)                            # (B, S, 2H) bf16, single transpose
    # hs/cs order: [l0_fwd, l0_bwd, l1_fwd, l1_bwd]  (matches PyTorch h_n layout)
    return enc_out, jnp.stack(hs, 0), jnp.stack(cs, 0)


def pgn_forward(params, src, src_len, trg, src_mask):
    # src_len is implied by src_mask (pack_padded semantics handled in-kernel via the mask)
    B, S = src.shape
    T = trg.shape[1]
    H = HIDDEN
    enc_out, h4, c4 = encoder_forward(src, src_mask, params)

    # matches reference _reshape_hidden: view(2, num_layers, B, H).mean(0) applied to
    # PyTorch's [l0_f, l0_b, l1_f, l1_b] layout (averages layers per direction slot).
    hidden0 = h4.reshape(2, NUM_LAYERS, B, H).mean(axis=0)
    cell0 = c4.reshape(2, NUM_LAYERS, B, H).mean(axis=0)

    # hoisted time-invariant pieces of the decoder step (bf16 intermediates)
    emb_trg = jnp.take(params["embedding"], trg.T, axis=0)            # (T, B, 768), frozen
    gx_emb = dense_stack(emb_trg.reshape(T * B, EMB_DIM),
                         params["dec_wih_emb"][None], params["dec_b0"][None],
                         out_dtype=jnp.bfloat16)[0].reshape(T, B, 4 * H)
    part_e = dense_stack(enc_out.reshape(B * S, 2 * H),
                         params["attn_we"][None], params["attn_b"][None],
                         out_dtype=jnp.bfloat16)[0].reshape(B, S, H)

    feat, attns = decoder_run(gx_emb, part_e, enc_out,
                              src_mask.astype(jnp.float32),
                              hidden0, cell0, params)                 # feat: (T, B, 3H) bf16

    # hoisted vocab + pointer projection: ONE well-shaped MXU matmul at M = T*B
    proj = dense_stack(feat.reshape(T * B, 3 * H),
                       params["w_outptr"][None], params["b_outptr"][None],
                       out_dtype=jnp.float32)[0].reshape(T, B, VOCAB + 1)
    preds = proj[..., :VOCAB]
    pgens = jax.nn.sigmoid(proj[..., VOCAB:VOCAB + 1])
    return (preds.transpose(1, 0, 2),    # (B, T, VOCAB)
            pgens.transpose(1, 0, 2),    # (B, T, 1)
            attns.transpose(1, 0, 2))    # (B, T, S)


# ---------------------------------------------------------------------------
if __name__ == "__main__":
    key = jax.random.PRNGKey(0)
    kp, ks, kt = jax.random.split(key, 3)
    B, S, T = 2, 8, 4

    params = init_params(kp)
    src = jax.random.randint(ks, (B, S), 0, VOCAB, dtype=jnp.int32)
    trg = jax.random.randint(kt, (B, T), 0, VOCAB, dtype=jnp.int32)
    src_len = jnp.array([S, S - 2], dtype=jnp.int32)
    src_mask = (jnp.arange(S)[None, :] < src_len[:, None]).astype(jnp.float32)

    fwd = jax.jit(pgn_forward)
    outputs, p_gens, attentions = fwd(params, src, src_len, trg, src_mask)
    jax.block_until_ready((outputs, p_gens, attentions))

    assert outputs.shape == (B, T, VOCAB)
    assert p_gens.shape == (B, T, 1)
    assert attentions.shape == (B, T, S)
    assert bool(jnp.all(jnp.isfinite(outputs)))
    # attention rows sum to 1 over valid positions
    assert bool(jnp.allclose(attentions.sum(-1), 1.0, atol=1e-5))
    print("KERNEL_OK")
</pallas_src>

<mosaic_0001>
module attributes {stable_mosaic.version = 11 : i64} {
  func.func @_dense_stack_kernel(%arg0: i32, %arg1: i32, %arg2: memref<16x768xbf16, #tpu.memory_space<vmem>>, %arg3: memref<1x768x128xbf16, #tpu.memory_space<vmem>>, %arg4: memref<1x1x128xf32, #tpu.memory_space<vmem>>, %arg5: memref<1x16x128xbf16, #tpu.memory_space<vmem>>) attributes {dimension_semantics = [#tpu.dimension_semantics<parallel>, #tpu.dimension_semantics<arbitrary>], iteration_bounds = array<i64: 1, 2>, scalar_prefetch = 0 : i64, scratch_operands = 0 : i64, tpu.core_type = #tpu.core_type<tc>, window_params = [{transform_indices = @transform_0, window_bounds = array<i64: 16, 768>}, {transform_indices = @transform_1, window_bounds = array<i64: 1, 768, 128>}, {transform_indices = @transform_2, window_bounds = array<i64: 1, 1, 128>}, {transform_indices = @transform_3, window_bounds = array<i64: 1, 16, 128>}]} {
    %c0 = arith.constant 0 : index
    %c0_0 = arith.constant 0 : index
    %c0_1 = arith.constant 0 : index
    %0 = vector.load %arg3[%c0, %c0_0, %c0_1] : memref<1x768x128xbf16, #tpu.memory_space<vmem>>, vector<1x768x128xbf16>
    %1 = vector.shape_cast %0 : vector<1x768x128xbf16> to vector<768x128xbf16>
    %c0_2 = arith.constant 0 : index
    %c0_3 = arith.constant 0 : index
    %2 = vector.load %arg2[%c0_2, %c0_3] : memref<16x768xbf16, #tpu.memory_space<vmem>>, vector<16x768xbf16>
    %cst = arith.constant dense<0.000000e+00> : vector<16x128xf32>
    %3 = tpu.matmul %2, %1, %cst {dimension_numbers = #tpu.dot_dimension_numbers<[1], [0], [0], [1], [0, 0, 1, 1], [], []>} : vector<16x768xbf16>, vector<768x128xbf16>, vector<16x128xf32> -> vector<16x128xf32>
    %c0_4 = arith.constant 0 : index
    %c0_5 = arith.constant 0 : index
    %c0_6 = arith.constant 0 : index
    %4 = vector.load %arg4[%c0_4, %c0_5, %c0_6] : memref<1x1x128xf32, #tpu.memory_space<vmem>>, vector<1x1x128xf32>
    %5 = vector.shape_cast %4 : vector<1x1x128xf32> to vector<1x128xf32>
    %6 = vector.broadcast %5 : vector<1x128xf32> to vector<16x128xf32>
    %7 = arith.addf %3, %6 : vector<16x128xf32>
    %8 = arith.truncf %7 : vector<16x128xf32> to vector<16x128xbf16>
    %c0_7 = arith.constant 0 : index
    %c0_8 = arith.constant 0 : index
    %c0_9 = arith.constant 0 : index
    %9 = vector.load %arg5[%c0_7, %c0_8, %c0_9] : memref<1x16x128xbf16, #tpu.memory_space<vmem>>, vector<1x16x128xbf16>
    %10 = vector.shape_cast %9 : vector<1x16x128xbf16> to vector<16x128xbf16>
    %11 = vector.shape_cast %8 : vector<16x128xbf16> to vector<1x16x128xbf16>
    tpu.vector_store %arg5[%c0_7, %c0_8, %c0_9], %11 {strides = array<i32>} : memref<1x16x128xbf16, #tpu.memory_space<vmem>>, vector<1x16x128xbf16>,
    return
  }
  func.func @transform_0(%arg0: i32, %arg1: i32) -> (i32, i32) {
    %c0_i32 = arith.constant 0 : i32
    %c0_i32_0 = arith.constant 0 : i32
    return %arg0, %c0_i32 : i32, i32
  }
  func.func @transform_1(%arg0: i32, %arg1: i32) -> (i32, i32, i32) {
    %c0_i32 = arith.constant 0 : i32
    %c0_i32_0 = arith.constant 0 : i32
    %c0_i32_1 = arith.constant 0 : i32
    return %arg1, %c0_i32, %c0_i32_0 : i32, i32, i32
  }
  func.func @transform_2(%arg0: i32, %arg1: i32) -> (i32, i32, i32) {
    %c0_i32 = arith.constant 0 : i32
    %c0_i32_0 = arith.constant 0 : i32
    %c0_i32_1 = arith.constant 0 : i32
    return %arg1, %c0_i32, %c0_i32_0 : i32, i32, i32
  }
  func.func @transform_3(%arg0: i32, %arg1: i32) -> (i32, i32, i32) {
    %c0_i32 = arith.constant 0 : i32
    %c0_i32_0 = arith.constant 0 : i32
    return %arg1, %arg0, %c0_i32 : i32, i32, i32
  }
}

module attributes {stable_mosaic.version = 11 : i64} {
  func.func @_enc_bilstm_kernel(%arg0: i32, %arg1: i32, %arg2: memref<1x8x2x128xbf16, #tpu.memory_space<vmem>>, %arg3: memref<1x32x128xbf16, #tpu.memory_space<vmem>>, %arg4: memref<8x2x1xf32, #tpu.memory_space<vmem>>, %arg5: memref<1x8x2x32xbf16, #tpu.memory_space<vmem>>, %arg6: memref<1x2x32xf32, #tpu.memory_space<vmem>>, %arg7: memref<1x2x32xf32, #tpu.memory_space<vmem>>, %arg8: memref<2x32xf32, #tpu.memory_space<vmem>>, %arg9: memref<2x32xf32, #tpu.memory_space<vmem>>) attributes {dimension_semantics = [#tpu.dimension_semantics<parallel>, #tpu.dimension_semantics<arbitrary>], iteration_bounds = array<i64: 2, 1>, scalar_prefetch = 0 : i64, scratch_operands = 2 : i64, tpu.core_type = #tpu.core_type<tc>, window_params = [{transform_indices = @transform_0, window_bounds = array<i64: 1, 8, 2, 128>}, {transform_indices = @transform_1, window_bounds = array<i64: 1, 32, 128>}, {transform_indices = @transform_2, window_bounds = array<i64: 8, 2, 1>}, {transform_indices = @transform_3, window_bounds = array<i64: 1, 8, 2, 32>}, {transform_indices = @transform_4, window_bounds = array<i64: 1, 2, 32>}, {transform_indices = @transform_5, window_bounds = array<i64: 1, 2, 32>}]} {
    %c0_i32 = arith.constant 0 : i32
    %0 = arith.cmpi eq, %arg1, %c0_i32 : i32
    %1 = arith.extui %0 : i1 to i32
    %c0_i32_0 = arith.constant 0 : i32
    %2 = arith.cmpi ne, %1, %c0_i32_0 : i32
    scf.if %2 {
      %cst_205 = arith.constant 0.000000e+00 : f32
      %525 = vector.broadcast %cst_205 : f32 to vector<2x32xf32>
      %c0_206 = arith.constant 0 : index
      %c0_207 = arith.constant 0 : index
      %526 = vector.load %arg8[%c0_206, %c0_207] : memref<2x32xf32, #tpu.memory_space<vmem>>, vector<2x32xf32>
      tpu.vector_store %arg8[%c0_206, %c0_207], %525 {strides = array<i32>} : memref<2x32xf32, #tpu.memory_space<vmem>>, vector<2x32xf32>,
      %cst_208 = arith.constant 0.000000e+00 : f32
      %527 = vector.broadcast %cst_208 : f32 to vector<2x32xf32>
      %c0_209 = arith.constant 0 : index
      %c0_210 = arith.constant 0 : index
      %528 = vector.load %arg9[%c0_209, %c0_210] : memref<2x32xf32, #tpu.memory_space<vmem>>, vector<2x32xf32>
      tpu.vector_store %arg9[%c0_209, %c0_210], %527 {strides = array<i32>} : memref<2x32xf32, #tpu.memory_space<vmem>>, vector<2x32xf32>,
    } else {
    }
    %c0 = arith.constant 0 : index
    %c0_1 = arith.constant 0 : index
    %c0_2 = arith.constant 0 : index
    %3 = vector.load %arg3[%c0, %c0_1, %c0_2] : memref<1x32x128xbf16, #tpu.memory_space<vmem>>, vector<1x32x128xbf16>
    %4 = vector.shape_cast %3 : vector<1x32x128xbf16> to vector<32x128xbf16>
    %c0_i32_3 = arith.constant 0 : i32
    %c2_i32 = arith.constant 2 : i32
    %5 = arith.muli %c2_i32, %c0_i32_3 : i32
    %c7_i32 = arith.constant 7 : i32
    %6 = arith.subi %c7_i32, %5 : i32
    %7 = arith.muli %arg0, %6 : i32
    %8 = arith.addi %c0_i32_3, %7 : i32
    %c0_4 = arith.constant 0 : index
    %c0_5 = arith.constant 0 : index
    %9 = vector.load %arg8[%c0_4, %c0_5] : memref<2x32xf32, #tpu.memory_space<vmem>>, vector<2x32xf32>
    %c0_6 = arith.constant 0 : index
    %c0_7 = arith.constant 0 : index
    %10 = vector.load %arg9[%c0_6, %c0_7] : memref<2x32xf32, #tpu.memory_space<vmem>>, vector<2x32xf32>
    %c0_8 = arith.constant 0 : index
    %11 = arith.index_cast %8 : i32 to index
    %c0_9 = arith.constant 0 : index
    %c0_10 = arith.constant 0 : index
    %12 = vector.load %arg2[%c0_8, %11, %c0_9, %c0_10] : memref<1x8x2x128xbf16, #tpu.memory_space<vmem>>, vector<1x1x2x128xbf16>
    %13 = vector.shape_cast %12 : vector<1x1x2x128xbf16> to vector<2x128xbf16>
    %14 = arith.extf %13 : vector<2x128xbf16> to vector<2x128xf32>
    %15 = arith.truncf %9 : vector<2x32xf32> to vector<2x32xbf16>
    %cst = arith.constant dense<0.000000e+00> : vector<2x128xf32>
    %16 = tpu.matmul %15, %4, %cst {dimension_numbers = #tpu.dot_dimension_numbers<[1], [0], [0], [1], [0, 0, 1, 1], [], []>} : vector<2x32xbf16>, vector<32x128xbf16>, vector<2x128xf32> -> vector<2x128xf32>
    %17 = arith.addf %14, %16 : vector<2x128xf32>
    %18 = vector.extract_strided_slice %17 {offsets = [0, 0], sizes = [2, 32], strides = [1, 1]} : vector<2x128xf32> to vector<2x32xf32>
    %19 = arith.negf %18 : vector<2x32xf32>
    %20 = math.exp %19 : vector<2x32xf32>
    %cst_11 = arith.constant 1.000000e+00 : f32
    %21 = vector.broadcast %cst_11 : f32 to vector<2x32xf32>
    %22 = arith.addf %21, %20 : vector<2x32xf32>
    %23 = arith.divf %21, %22 : vector<2x32xf32>
    %24 = vector.extract_strided_slice %17 {offsets = [0, 32], sizes = [2, 32], strides = [1, 1]} : vector<2x128xf32> to vector<2x32xf32>
    %25 = arith.negf %24 : vector<2x32xf32>
    %26 = math.exp %25 : vector<2x32xf32>
    %cst_12 = arith.constant 1.000000e+00 : f32
    %27 = vector.broadcast %cst_12 : f32 to vector<2x32xf32>
    %28 = arith.addf %27, %26 : vector<2x32xf32>
    %29 = arith.divf %27, %28 : vector<2x32xf32>
    %30 = vector.extract_strided_slice %17 {offsets = [0, 64], sizes = [2, 32], strides = [1, 1]} : vector<2x128xf32> to vector<2x32xf32>
    %31 = math.tanh %30 : vector<2x32xf32>
    %32 = vector.extract_strided_slice %17 {offsets = [0, 96], sizes = [2, 32], strides = [1, 1]} : vector<2x128xf32> to vector<2x32xf32>
    %33 = arith.negf %32 : vector<2x32xf32>
    %34 = math.exp %33 : vector<2x32xf32>
    %cst_13 = arith.constant 1.000000e+00 : f32
    %35 = vector.broadcast %cst_13 : f32 to vector<2x32xf32>
    %36 = arith.addf %35, %34 : vector<2x32xf32>
    %37 = arith.divf %35, %36 : vector<2x32xf32>
    %38 = arith.mulf %29, %10 : vector<2x32xf32>
    %39 = arith.mulf %23, %31 : vector<2x32xf32>
    %40 = arith.addf %38, %39 : vector<2x32xf32>
    %41 = math.tanh %40 : vector<2x32xf32>
    %42 = arith.mulf %37, %41 : vector<2x32xf32>
    %43 = arith.index_cast %8 : i32 to index
    %c0_14 = arith.constant 0 : index
    %c0_15 = arith.constant 0 : index
    %44 = vector.load %arg4[%43, %c0_14, %c0_15] : memref<8x2x1xf32, #tpu.memory_space<vmem>>, vector<1x2x1xf32>
    %45 = vector.shape_cast %44 : vector<1x2x1xf32> to vector<2x1xf32>
    %46 = vector.broadcast %45 : vector<2x1xf32> to vector<2x32xf32>
    %47 = arith.mulf %46, %42 : vector<2x32xf32>
    %cst_16 = arith.constant 1.000000e+00 : f32
    %48 = vector.broadcast %cst_16 : f32 to vector<2x1xf32>
    %49 = arith.subf %48, %45 : vector<2x1xf32>
    %50 = vector.broadcast %49 : vector<2x1xf32> to vector<2x32xf32>
    %51 = arith.mulf %50, %9 : vector<2x32xf32>
    %52 = arith.addf %47, %51 : vector<2x32xf32>
    %53 = vector.broadcast %45 : vector<2x1xf32> to vector<2x32xf32>
    %54 = arith.mulf %53, %40 : vector<2x32xf32>
    %cst_17 = arith.constant 1.000000e+00 : f32
    %55 = vector.broadcast %cst_17 : f32 to vector<2x1xf32>
    %56 = arith.subf %55, %45 : vector<2x1xf32>
    %57 = vector.broadcast %56 : vector<2x1xf32> to vector<2x32xf32>
    %58 = arith.mulf %57, %10 : vector<2x32xf32>
    %59 = arith.addf %54, %58 : vector<2x32xf32>
    %c0_18 = arith.constant 0 : index
    %c0_19 = arith.constant 0 : index
    %60 = vector.load %arg8[%c0_18, %c0_19] : memref<2x32xf32, #tpu.memory_space<vmem>>, vector<2x32xf32>
    tpu.vector_store %arg8[%c0_18, %c0_19], %52 {strides = array<i32>} : memref<2x32xf32, #tpu.memory_space<vmem>>, vector<2x32xf32>,
    %c0_20 = arith.constant 0 : index
    %c0_21 = arith.constant 0 : index
    %61 = vector.load %arg9[%c0_20, %c0_21] : memref<2x32xf32, #tpu.memory_space<vmem>>, vector<2x32xf32>
    tpu.vector_store %arg9[%c0_20, %c0_21], %59 {strides = array<i32>} : memref<2x32xf32, #tpu.memory_space<vmem>>, vector<2x32xf32>,
    %62 = vector.broadcast %45 : vector<2x1xf32> to vector<2x32xf32>
    %63 = arith.mulf %62, %52 : vector<2x32xf32>
    %64 = arith.truncf %63 : vector<2x32xf32> to vector<2x32xbf16>
    %c0_22 = arith.constant 0 : index
    %65 = arith.index_cast %8 : i32 to index
    %c0_23 = arith.constant 0 : index
    %c0_24 = arith.constant 0 : index
    %66 = vector.load %arg5[%c0_22, %65, %c0_23, %c0_24] : memref<1x8x2x32xbf16, #tpu.memory_space<vmem>>, vector<1x1x2x32xbf16>
    %67 = vector.shape_cast %66 : vector<1x1x2x32xbf16> to vector<2x32xbf16>
    %68 = vector.shape_cast %64 : vector<2x32xbf16> to vector<1x1x2x32xbf16>
    tpu.vector_store %arg5[%c0_22, %65, %c0_23, %c0_24], %68 {strides = array<i32>} : memref<1x8x2x32xbf16, #tpu.memory_space<vmem>>, vector<1x1x2x32xbf16>,
    %c1_i32 = arith.constant 1 : i32
    %c2_i32_25 = arith.constant 2 : i32
    %69 = arith.muli %c2_i32_25, %c1_i32 : i32
    %c7_i32_26 = arith.constant 7 : i32
    %70 = arith.subi %c7_i32_26, %69 : i32
    %71 = arith.muli %arg0, %70 : i32
    %72 = arith.addi %c1_i32, %71 : i32
    %c0_27 = arith.constant 0 : index
    %c0_28 = arith.constant 0 : index
    %73 = vector.load %arg8[%c0_27, %c0_28] : memref<2x32xf32, #tpu.memory_space<vmem>>, vector<2x32xf32>
    %c0_29 = arith.constant 0 : index
    %c0_30 = arith.constant 0 : index
    %74 = vector.load %arg9[%c0_29, %c0_30] : memref<2x32xf32, #tpu.memory_space<vmem>>, vector<2x32xf32>
    %c0_31 = arith.constant 0 : index
    %75 = arith.index_cast %72 : i32 to index
    %c0_32 = arith.constant 0 : index
    %c0_33 = arith.constant 0 : index
    %76 = vector.load %arg2[%c0_31, %75, %c0_32, %c0_33] : memref<1x8x2x128xbf16, #tpu.memory_space<vmem>>, vector<1x1x2x128xbf16>
    %77 = vector.shape_cast %76 : vector<1x1x2x128xbf16> to vector<2x128xbf16>
    %78 = arith.extf %77 : vector<2x128xbf16> to vector<2x128xf32>
    %79 = arith.truncf %73 : vector<2x32xf32> to vector<2x32xbf16>
    %cst_34 = arith.constant dense<0.000000e+00> : vector<2x128xf32>
    %80 = tpu.matmul %79, %4, %cst_34 {dimension_numbers = #tpu.dot_dimension_numbers<[1], [0], [0], [1], [0, 0, 1, 1], [], []>} : vector<2x32xbf16>, vector<32x128xbf16>, vector<2x128xf32> -> vector<2x128xf32>
    %81 = arith.addf %78, %80 : vector<2x128xf32>
    %82 = vector.extract_strided_slice %81 {offsets = [0, 0], sizes = [2, 32], strides = [1, 1]} : vector<2x128xf32> to vector<2x32xf32>
    %83 = arith.negf %82 : vector<2x32xf32>
    %84 = math.exp %83 : vector<2x32xf32>
    %cst_35 = arith.constant 1.000000e+00 : f32
    %85 = vector.broadcast %cst_35 : f32 to vector<2x32xf32>
    %86 = arith.addf %85, %84 : vector<2x32xf32>
    %87 = arith.divf %85, %86 : vector<2x32xf32>
    %88 = vector.extract_strided_slice %81 {offsets = [0, 32], sizes = [2, 32], strides = [1, 1]} : vector<2x128xf32> to vector<2x32xf32>
    %89 = arith.negf %88 : vector<2x32xf32>
    %90 = math.exp %89 : vector<2x32xf32>
    %cst_36 = arith.constant 1.000000e+00 : f32
    %91 = vector.broadcast %cst_36 : f32 to vector<2x32xf32>
    %92 = arith.addf %91, %90 : vector<2x32xf32>
    %93 = arith.divf %91, %92 : vector<2x32xf32>
    %94 = vector.extract_strided_slice %81 {offsets = [0, 64], sizes = [2, 32], strides = [1, 1]} : vector<2x128xf32> to vector<2x32xf32>
    %95 = math.tanh %94 : vector<2x32xf32>
    %96 = vector.extract_strided_slice %81 {offsets = [0, 96], sizes = [2, 32], strides = [1, 1]} : vector<2x128xf32> to vector<2x32xf32>
    %97 = arith.negf %96 : vector<2x32xf32>
    %98 = math.exp %97 : vector<2x32xf32>
    %cst_37 = arith.constant 1.000000e+00 : f32
    %99 = vector.broadcast %cst_37 : f32 to vector<2x32xf32>
    %100 = arith.addf %99, %98 : vector<2x32xf32>
    %101 = arith.divf %99, %100 : vector<2x32xf32>
    %102 = arith.mulf %93, %74 : vector<2x32xf32>
    %103 = arith.mulf %87, %95 : vector<2x32xf32>
    %104 = arith.addf %102, %103 : vector<2x32xf32>
    %105 = math.tanh %104 : vector<2x32xf32>
    %106 = arith.mulf %101, %105 : vector<2x32xf32>
    %107 = arith.index_cast %72 : i32 to index
    %c0_38 = arith.constant 0 : index
    %c0_39 = arith.constant 0 : index
    %108 = vector.load %arg4[%107, %c0_38, %c0_39] : memref<8x2x1xf32, #tpu.memory_space<vmem>>, vector<1x2x1xf32>
    %109 = vector.shape_cast %108 : vector<1x2x1xf32> to vector<2x1xf32>
    %110 = vector.broadcast %109 : vector<2x1xf32> to vector<2x32xf32>
    %111 = arith.mulf %110, %106 : vector<2x32xf32>
    %cst_40 = arith.constant 1.000000e+00 : f32
    %112 = vector.broadcast %cst_40 : f32 to vector<2x1xf32>
    %113 = arith.subf %112, %109 : vector<2x1xf32>
    %114 = vector.broadcast %113 : vector<2x1xf32> to vector<2x32xf32>
    %115 = arith.mulf %114, %73 : vector<2x32xf32>
    %116 = arith.addf %111, %115 : vector<2x32xf32>
    %117 = vector.broadcast %109 : vector<2x1xf32> to vector<2x32xf32>
    %118 = arith.mulf %117, %104 : vector<2x32xf32>
    %cst_41 = arith.constant 1.000000e+00 : f32
    %119 = vector.broadcast %cst_41 : f32 to vector<2x1xf32>
    %120 = arith.subf %119, %109 : vector<2x1xf32>
    %121 = vector.broadcast %120 : vector<2x1xf32> to vector<2x32xf32>
    %122 = arith.mulf %121, %74 : vector<2x32xf32>
    %123 = arith.addf %118, %122 : vector<2x32xf32>
    %c0_42 = arith.constant 0 : index
    %c0_43 = arith.constant 0 : index
    %124 = vector.load %arg8[%c0_42, %c0_43] : memref<2x32xf32, #tpu.memory_space<vmem>>, vector<2x32xf32>
    tpu.vector_store %arg8[%c0_42, %c0_43], %116 {strides = array<i32>} : memref<2x32xf32, #tpu.memory_space<vmem>>, vector<2x32xf32>,
    %c0_44 = arith.constant 0 : index
    %c0_45 = arith.constant 0 : index
    %125 = vector.load %arg9[%c0_44, %c0_45] : memref<2x32xf32, #tpu.memory_space<vmem>>, vector<2x32xf32>
    tpu.vector_store %arg9[%c0_44, %c0_45], %123 {strides = array<i32>} : memref<2x32xf32, #tpu.memory_space<vmem>>, vector<2x32xf32>,
    %126 = vector.broadcast %109 : vector<2x1xf32> to vector<2x32xf32>
    %127 = arith.mulf %126, %116 : vector<2x32xf32>
    %128 = arith.truncf %127 : vector<2x32xf32> to vector<2x32xbf16>
    %c0_46 = arith.constant 0 : index
    %129 = arith.index_cast %72 : i32 to index
    %c0_47 = arith.constant 0 : index
    %c0_48 = arith.constant 0 : index
    %130 = vector.load %arg5[%c0_46, %129, %c0_47, %c0_48] : memref<1x8x2x32xbf16, #tpu.memory_space<vmem>>, vector<1x1x2x32xbf16>
    %131 = vector.shape_cast %130 : vector<1x1x2x32xbf16> to vector<2x32xbf16>
    %132 = vector.shape_cast %128 : vector<2x32xbf16> to vector<1x1x2x32xbf16>
    tpu.vector_store %arg5[%c0_46, %129, %c0_47, %c0_48], %132 {strides = array<i32>} : memref<1x8x2x32xbf16, #tpu.memory_space<vmem>>, vector<1x1x2x32xbf16>,
    %c2_i32_49 = arith.constant 2 : i32
    %c2_i32_50 = arith.constant 2 : i32
    %133 = arith.muli %c2_i32_50, %c2_i32_49 : i32
    %c7_i32_51 = arith.constant 7 : i32
    %134 = arith.subi %c7_i32_51, %133 : i32
    %135 = arith.muli %arg0, %134 : i32
    %136 = arith.addi %c2_i32_49, %135 : i32
    %c0_52 = arith.constant 0 : index
    %c0_53 = arith.constant 0 : index
    %137 = vector.load %arg8[%c0_52, %c0_53] : memref<2x32xf32, #tpu.memory_space<vmem>>, vector<2x32xf32>
    %c0_54 = arith.constant 0 : index
    %c0_55 = arith.constant 0 : index
    %138 = vector.load %arg9[%c0_54, %c0_55] : memref<2x32xf32, #tpu.memory_space<vmem>>, vector<2x32xf32>
    %c0_56 = arith.constant 0 : index
    %139 = arith.index_cast %136 : i32 to index
    %c0_57 = arith.constant 0 : index
    %c0_58 = arith.constant 0 : index
    %140 = vector.load %arg2[%c0_56, %139, %c0_57, %c0_58] : memref<1x8x2x128xbf16, #tpu.memory_space<vmem>>, vector<1x1x2x128xbf16>
    %141 = vector.shape_cast %140 : vector<1x1x2x128xbf16> to vector<2x128xbf16>
    %142 = arith.extf %141 : vector<2x128xbf16> to vector<2x128xf32>
    %143 = arith.truncf %137 : vector<2x32xf32> to vector<2x32xbf16>
    %cst_59 = arith.constant dense<0.000000e+00> : vector<2x128xf32>
    %144 = tpu.matmul %143, %4, %cst_59 {dimension_numbers = #tpu.dot_dimension_numbers<[1], [0], [0], [1], [0, 0, 1, 1], [], []>} : vector<2x32xbf16>, vector<32x128xbf16>, vector<2x128xf32> -> vector<2x128xf32>
    %145 = arith.addf %142, %144 : vector<2x128xf32>
    %146 = vector.extract_strided_slice %145 {offsets = [0, 0], sizes = [2, 32], strides = [1, 1]} : vector<2x128xf32> to vector<2x32xf32>
    %147 = arith.negf %146 : vector<2x32xf32>
    %148 = math.exp %147 : vector<2x32xf32>
    %cst_60 = arith.constant 1.000000e+00 : f32
    %149 = vector.broadcast %cst_60 : f32 to vector<2x32xf32>
    %150 = arith.addf %149, %148 : vector<2x32xf32>
    %151 = arith.divf %149, %150 : vector<2x32xf32>
    %152 = vector.extract_strided_slice %145 {offsets = [0, 32], sizes = [2, 32], strides = [1, 1]} : vector<2x128xf32> to vector<2x32xf32>
    %153 = arith.negf %152 : vector<2x32xf32>
    %154 = math.exp %153 : vector<2x32xf32>
    %cst_61 = arith.constant 1.000000e+00 : f32
    %155 = vector.broadcast %cst_61 : f32 to vector<2x32xf32>
    %156 = arith.addf %155, %154 : vector<2x32xf32>
    %157 = arith.divf %155, %156 : vector<2x32xf32>
    %158 = vector.extract_strided_slice %145 {offsets = [0, 64], sizes = [2, 32], strides = [1, 1]} : vector<2x128xf32> to vector<2x32xf32>
    %159 = math.tanh %158 : vector<2x32xf32>
    %160 = vector.extract_strided_slice %145 {offsets = [0, 96], sizes = [2, 32], strides = [1, 1]} : vector<2x128xf32> to vector<2x32xf32>
    %161 = arith.negf %160 : vector<2x32xf32>
    %162 = math.exp %161 : vector<2x32xf32>
    %cst_62 = arith.constant 1.000000e+00 : f32
    %163 = vector.broadcast %cst_62 : f32 to vector<2x32xf32>
    %164 = arith.addf %163, %162 : vector<2x32xf32>
    %165 = arith.divf %163, %164 : vector<2x32xf32>
    %166 = arith.mulf %157, %138 : vector<2x32xf32>
    %167 = arith.mulf %151, %159 : vector<2x32xf32>
    %168 = arith.addf %166, %167 : vector<2x32xf32>
    %169 = math.tanh %168 : vector<2x32xf32>
    %170 = arith.mulf %165, %169 : vector<2x32xf32>
    %171 = arith.index_cast %136 : i32 to index
    %c0_63 = arith.constant 0 : index
    %c0_64 = arith.constant 0 : index
    %172 = vector.load %arg4[%171, %c0_63, %c0_64] : memref<8x2x1xf32, #tpu.memory_space<vmem>>, vector<1x2x1xf32>
    %173 = vector.shape_cast %172 : vector<1x2x1xf32> to vector<2x1xf32>
    %174 = vector.broadcast %173 : vector<2x1xf32> to vector<2x32xf32>
    %175 = arith.mulf %174, %170 : vector<2x32xf32>
    %cst_65 = arith.constant 1.000000e+00 : f32
    %176 = vector.broadcast %cst_65 : f32 to vector<2x1xf32>
    %177 = arith.subf %176, %173 : vector<2x1xf32>
    %178 = vector.broadcast %177 : vector<2x1xf32> to vector<2x32xf32>
    %179 = arith.mulf %178, %137 : vector<2x32xf32>
    %180 = arith.addf %175, %179 : vector<2x32xf32>
    %181 = vector.broadcast %173 : vector<2x1xf32> to vector<2x32xf32>
    %182 = arith.mulf %181, %168 : vector<2x32xf32>
    %cst_66 = arith.constant 1.000000e+00 : f32
    %183 = vector.broadcast %cst_66 : f32 to vector<2x1xf32>
    %184 = arith.subf %183, %173 : vector<2x1xf32>
    %185 = vector.broadcast %184 : vector<2x1xf32> to vector<2x32xf32>
    %186 = arith.mulf %185, %138 : vector<2x32xf32>
    %187 = arith.addf %182, %186 : vector<2x32xf32>
    %c0_67 = arith.constant 0 : index
    %c0_68 = arith.constant 0 : index
    %188 = vector.load %arg8[%c0_67, %c0_68] : memref<2x32xf32, #tpu.memory_space<vmem>>, vector<2x32xf32>
    tpu.vector_store %arg8[%c0_67, %c0_68], %180 {strides = array<i32>} : memref<2x32xf32, #tpu.memory_space<vmem>>, vector<2x32xf32>,
    %c0_69 = arith.constant 0 : index
    %c0_70 = arith.constant 0 : index
    %189 = vector.load %arg9[%c0_69, %c0_70] : memref<2x32xf32, #tpu.memory_space<vmem>>, vector<2x32xf32>
    tpu.vector_store %arg9[%c0_69, %c0_70], %187 {strides = array<i32>} : memref<2x32xf32, #tpu.memory_space<vmem>>, vector<2x32xf32>,
    %190 = vector.broadcast %173 : vector<2x1xf32> to vector<2x32xf32>
    %191 = arith.mulf %190, %180 : vector<2x32xf32>
    %192 = arith.truncf %191 : vector<2x32xf32> to vector<2x32xbf16>
    %c0_71 = arith.constant 0 : index
    %193 = arith.index_cast %136 : i32 to index
    %c0_72 = arith.constant 0 : index
    %c0_73 = arith.constant 0 : index
    %194 = vector.load %arg5[%c0_71, %193, %c0_72, %c0_73] : memref<1x8x2x32xbf16, #tpu.memory_space<vmem>>, vector<1x1x2x32xbf16>
    %195 = vector.shape_cast %194 : vector<1x1x2x32xbf16> to vector<2x32xbf16>
    %196 = vector.shape_cast %192 : vector<2x32xbf16> to vector<1x1x2x32xbf16>
    tpu.vector_store %arg5[%c0_71, %193, %c0_72, %c0_73], %196 {strides = array<i32>} : memref<1x8x2x32xbf16, #tpu.memory_space<vmem>>, vector<1x1x2x32xbf16>,
    %c3_i32 = arith.constant 3 : i32
    %c2_i32_74 = arith.constant 2 : i32
    %197 = arith.muli %c2_i32_74, %c3_i32 : i32
    %c7_i32_75 = arith.constant 7 : i32
    %198 = arith.subi %c7_i32_75, %197 : i32
    %199 = arith.muli %arg0, %198 : i32
    %200 = arith.addi %c3_i32, %199 : i32
    %c0_76 = arith.constant 0 : index
    %c0_77 = arith.constant 0 : index
    %201 = vector.load %arg8[%c0_76, %c0_77] : memref<2x32xf32, #tpu.memory_space<vmem>>, vector<2x32xf32>
    %c0_78 = arith.constant 0 : index
    %c0_79 = arith.constant 0 : index
    %202 = vector.load %arg9[%c0_78, %c0_79] : memref<2x32xf32, #tpu.memory_space<vmem>>, vector<2x32xf32>
    %c0_80 = arith.constant 0 : index
    %203 = arith.index_cast %200 : i32 to index
    %c0_81 = arith.constant 0 : index
    %c0_82 = arith.constant 0 : index
    %204 = vector.load %arg2[%c0_80, %203, %c0_81, %c0_82] : memref<1x8x2x128xbf16, #tpu.memory_space<vmem>>, vector<1x1x2x128xbf16>
    %205 = vector.shape_cast %204 : vector<1x1x2x128xbf16> to vector<2x128xbf16>
    %206 = arith.extf %205 : vector<2x128xbf16> to vector<2x128xf32>
    %207 = arith.truncf %201 : vector<2x32xf32> to vector<2x32xbf16>
    %cst_83 = arith.constant dense<0.000000e+00> : vector<2x128xf32>
    %208 = tpu.matmul %207, %4, %cst_83 {dimension_numbers = #tpu.dot_dimension_numbers<[1], [0], [0], [1], [0, 0, 1, 1], [], []>} : vector<2x32xbf16>, vector<32x128xbf16>, vector<2x128xf32> -> vector<2x128xf32>
    %209 = arith.addf %206, %208 : vector<2x128xf32>
    %210 = vector.extract_strided_slice %209 {offsets = [0, 0], sizes = [2, 32], strides = [1, 1]} : vector<2x128xf32> to vector<2x32xf32>
    %211 = arith.negf %210 : vector<2x32xf32>
    %212 = math.exp %211 : vector<2x32xf32>
    %cst_84 = arith.constant 1.000000e+00 : f32
    %213 = vector.broadcast %cst_84 : f32 to vector<2x32xf32>
    %214 = arith.addf %213, %212 : vector<2x32xf32>
    %215 = arith.divf %213, %214 : vector<2x32xf32>
    %216 = vector.extract_strided_slice %209 {offsets = [0, 32], sizes = [2, 32], strides = [1, 1]} : vector<2x128xf32> to vector<2x32xf32>
    %217 = arith.negf %216 : vector<2x32xf32>
    %218 = math.exp %217 : vector<2x32xf32>
    %cst_85 = arith.constant 1.000000e+00 : f32
    %219 = vector.broadcast %cst_85 : f32 to vector<2x32xf32>
    %220 = arith.addf %219, %218 : vector<2x32xf32>
    %221 = arith.divf %219, %220 : vector<2x32xf32>
    %222 = vector.extract_strided_slice %209 {offsets = [0, 64], sizes = [2, 32], strides = [1, 1]} : vector<2x128xf32> to vector<2x32xf32>
    %223 = math.tanh %222 : vector<2x32xf32>
    %224 = vector.extract_strided_slice %209 {offsets = [0, 96], sizes = [2, 32], strides = [1, 1]} : vector<2x128xf32> to vector<2x32xf32>
    %225 = arith.negf %224 : vector<2x32xf32>
    %226 = math.exp %225 : vector<2x32xf32>
    %cst_86 = arith.constant 1.000000e+00 : f32
    %227 = vector.broadcast %cst_86 : f32 to vector<2x32xf32>
    %228 = arith.addf %227, %226 : vector<2x32xf32>
    %229 = arith.divf %227, %228 : vector<2x32xf32>
    %230 = arith.mulf %221, %202 : vector<2x32xf32>
    %231 = arith.mulf %215, %223 : vector<2x32xf32>
    %232 = arith.addf %230, %231 : vector<2x32xf32>
    %233 = math.tanh %232 : vector<2x32xf32>
    %234 = arith.mulf %229, %233 : vector<2x32xf32>
    %235 = arith.index_cast %200 : i32 to index
    %c0_87 = arith.constant 0 : index
    %c0_88 = arith.constant 0 : index
    %236 = vector.load %arg4[%235, %c0_87, %c0_88] : memref<8x2x1xf32, #tpu.memory_space<vmem>>, vector<1x2x1xf32>
    %237 = vector.shape_cast %236 : vector<1x2x1xf32> to vector<2x1xf32>
    %238 = vector.broadcast %237 : vector<2x1xf32> to vector<2x32xf32>
    %239 = arith.mulf %238, %234 : vector<2x32xf32>
    %cst_89 = arith.constant 1.000000e+00 : f32
    %240 = vector.broadcast %cst_89 : f32 to vector<2x1xf32>
    %241 = arith.subf %240, %237 : vector<2x1xf32>
    %242 = vector.broadcast %241 : vector<2x1xf32> to vector<2x32xf32>
    %243 = arith.mulf %242, %201 : vector<2x32xf32>
    %244 = arith.addf %239, %243 : vector<2x32xf32>
    %245 = vector.broadcast %237 : vector<2x1xf32> to vector<2x32xf32>
    %246 = arith.mulf %245, %232 : vector<2x32xf32>
    %cst_90 = arith.constant 1.000000e+00 : f32
    %247 = vector.broadcast %cst_90 : f32 to vector<2x1xf32>
    %248 = arith.subf %247, %237 : vector<2x1xf32>
    %249 = vector.broadcast %248 : vector<2x1xf32> to vector<2x32xf32>
    %250 = arith.mulf %249, %202 : vector<2x32xf32>
    %251 = arith.addf %246, %250 : vector<2x32xf32>
    %c0_91 = arith.constant 0 : index
    %c0_92 = arith.constant 0 : index
    %252 = vector.load %arg8[%c0_91, %c0_92] : memref<2x32xf32, #tpu.memory_space<vmem>>, vector<2x32xf32>
    tpu.vector_store %arg8[%c0_91, %c0_92], %244 {strides = array<i32>} : memref<2x32xf32, #tpu.memory_space<vmem>>, vector<2x32xf32>,
    %c0_93 = arith.constant 0 : index
    %c0_94 = arith.constant 0 : index
    %253 = vector.load %arg9[%c0_93, %c0_94] : memref<2x32xf32, #tpu.memory_space<vmem>>, vector<2x32xf32>
    tpu.vector_store %arg9[%c0_93, %c0_94], %251 {strides = array<i32>} : memref<2x32xf32, #tpu.memory_space<vmem>>, vector<2x32xf32>,
    %254 = vector.broadcast %237 : vector<2x1xf32> to vector<2x32xf32>
    %255 = arith.mulf %254, %244 : vector<2x32xf32>
    %256 = arith.truncf %255 : vector<2x32xf32> to vector<2x32xbf16>
    %c0_95 = arith.constant 0 : index
    %257 = arith.index_cast %200 : i32 to index
    %c0_96 = arith.constant 0 : index
    %c0_97 = arith.constant 0 : index
    %258 = vector.load %arg5[%c0_95, %257, %c0_96, %c0_97] : memref<1x8x2x32xbf16, #tpu.memory_space<vmem>>, vector<1x1x2x32xbf16>
    %259 = vector.shape_cast %258 : vector<1x1x2x32xbf16> to vector<2x32xbf16>
    %260 = vector.shape_cast %256 : vector<2x32xbf16> to vector<1x1x2x32xbf16>
    tpu.vector_store %arg5[%c0_95, %257, %c0_96, %c0_97], %260 {strides = array<i32>} : memref<1x8x2x32xbf16, #tpu.memory_space<vmem>>, vector<1x1x2x32xbf16>,
    %c4_i32 = arith.constant 4 : i32
    %c2_i32_98 = arith.constant 2 : i32
    %261 = arith.muli %c2_i32_98, %c4_i32 : i32
    %c7_i32_99 = arith.constant 7 : i32
    %262 = arith.subi %c7_i32_99, %261 : i32
    %263 = arith.muli %arg0, %262 : i32
    %264 = arith.addi %c4_i32, %263 : i32
    %c0_100 = arith.constant 0 : index
    %c0_101 = arith.constant 0 : index
    %265 = vector.load %arg8[%c0_100, %c0_101] : memref<2x32xf32, #tpu.memory_space<vmem>>, vector<2x32xf32>
    %c0_102 = arith.constant 0 : index
    %c0_103 = arith.constant 0 : index
    %266 = vector.load %arg9[%c0_102, %c0_103] : memref<2x32xf32, #tpu.memory_space<vmem>>, vector<2x32xf32>
    %c0_104 = arith.constant 0 : index
    %267 = arith.index_cast %264 : i32 to index
    %c0_105 = arith.constant 0 : index
    %c0_106 = arith.constant 0 : index
    %268 = vector.load %arg2[%c0_104, %267, %c0_105, %c0_106] : memref<1x8x2x128xbf16, #tpu.memory_space<vmem>>, vector<1x1x2x128xbf16>
    %269 = vector.shape_cast %268 : vector<1x1x2x128xbf16> to vector<2x128xbf16>
    %270 = arith.extf %269 : vector<2x128xbf16> to vector<2x128xf32>
    %271 = arith.truncf %265 : vector<2x32xf32> to vector<2x32xbf16>
    %cst_107 = arith.constant dense<0.000000e+00> : vector<2x128xf32>
    %272 = tpu.matmul %271, %4, %cst_107 {dimension_numbers = #tpu.dot_dimension_numbers<[1], [0], [0], [1], [0, 0, 1, 1], [], []>} : vector<2x32xbf16>, vector<32x128xbf16>, vector<2x128xf32> -> vector<2x128xf32>
    %273 = arith.addf %270, %272 : vector<2x128xf32>
    %274 = vector.extract_strided_slice %273 {offsets = [0, 0], sizes = [2, 32], strides = [1, 1]} : vector<2x128xf32> to vector<2x32xf32>
    %275 = arith.negf %274 : vector<2x32xf32>
    %276 = math.exp %275 : vector<2x32xf32>
    %cst_108 = arith.constant 1.000000e+00 : f32
    %277 = vector.broadcast %cst_108 : f32 to vector<2x32xf32>
    %278 = arith.addf %277, %276 : vector<2x32xf32>
    %279 = arith.divf %277, %278 : vector<2x32xf32>
    %280 = vector.extract_strided_slice %273 {offsets = [0, 32], sizes = [2, 32], strides = [1, 1]} : vector<2x128xf32> to vector<2x32xf32>
    %281 = arith.negf %280 : vector<2x32xf32>
    %282 = math.exp %281 : vector<2x32xf32>
    %cst_109 = arith.constant 1.000000e+00 : f32
    %283 = vector.broadcast %cst_109 : f32 to vector<2x32xf32>
    %284 = arith.addf %283, %282 : vector<2x32xf32>
    %285 = arith.divf %283, %284 : vector<2x32xf32>
    %286 = vector.extract_strided_slice %273 {offsets = [0, 64], sizes = [2, 32], strides = [1, 1]} : vector<2x128xf32> to vector<2x32xf32>
    %287 = math.tanh %286 : vector<2x32xf32>
    %288 = vector.extract_strided_slice %273 {offsets = [0, 96], sizes = [2, 32], strides = [1, 1]} : vector<2x128xf32> to vector<2x32xf32>
    %289 = arith.negf %288 : vector<2x32xf32>
    %290 = math.exp %289 : vector<2x32xf32>
    %cst_110 = arith.constant 1.000000e+00 : f32
    %291 = vector.broadcast %cst_110 : f32 to vector<2x32xf32>
    %292 = arith.addf %291, %290 : vector<2x32xf32>
    %293 = arith.divf %291, %292 : vector<2x32xf32>
    %294 = arith.mulf %285, %266 : vector<2x32xf32>
    %295 = arith.mulf %279, %287 : vector<2x32xf32>
    %296 = arith.addf %294, %295 : vector<2x32xf32>
    %297 = math.tanh %296 : vector<2x32xf32>
    %298 = arith.mulf %293, %297 : vector<2x32xf32>
    %299 = arith.index_cast %264 : i32 to index
    %c0_111 = arith.constant 0 : index
    %c0_112 = arith.constant 0 : index
    %300 = vector.load %arg4[%299, %c0_111, %c0_112] : memref<8x2x1xf32, #tpu.memory_space<vmem>>, vector<1x2x1xf32>
    %301 = vector.shape_cast %300 : vector<1x2x1xf32> to vector<2x1xf32>
    %302 = vector.broadcast %301 : vector<2x1xf32> to vector<2x32xf32>
    %303 = arith.mulf %302, %298 : vector<2x32xf32>
    %cst_113 = arith.constant 1.000000e+00 : f32
    %304 = vector.broadcast %cst_113 : f32 to vector<2x1xf32>
    %305 = arith.subf %304, %301 : vector<2x1xf32>
    %306 = vector.broadcast %305 : vector<2x1xf32> to vector<2x32xf32>
    %307 = arith.mulf %306, %265 : vector<2x32xf32>
    %308 = arith.addf %303, %307 : vector<2x32xf32>
    %309 = vector.broadcast %301 : vector<2x1xf32> to vector<2x32xf32>
    %310 = arith.mulf %309, %296 : vector<2x32xf32>
    %cst_114 = arith.constant 1.000000e+00 : f32
    %311 = vector.broadcast %cst_114 : f32 to vector<2x1xf32>
    %312 = arith.subf %311, %301 : vector<2x1xf32>
    %313 = vector.broadcast %312 : vector<2x1xf32> to vector<2x32xf32>
    %314 = arith.mulf %313, %266 : vector<2x32xf32>
    %315 = arith.addf %310, %314 : vector<2x32xf32>
    %c0_115 = arith.constant 0 : index
    %c0_116 = arith.constant 0 : index
    %316 = vector.load %arg8[%c0_115, %c0_116] : memref<2x32xf32, #tpu.memory_space<vmem>>, vector<2x32xf32>
    tpu.vector_store %arg8[%c0_115, %c0_116], %308 {strides = array<i32>} : memref<2x32xf32, #tpu.memory_space<vmem>>, vector<2x32xf32>,
    %c0_117 = arith.constant 0 : index
    %c0_118 = arith.constant 0 : index
    %317 = vector.load %arg9[%c0_117, %c0_118] : memref<2x32xf32, #tpu.memory_space<vmem>>, vector<2x32xf32>
    tpu.vector_store %arg9[%c0_117, %c0_118], %315 {strides = array<i32>} : memref<2x32xf32, #tpu.memory_space<vmem>>, vector<2x32xf32>,
    %318 = vector.broadcast %301 : vector<2x1xf32> to vector<2x32xf32>
    %319 = arith.mulf %318, %308 : vector<2x32xf32>
    %320 = arith.truncf %319 : vector<2x32xf32> to vector<2x32xbf16>
    %c0_119 = arith.constant 0 : index
    %321 = arith.index_cast %264 : i32 to index
    %c0_120 = arith.constant 0 : index
    %c0_121 = arith.constant 0 : index
    %322 = vector.load %arg5[%c0_119, %321, %c0_120, %c0_121] : memref<1x8x2x32xbf16, #tpu.memory_space<vmem>>, vector<1x1x2x32xbf16>
    %323 = vector.shape_cast %322 : vector<1x1x2x32xbf16> to vector<2x32xbf16>
    %324 = vector.shape_cast %320 : vector<2x32xbf16> to vector<1x1x2x32xbf16>
    tpu.vector_store %arg5[%c0_119, %321, %c0_120, %c0_121], %324 {strides = array<i32>} : memref<1x8x2x32xbf16, #tpu.memory_space<vmem>>, vector<1x1x2x32xbf16>,
    %c5_i32 = arith.constant 5 : i32
    %c2_i32_122 = arith.constant 2 : i32
    %325 = arith.muli %c2_i32_122, %c5_i32 : i32
    %c7_i32_123 = arith.constant 7 : i32
    %326 = arith.subi %c7_i32_123, %325 : i32
    %327 = arith.muli %arg0, %326 : i32
    %328 = arith.addi %c5_i32, %327 : i32
    %c0_124 = arith.constant 0 : index
    %c0_125 = arith.constant 0 : index
    %329 = vector.load %arg8[%c0_124, %c0_125] : memref<2x32xf32, #tpu.memory_space<vmem>>, vector<2x32xf32>
    %c0_126 = arith.constant 0 : index
    %c0_127 = arith.constant 0 : index
    %330 = vector.load %arg9[%c0_126, %c0_127] : memref<2x32xf32, #tpu.memory_space<vmem>>, vector<2x32xf32>
    %c0_128 = arith.constant 0 : index
    %331 = arith.index_cast %328 : i32 to index
    %c0_129 = arith.constant 0 : index
    %c0_130 = arith.constant 0 : index
    %332 = vector.load %arg2[%c0_128, %331, %c0_129, %c0_130] : memref<1x8x2x128xbf16, #tpu.memory_space<vmem>>, vector<1x1x2x128xbf16>
    %333 = vector.shape_cast %332 : vector<1x1x2x128xbf16> to vector<2x128xbf16>
    %334 = arith.extf %333 : vector<2x128xbf16> to vector<2x128xf32>
    %335 = arith.truncf %329 : vector<2x32xf32> to vector<2x32xbf16>
    %cst_131 = arith.constant dense<0.000000e+00> : vector<2x128xf32>
    %336 = tpu.matmul %335, %4, %cst_131 {dimension_numbers = #tpu.dot_dimension_numbers<[1], [0], [0], [1], [0, 0, 1, 1], [], []>} : vector<2x32xbf16>, vector<32x128xbf16>, vector<2x128xf32> -> vector<2x128xf32>
    %337 = arith.addf %334, %336 : vector<2x128xf32>
    %338 = vector.extract_strided_slice %337 {offsets = [0, 0], sizes = [2, 32], strides = [1, 1]} : vector<2x128xf32> to vector<2x32xf32>
    %339 = arith.negf %338 : vector<2x32xf32>
    %340 = math.exp %339 : vector<2x32xf32>
    %cst_132 = arith.constant 1.000000e+00 : f32
    %341 = vector.broadcast %cst_132 : f32 to vector<2x32xf32>
    %342 = arith.addf %341, %340 : vector<2x32xf32>
    %343 = arith.divf %341, %342 : vector<2x32xf32>
    %344 = vector.extract_strided_slice %337 {offsets = [0, 32], sizes = [2, 32], strides = [1, 1]} : vector<2x128xf32> to vector<2x32xf32>
    %345 = arith.negf %344 : vector<2x32xf32>
    %346 = math.exp %345 : vector<2x32xf32>
    %cst_133 = arith.constant 1.000000e+00 : f32
    %347 = vector.broadcast %cst_133 : f32 to vector<2x32xf32>
    %348 = arith.addf %347, %346 : vector<2x32xf32>
    %349 = arith.divf %347, %348 : vector<2x32xf32>
    %350 = vector.extract_strided_slice %337 {offsets = [0, 64], sizes = [2, 32], strides = [1, 1]} : vector<2x128xf32> to vector<2x32xf32>
    %351 = math.tanh %350 : vector<2x32xf32>
    %352 = vector.extract_strided_slice %337 {offsets = [0, 96], sizes = [2, 32], strides = [1, 1]} : vector<2x128xf32> to vector<2x32xf32>
    %353 = arith.negf %352 : vector<2x32xf32>
    %354 = math.exp %353 : vector<2x32xf32>
    %cst_134 = arith.constant 1.000000e+00 : f32
    %355 = vector.broadcast %cst_134 : f32 to vector<2x32xf32>
    %356 = arith.addf %355, %354 : vector<2x32xf32>
    %357 = arith.divf %355, %356 : vector<2x32xf32>
    %358 = arith.mulf %349, %330 : vector<2x32xf32>
    %359 = arith.mulf %343, %351 : vector<2x32xf32>
    %360 = arith.addf %358, %359 : vector<2x32xf32>
    %361 = math.tanh %360 : vector<2x32xf32>
    %362 = arith.mulf %357, %361 : vector<2x32xf32>
    %363 = arith.index_cast %328 : i32 to index
    %c0_135 = arith.constant 0 : index
    %c0_136 = arith.constant 0 : index
    %364 = vector.load %arg4[%363, %c0_135, %c0_136] : memref<8x2x1xf32, #tpu.memory_space<vmem>>, vector<1x2x1xf32>
    %365 = vector.shape_cast %364 : vector<1x2x1xf32> to vector<2x1xf32>
    %366 = vector.broadcast %365 : vector<2x1xf32> to vector<2x32xf32>
    %367 = arith.mulf %366, %362 : vector<2x32xf32>
    %cst_137 = arith.constant 1.000000e+00 : f32
    %368 = vector.broadcast %cst_137 : f32 to vector<2x1xf32>
    %369 = arith.subf %368, %365 : vector<2x1xf32>
    %370 = vector.broadcast %369 : vector<2x1xf32> to vector<2x32xf32>
    %371 = arith.mulf %370, %329 : vector<2x32xf32>
    %372 = arith.addf %367, %371 : vector<2x32xf32>
    %373 = vector.broadcast %365 : vector<2x1xf32> to vector<2x32xf32>
    %374 = arith.mulf %373, %360 : vector<2x32xf32>
    %cst_138 = arith.constant 1.000000e+00 : f32
    %375 = vector.broadcast %cst_138 : f32 to vector<2x1xf32>
    %376 = arith.subf %375, %365 : vector<2x1xf32>
    %377 = vector.broadcast %376 : vector<2x1xf32> to vector<2x32xf32>
    %378 = arith.mulf %377, %330 : vector<2x32xf32>
    %379 = arith.addf %374, %378 : vector<2x32xf32>
    %c0_139 = arith.constant 0 : index
    %c0_140 = arith.constant 0 : index
    %380 = vector.load %arg8[%c0_139, %c0_140] : memref<2x32xf32, #tpu.memory_space<vmem>>, vector<2x32xf32>
    tpu.vector_store %arg8[%c0_139, %c0_140], %372 {strides = array<i32>} : memref<2x32xf32, #tpu.memory_space<vmem>>, vector<2x32xf32>,
    %c0_141 = arith.constant 0 : index
    %c0_142 = arith.constant 0 : index
    %381 = vector.load %arg9[%c0_141, %c0_142] : memref<2x32xf32, #tpu.memory_space<vmem>>, vector<2x32xf32>
    tpu.vector_store %arg9[%c0_141, %c0_142], %379 {strides = array<i32>} : memref<2x32xf32, #tpu.memory_space<vmem>>, vector<2x32xf32>,
    %382 = vector.broadcast %365 : vector<2x1xf32> to vector<2x32xf32>
    %383 = arith.mulf %382, %372 : vector<2x32xf32>
    %384 = arith.truncf %383 : vector<2x32xf32> to vector<2x32xbf16>
    %c0_143 = arith.constant 0 : index
    %385 = arith.index_cast %328 : i32 to index
    %c0_144 = arith.constant 0 : index
    %c0_145 = arith.constant 0 : index
    %386 = vector.load %arg5[%c0_143, %385, %c0_144, %c0_145] : memref<1x8x2x32xbf16, #tpu.memory_space<vmem>>, vector<1x1x2x32xbf16>
    %387 = vector.shape_cast %386 : vector<1x1x2x32xbf16> to vector<2x32xbf16>
    %388 = vector.shape_cast %384 : vector<2x32xbf16> to vector<1x1x2x32xbf16>
    tpu.vector_store %arg5[%c0_143, %385, %c0_144, %c0_145], %388 {strides = array<i32>} : memref<1x8x2x32xbf16, #tpu.memory_space<vmem>>, vector<1x1x2x32xbf16>,
    %c6_i32 = arith.constant 6 : i32
    %c2_i32_146 = arith.constant 2 : i32
    %389 = arith.muli %c2_i32_146, %c6_i32 : i32
    %c7_i32_147 = arith.constant 7 : i32
    %390 = arith.subi %c7_i32_147, %389 : i32
    %391 = arith.muli %arg0, %390 : i32
    %392 = arith.addi %c6_i32, %391 : i32
    %c0_148 = arith.constant 0 : index
    %c0_149 = arith.constant 0 : index
    %393 = vector.load %arg8[%c0_148, %c0_149] : memref<2x32xf32, #tpu.memory_space<vmem>>, vector<2x32xf32>
    %c0_150 = arith.constant 0 : index
    %c0_151 = arith.constant 0 : index
    %394 = vector.load %arg9[%c0_150, %c0_151] : memref<2x32xf32, #tpu.memory_space<vmem>>, vector<2x32xf32>
    %c0_152 = arith.constant 0 : index
    %395 = arith.index_cast %392 : i32 to index
    %c0_153 = arith.constant 0 : index
    %c0_154 = arith.constant 0 : index
    %396 = vector.load %arg2[%c0_152, %395, %c0_153, %c0_154] : memref<1x8x2x128xbf16, #tpu.memory_space<vmem>>, vector<1x1x2x128xbf16>
    %397 = vector.shape_cast %396 : vector<1x1x2x128xbf16> to vector<2x128xbf16>
    %398 = arith.extf %397 : vector<2x128xbf16> to vector<2x128xf32>
    %399 = arith.truncf %393 : vector<2x32xf32> to vector<2x32xbf16>
    %cst_155 = arith.constant dense<0.000000e+00> : vector<2x128xf32>
    %400 = tpu.matmul %399, %4, %cst_155 {dimension_numbers = #tpu.dot_dimension_numbers<[1], [0], [0], [1], [0, 0, 1, 1], [], []>} : vector<2x32xbf16>, vector<32x128xbf16>, vector<2x128xf32> -> vector<2x128xf32>
    %401 = arith.addf %398, %400 : vector<2x128xf32>
    %402 = vector.extract_strided_slice %401 {offsets = [0, 0], sizes = [2, 32], strides = [1, 1]} : vector<2x128xf32> to vector<2x32xf32>
    %403 = arith.negf %402 : vector<2x32xf32>
    %404 = math.exp %403 : vector<2x32xf32>
    %cst_156 = arith.constant 1.000000e+00 : f32
    %405 = vector.broadcast %cst_156 : f32 to vector<2x32xf32>
    %406 = arith.addf %405, %404 : vector<2x32xf32>
    %407 = arith.divf %405, %406 : vector<2x32xf32>
    %408 = vector.extract_strided_slice %401 {offsets = [0, 32], sizes = [2, 32], strides = [1, 1]} : vector<2x128xf32> to vector<2x32xf32>
    %409 = arith.negf %408 : vector<2x32xf32>
    %410 = math.exp %409 : vector<2x32xf32>
    %cst_157 = arith.constant 1.000000e+00 : f32
    %411 = vector.broadcast %cst_157 : f32 to vector<2x32xf32>
    %412 = arith.addf %411, %410 : vector<2x32xf32>
    %413 = arith.divf %411, %412 : vector<2x32xf32>
    %414 = vector.extract_strided_slice %401 {offsets = [0, 64], sizes = [2, 32], strides = [1, 1]} : vector<2x128xf32> to vector<2x32xf32>
    %415 = math.tanh %414 : vector<2x32xf32>
    %416 = vector.extract_strided_slice %401 {offsets = [0, 96], sizes = [2, 32], strides = [1, 1]} : vector<2x128xf32> to vector<2x32xf32>
    %417 = arith.negf %416 : vector<2x32xf32>
    %418 = math.exp %417 : vector<2x32xf32>
    %cst_158 = arith.constant 1.000000e+00 : f32
    %419 = vector.broadcast %cst_158 : f32 to vector<2x32xf32>
    %420 = arith.addf %419, %418 : vector<2x32xf32>
    %421 = arith.divf %419, %420 : vector<2x32xf32>
    %422 = arith.mulf %413, %394 : vector<2x32xf32>
    %423 = arith.mulf %407, %415 : vector<2x32xf32>
    %424 = arith.addf %422, %423 : vector<2x32xf32>
    %425 = math.tanh %424 : vector<2x32xf32>
    %426 = arith.mulf %421, %425 : vector<2x32xf32>
    %427 = arith.index_cast %392 : i32 to index
    %c0_159 = arith.constant 0 : index
    %c0_160 = arith.constant 0 : index
    %428 = vector.load %arg4[%427, %c0_159, %c0_160] : memref<8x2x1xf32, #tpu.memory_space<vmem>>, vector<1x2x1xf32>
    %429 = vector.shape_cast %428 : vector<1x2x1xf32> to vector<2x1xf32>
    %430 = vector.broadcast %429 : vector<2x1xf32> to vector<2x32xf32>
    %431 = arith.mulf %430, %426 : vector<2x32xf32>
    %cst_161 = arith.constant 1.000000e+00 : f32
    %432 = vector.broadcast %cst_161 : f32 to vector<2x1xf32>
    %433 = arith.subf %432, %429 : vector<2x1xf32>
    %434 = vector.broadcast %433 : vector<2x1xf32> to vector<2x32xf32>
    %435 = arith.mulf %434, %393 : vector<2x32xf32>
    %436 = arith.addf %431, %435 : vector<2x32xf32>
    %437 = vector.broadcast %429 : vector<2x1xf32> to vector<2x32xf32>
    %438 = arith.mulf %437, %424 : vector<2x32xf32>
    %cst_162 = arith.constant 1.000000e+00 : f32
    %439 = vector.broadcast %cst_162 : f32 to vector<2x1xf32>
    %440 = arith.subf %439, %429 : vector<2x1xf32>
    %441 = vector.broadcast %440 : vector<2x1xf32> to vector<2x32xf32>
    %442 = arith.mulf %441, %394 : vector<2x32xf32>
    %443 = arith.addf %438, %442 : vector<2x32xf32>
    %c0_163 = arith.constant 0 : index
    %c0_164 = arith.constant 0 : index
    %444 = vector.load %arg8[%c0_163, %c0_164] : memref<2x32xf32, #tpu.memory_space<vmem>>, vector<2x32xf32>
    tpu.vector_store %arg8[%c0_163, %c0_164], %436 {strides = array<i32>} : memref<2x32xf32, #tpu.memory_space<vmem>>, vector<2x32xf32>,
    %c0_165 = arith.constant 0 : index
    %c0_166 = arith.constant 0 : index
    %445 = vector.load %arg9[%c0_165, %c0_166] : memref<2x32xf32, #tpu.memory_space<vmem>>, vector<2x32xf32>
    tpu.vector_store %arg9[%c0_165, %c0_166], %443 {strides = array<i32>} : memref<2x32xf32, #tpu.memory_space<vmem>>, vector<2x32xf32>,
    %446 = vector.broadcast %429 : vector<2x1xf32> to vector<2x32xf32>
    %447 = arith.mulf %446, %436 : vector<2x32xf32>
    %448 = arith.truncf %447 : vector<2x32xf32> to vector<2x32xbf16>
    %c0_167 = arith.constant 0 : index
    %449 = arith.index_cast %392 : i32 to index
    %c0_168 = arith.constant 0 : index
    %c0_169 = arith.constant 0 : index
    %450 = vector.load %arg5[%c0_167, %449, %c0_168, %c0_169] : memref<1x8x2x32xbf16, #tpu.memory_space<vmem>>, vector<1x1x2x32xbf16>
    %451 = vector.shape_cast %450 : vector<1x1x2x32xbf16> to vector<2x32xbf16>
    %452 = vector.shape_cast %448 : vector<2x32xbf16> to vector<1x1x2x32xbf16>
    tpu.vector_store %arg5[%c0_167, %449, %c0_168, %c0_169], %452 {strides = array<i32>} : memref<1x8x2x32xbf16, #tpu.memory_space<vmem>>, vector<1x1x2x32xbf16>,
    %c7_i32_170 = arith.constant 7 : i32
    %c2_i32_171 = arith.constant 2 : i32
    %453 = arith.muli %c2_i32_171, %c7_i32_170 : i32
    %c7_i32_172 = arith.constant 7 : i32
    %454 = arith.subi %c7_i32_172, %453 : i32
    %455 = arith.muli %arg0, %454 : i32
    %456 = arith.addi %c7_i32_170, %455 : i32
    %c0_173 = arith.constant 0 : index
    %c0_174 = arith.constant 0 : index
    %457 = vector.load %arg8[%c0_173, %c0_174] : memref<2x32xf32, #tpu.memory_space<vmem>>, vector<2x32xf32>
    %c0_175 = arith.constant 0 : index
    %c0_176 = arith.constant 0 : index
    %458 = vector.load %arg9[%c0_175, %c0_176] : memref<2x32xf32, #tpu.memory_space<vmem>>, vector<2x32xf32>
    %c0_177 = arith.constant 0 : index
    %459 = arith.index_cast %456 : i32 to index
    %c0_178 = arith.constant 0 : index
    %c0_179 = arith.constant 0 : index
    %460 = vector.load %arg2[%c0_177, %459, %c0_178, %c0_179] : memref<1x8x2x128xbf16, #tpu.memory_space<vmem>>, vector<1x1x2x128xbf16>
    %461 = vector.shape_cast %460 : vector<1x1x2x128xbf16> to vector<2x128xbf16>
    %462 = arith.extf %461 : vector<2x128xbf16> to vector<2x128xf32>
    %463 = arith.truncf %457 : vector<2x32xf32> to vector<2x32xbf16>
    %cst_180 = arith.constant dense<0.000000e+00> : vector<2x128xf32>
    %464 = tpu.matmul %463, %4, %cst_180 {dimension_numbers = #tpu.dot_dimension_numbers<[1], [0], [0], [1], [0, 0, 1, 1], [], []>} : vector<2x32xbf16>, vector<32x128xbf16>, vector<2x128xf32> -> vector<2x128xf32>
    %465 = arith.addf %462, %464 : vector<2x128xf32>
    %466 = vector.extract_strided_slice %465 {offsets = [0, 0], sizes = [2, 32], strides = [1, 1]} : vector<2x128xf32> to vector<2x32xf32>
    %467 = arith.negf %466 : vector<2x32xf32>
    %468 = math.exp %467 : vector<2x32xf32>
    %cst_181 = arith.constant 1.000000e+00 : f32
    %469 = vector.broadcast %cst_181 : f32 to vector<2x32xf32>
    %470 = arith.addf %469, %468 : vector<2x32xf32>
    %471 = arith.divf %469, %470 : vector<2x32xf32>
    %472 = vector.extract_strided_slice %465 {offsets = [0, 32], sizes = [2, 32], strides = [1, 1]} : vector<2x128xf32> to vector<2x32xf32>
    %473 = arith.negf %472 : vector<2x32xf32>
    %474 = math.exp %473 : vector<2x32xf32>
    %cst_182 = arith.constant 1.000000e+00 : f32
    %475 = vector.broadcast %cst_182 : f32 to vector<2x32xf32>
    %476 = arith.addf %475, %474 : vector<2x32xf32>
    %477 = arith.divf %475, %476 : vector<2x32xf32>
    %478 = vector.extract_strided_slice %465 {offsets = [0, 64], sizes = [2, 32], strides = [1, 1]} : vector<2x128xf32> to vector<2x32xf32>
    %479 = math.tanh %478 : vector<2x32xf32>
    %480 = vector.extract_strided_slice %465 {offsets = [0, 96], sizes = [2, 32], strides = [1, 1]} : vector<2x128xf32> to vector<2x32xf32>
    %481 = arith.negf %480 : vector<2x32xf32>
    %482 = math.exp %481 : vector<2x32xf32>
    %cst_183 = arith.constant 1.000000e+00 : f32
    %483 = vector.broadcast %cst_183 : f32 to vector<2x32xf32>
    %484 = arith.addf %483, %482 : vector<2x32xf32>
    %485 = arith.divf %483, %484 : vector<2x32xf32>
    %486 = arith.mulf %477, %458 : vector<2x32xf32>
    %487 = arith.mulf %471, %479 : vector<2x32xf32>
    %488 = arith.addf %486, %487 : vector<2x32xf32>
    %489 = math.tanh %488 : vector<2x32xf32>
    %490 = arith.mulf %485, %489 : vector<2x32xf32>
    %491 = arith.index_cast %456 : i32 to index
    %c0_184 = arith.constant 0 : index
    %c0_185 = arith.constant 0 : index
    %492 = vector.load %arg4[%491, %c0_184, %c0_185] : memref<8x2x1xf32, #tpu.memory_space<vmem>>, vector<1x2x1xf32>
    %493 = vector.shape_cast %492 : vector<1x2x1xf32> to vector<2x1xf32>
    %494 = vector.broadcast %493 : vector<2x1xf32> to vector<2x32xf32>
    %495 = arith.mulf %494, %490 : vector<2x32xf32>
    %cst_186 = arith.constant 1.000000e+00 : f32
    %496 = vector.broadcast %cst_186 : f32 to vector<2x1xf32>
    %497 = arith.subf %496, %493 : vector<2x1xf32>
    %498 = vector.broadcast %497 : vector<2x1xf32> to vector<2x32xf32>
    %499 = arith.mulf %498, %457 : vector<2x32xf32>
    %500 = arith.addf %495, %499 : vector<2x32xf32>
    %501 = vector.broadcast %493 : vector<2x1xf32> to vector<2x32xf32>
    %502 = arith.mulf %501, %488 : vector<2x32xf32>
    %cst_187 = arith.constant 1.000000e+00 : f32
    %503 = vector.broadcast %cst_187 : f32 to vector<2x1xf32>
    %504 = arith.subf %503, %493 : vector<2x1xf32>
    %505 = vector.broadcast %504 : vector<2x1xf32> to vector<2x32xf32>
    %506 = arith.mulf %505, %458 : vector<2x32xf32>
    %507 = arith.addf %502, %506 : vector<2x32xf32>
    %c0_188 = arith.constant 0 : index
    %c0_189 = arith.constant 0 : index
    %508 = vector.load %arg8[%c0_188, %c0_189] : memref<2x32xf32, #tpu.memory_space<vmem>>, vector<2x32xf32>
    tpu.vector_store %arg8[%c0_188, %c0_189], %500 {strides = array<i32>} : memref<2x32xf32, #tpu.memory_space<vmem>>, vector<2x32xf32>,
    %c0_190 = arith.constant 0 : index
    %c0_191 = arith.constant 0 : index
    %509 = vector.load %arg9[%c0_190, %c0_191] : memref<2x32xf32, #tpu.memory_space<vmem>>, vector<2x32xf32>
    tpu.vector_store %arg9[%c0_190, %c0_191], %507 {strides = array<i32>} : memref<2x32xf32, #tpu.memory_space<vmem>>, vector<2x32xf32>,
    %510 = vector.broadcast %493 : vector<2x1xf32> to vector<2x32xf32>
    %511 = arith.mulf %510, %500 : vector<2x32xf32>
    %512 = arith.truncf %511 : vector<2x32xf32> to vector<2x32xbf16>
    %c0_192 = arith.constant 0 : index
    %513 = arith.index_cast %456 : i32 to index
    %c0_193 = arith.constant 0 : index
    %c0_194 = arith.constant 0 : index
    %514 = vector.load %arg5[%c0_192, %513, %c0_193, %c0_194] : memref<1x8x2x32xbf16, #tpu.memory_space<vmem>>, vector<1x1x2x32xbf16>
    %515 = vector.shape_cast %514 : vector<1x1x2x32xbf16> to vector<2x32xbf16>
    %516 = vector.shape_cast %512 : vector<2x32xbf16> to vector<1x1x2x32xbf16>
    tpu.vector_store %arg5[%c0_192, %513, %c0_193, %c0_194], %516 {strides = array<i32>} : memref<1x8x2x32xbf16, #tpu.memory_space<vmem>>, vector<1x1x2x32xbf16>,
    %c8_i32 = arith.constant 8 : i32
    %c0_195 = arith.constant 0 : index
    %c0_196 = arith.constant 0 : index
    %517 = vector.load %arg8[%c0_195, %c0_196] : memref<2x32xf32, #tpu.memory_space<vmem>>, vector<2x32xf32>
    %c0_197 = arith.constant 0 : index
    %c0_198 = arith.constant 0 : index
    %c0_199 = arith.constant 0 : index
    %518 = vector.load %arg6[%c0_197, %c0_198, %c0_199] : memref<1x2x32xf32, #tpu.memory_space<vmem>>, vector<1x2x32xf32>
    %519 = vector.shape_cast %518 : vector<1x2x32xf32> to vector<2x32xf32>
    %520 = vector.shape_cast %517 : vector<2x32xf32> to vector<1x2x32xf32>
    tpu.vector_store %arg6[%c0_197, %c0_198, %c0_199], %520 {strides = array<i32>} : memref<1x2x32xf32, #tpu.memory_space<vmem>>, vector<1x2x32xf32>,
    %c0_200 = arith.constant 0 : index
    %c0_201 = arith.constant 0 : index
    %521 = vector.load %arg9[%c0_200, %c0_201] : memref<2x32xf32, #tpu.memory_space<vmem>>, vector<2x32xf32>
    %c0_202 = arith.constant 0 : index
    %c0_203 = arith.constant 0 : index
    %c0_204 = arith.constant 0 : index
    %522 = vector.load %arg7[%c0_202, %c0_203, %c0_204] : memref<1x2x32xf32, #tpu.memory_space<vmem>>, vector<1x2x32xf32>
    %523 = vector.shape_cast %522 : vector<1x2x32xf32> to vector<2x32xf32>
    %524 = vector.shape_cast %521 : vector<2x32xf32> to vector<1x2x32xf32>
    tpu.vector_store %arg7[%c0_202, %c0_203, %c0_204], %524 {strides = array<i32>} : memref<1x2x32xf32, #tpu.memory_space<vmem>>, vector<1x2x32xf32>,
    return
  }
  func.func @transform_0(%arg0: i32, %arg1: i32) -> (i32, i32, i32, i32) {
    %c2_i32 = arith.constant 2 : i32
    %0 = arith.muli %c2_i32, %arg1 : i32
    %c0_i32 = arith.constant 0 : i32
    %1 = arith.subi %c0_i32, %0 : i32
    %2 = arith.muli %arg0, %1 : i32
    %3 = arith.addi %arg1, %2 : i32
    %c0_i32_0 = arith.constant 0 : i32
    %c0_i32_1 = arith.constant 0 : i32
    %c0_i32_2 = arith.constant 0 : i32
    return %arg0, %3, %c0_i32_0, %c0_i32_1 : i32, i32, i32, i32
  }
  func.func @transform_1(%arg0: i32, %arg1: i32) -> (i32, i32, i32) {
    %c0_i32 = arith.constant 0 : i32
    %c0_i32_0 = arith.constant 0 : i32
    %c0_i32_1 = arith.constant 0 : i32
    return %arg0, %c0_i32, %c0_i32_0 : i32, i32, i32
  }
  func.func @transform_2(%arg0: i32, %arg1: i32) -> (i32, i32, i32) {
    %c2_i32 = arith.constant 2 : i32
    %0 = arith.muli %c2_i32, %arg1 : i32
    %c0_i32 = arith.constant 0 : i32
    %1 = arith.subi %c0_i32, %0 : i32
    %2 = arith.muli %arg0, %1 : i32
    %3 = arith.addi %arg1, %2 : i32
    %c0_i32_0 = arith.constant 0 : i32
    %c0_i32_1 = arith.constant 0 : i32
    %c0_i32_2 = arith.constant 0 : i32
    return %3, %c0_i32_0, %c0_i32_1 : i32, i32, i32
  }
  func.func @transform_3(%arg0: i32, %arg1: i32) -> (i32, i32, i32, i32) {
    %c2_i32 = arith.constant 2 : i32
    %0 = arith.muli %c2_i32, %arg1 : i32
    %c0_i32 = arith.constant 0 : i32
    %1 = arith.subi %c0_i32, %0 : i32
    %2 = arith.muli %arg0, %1 : i32
    %3 = arith.addi %arg1, %2 : i32
    %c0_i32_0 = arith.constant 0 : i32
    %c0_i32_1 = arith.constant 0 : i32
    %c0_i32_2 = arith.constant 0 : i32
    return %arg0, %3, %c0_i32_0, %c0_i32_1 : i32, i32, i32, i32
  }
  func.func @transform_4(%arg0: i32, %arg1: i32) -> (i32, i32, i32) {
    %c0_i32 = arith.constant 0 : i32
    %c0_i32_0 = arith.constant 0 : i32
    %c0_i32_1 = arith.constant 0 : i32
    return %arg0, %c0_i32, %c0_i32_0 : i32, i32, i32
  }
  func.func @transform_5(%arg0: i32, %arg1: i32) -> (i32, i32, i32) {
    %c0_i32 = arith.constant 0 : i32
    %c0_i32_0 = arith.constant 0 : i32
    %c0_i32_1 = arith.constant 0 : i32
    return %arg0, %c0_i32, %c0_i32_0 : i32, i32, i32
  }
}

module attributes {stable_mosaic.version = 11 : i64} {
  func.func @_dense_stack_kernel(%arg0: i32, %arg1: i32, %arg2: memref<16x64xbf16, #tpu.memory_space<vmem>>, %arg3: memref<1x64x128xbf16, #tpu.memory_space<vmem>>, %arg4: memref<1x1x128xf32, #tpu.memory_space<vmem>>, %arg5: memref<1x16x128xbf16, #tpu.memory_space<vmem>>) attributes {dimension_semantics = [#tpu.dimension_semantics<parallel>, #tpu.dimension_semantics<arbitrary>], iteration_bounds = array<i64: 1, 2>, scalar_prefetch = 0 : i64, scratch_operands = 0 : i64, tpu.core_type = #tpu.core_type<tc>, window_params = [{transform_indices = @transform_0, window_bounds = array<i64: 16, 64>}, {transform_indices = @transform_1, window_bounds = array<i64: 1, 64, 128>}, {transform_indices = @transform_2, window_bounds = array<i64: 1, 1, 128>}, {transform_indices = @transform_3, window_bounds = array<i64: 1, 16, 128>}]} {
    %c0 = arith.constant 0 : index
    %c0_0 = arith.constant 0 : index
    %c0_1 = arith.constant 0 : index
    %0 = vector.load %arg3[%c0, %c0_0, %c0_1] : memref<1x64x128xbf16, #tpu.memory_space<vmem>>, vector<1x64x128xbf16>
    %1 = vector.shape_cast %0 : vector<1x64x128xbf16> to vector<64x128xbf16>
    %c0_2 = arith.constant 0 : index
    %c0_3 = arith.constant 0 : index
    %2 = vector.load %arg2[%c0_2, %c0_3] : memref<16x64xbf16, #tpu.memory_space<vmem>>, vector<16x64xbf16>
    %cst = arith.constant dense<0.000000e+00> : vector<16x128xf32>
    %3 = tpu.matmul %2, %1, %cst {dimension_numbers = #tpu.dot_dimension_numbers<[1], [0], [0], [1], [0, 0, 1, 1], [], []>} : vector<16x64xbf16>, vector<64x128xbf16>, vector<16x128xf32> -> vector<16x128xf32>
    %c0_4 = arith.constant 0 : index
    %c0_5 = arith.constant 0 : index
    %c0_6 = arith.constant 0 : index
    %4 = vector.load %arg4[%c0_4, %c0_5, %c0_6] : memref<1x1x128xf32, #tpu.memory_space<vmem>>, vector<1x1x128xf32>
    %5 = vector.shape_cast %4 : vector<1x1x128xf32> to vector<1x128xf32>
    %6 = vector.broadcast %5 : vector<1x128xf32> to vector<16x128xf32>
    %7 = arith.addf %3, %6 : vector<16x128xf32>
    %8 = arith.truncf %7 : vector<16x128xf32> to vector<16x128xbf16>
    %c0_7 = arith.constant 0 : index
    %c0_8 = arith.constant 0 : index
    %c0_9 = arith.constant 0 : index
    %9 = vector.load %arg5[%c0_7, %c0_8, %c0_9] : memref<1x16x128xbf16, #tpu.memory_space<vmem>>, vector<1x16x128xbf16>
    %10 = vector.shape_cast %9 : vector<1x16x128xbf16> to vector<16x128xbf16>
    %11 = vector.shape_cast %8 : vector<16x128xbf16> to vector<1x16x128xbf16>
    tpu.vector_store %arg5[%c0_7, %c0_8, %c0_9], %11 {strides = array<i32>} : memref<1x16x128xbf16, #tpu.memory_space<vmem>>, vector<1x16x128xbf16>,
    return
  }
  func.func @transform_0(%arg0: i32, %arg1: i32) -> (i32, i32) {
    %c0_i32 = arith.constant 0 : i32
    %c0_i32_0 = arith.constant 0 : i32
    return %arg0, %c0_i32 : i32, i32
  }
  func.func @transform_1(%arg0: i32, %arg1: i32) -> (i32, i32, i32) {
    %c0_i32 = arith.constant 0 : i32
    %c0_i32_0 = arith.constant 0 : i32
    %c0_i32_1 = arith.constant 0 : i32
    return %arg1, %c0_i32, %c0_i32_0 : i32, i32, i32
  }
  func.func @transform_2(%arg0: i32, %arg1: i32) -> (i32, i32, i32) {
    %c0_i32 = arith.constant 0 : i32
    %c0_i32_0 = arith.constant 0 : i32
    %c0_i32_1 = arith.constant 0 : i32
    return %arg1, %c0_i32, %c0_i32_0 : i32, i32, i32
  }
  func.func @transform_3(%arg0: i32, %arg1: i32) -> (i32, i32, i32) {
    %c0_i32 = arith.constant 0 : i32
    %c0_i32_0 = arith.constant 0 : i32
    return %arg1, %arg0, %c0_i32 : i32, i32, i32
  }
}

module attributes {stable_mosaic.version = 11 : i64} {
  func.func @_dense_stack_kernel(%arg0: i32, %arg1: i32, %arg2: memref<16x64xbf16, #tpu.memory_space<vmem>>, %arg3: memref<1x64x32xbf16, #tpu.memory_space<vmem>>, %arg4: memref<1x1x32xf32, #tpu.memory_space<vmem>>, %arg5: memref<1x16x32xbf16, #tpu.memory_space<vmem>>) attributes {dimension_semantics = [#tpu.dimension_semantics<parallel>, #tpu.dimension_semantics<arbitrary>], iteration_bounds = array<i64: 1, 1>, scalar_prefetch = 0 : i64, scratch_operands = 0 : i64, tpu.core_type = #tpu.core_type<tc>, window_params = [{transform_indices = @transform_0, window_bounds = array<i64: 16, 64>}, {transform_indices = @transform_1, window_bounds = array<i64: 1, 64, 32>}, {transform_indices = @transform_2, window_bounds = array<i64: 1, 1, 32>}, {transform_indices = @transform_3, window_bounds = array<i64: 1, 16, 32>}]} {
    %c0 = arith.constant 0 : index
    %c0_0 = arith.constant 0 : index
    %c0_1 = arith.constant 0 : index
    %0 = vector.load %arg3[%c0, %c0_0, %c0_1] : memref<1x64x32xbf16, #tpu.memory_space<vmem>>, vector<1x64x32xbf16>
    %1 = vector.shape_cast %0 : vector<1x64x32xbf16> to vector<64x32xbf16>
    %c0_2 = arith.constant 0 : index
    %c0_3 = arith.constant 0 : index
    %2 = vector.load %arg2[%c0_2, %c0_3] : memref<16x64xbf16, #tpu.memory_space<vmem>>, vector<16x64xbf16>
    %cst = arith.constant dense<0.000000e+00> : vector<16x32xf32>
    %3 = tpu.matmul %2, %1, %cst {dimension_numbers = #tpu.dot_dimension_numbers<[1], [0], [0], [1], [0, 0, 1, 1], [], []>} : vector<16x64xbf16>, vector<64x32xbf16>, vector<16x32xf32> -> vector<16x32xf32>
    %c0_4 = arith.constant 0 : index
    %c0_5 = arith.constant 0 : index
    %c0_6 = arith.constant 0 : index
    %4 = vector.load %arg4[%c0_4, %c0_5, %c0_6] : memref<1x1x32xf32, #tpu.memory_space<vmem>>, vector<1x1x32xf32>
    %5 = vector.shape_cast %4 : vector<1x1x32xf32> to vector<1x32xf32>
    %6 = vector.broadcast %5 : vector<1x32xf32> to vector<16x32xf32>
    %7 = arith.addf %3, %6 : vector<16x32xf32>
    %8 = arith.truncf %7 : vector<16x32xf32> to vector<16x32xbf16>
    %c0_7 = arith.constant 0 : index
    %c0_8 = arith.constant 0 : index
    %c0_9 = arith.constant 0 : index
    %9 = vector.load %arg5[%c0_7, %c0_8, %c0_9] : memref<1x16x32xbf16, #tpu.memory_space<vmem>>, vector<1x16x32xbf16>
    %10 = vector.shape_cast %9 : vector<1x16x32xbf16> to vector<16x32xbf16>
    %11 = vector.shape_cast %8 : vector<16x32xbf16> to vector<1x16x32xbf16>
    tpu.vector_store %arg5[%c0_7, %c0_8, %c0_9], %11 {strides = array<i32>} : memref<1x16x32xbf16, #tpu.memory_space<vmem>>, vector<1x16x32xbf16>,
    return
  }
  func.func @transform_0(%arg0: i32, %arg1: i32) -> (i32, i32) {
    %c0_i32 = arith.constant 0 : i32
    %c0_i32_0 = arith.constant 0 : i32
    return %arg0, %c0_i32 : i32, i32
  }
  func.func @transform_1(%arg0: i32, %arg1: i32) -> (i32, i32, i32) {
    %c0_i32 = arith.constant 0 : i32
    %c0_i32_0 = arith.constant 0 : i32
    %c0_i32_1 = arith.constant 0 : i32
    return %arg1, %c0_i32, %c0_i32_0 : i32, i32, i32
  }
  func.func @transform_2(%arg0: i32, %arg1: i32) -> (i32, i32, i32) {
    %c0_i32 = arith.constant 0 : i32
    %c0_i32_0 = arith.constant 0 : i32
    %c0_i32_1 = arith.constant 0 : i32
    return %arg1, %c0_i32, %c0_i32_0 : i32, i32, i32
  }
  func.func @transform_3(%arg0: i32, %arg1: i32) -> (i32, i32, i32) {
    %c0_i32 = arith.constant 0 : i32
    %c0_i32_0 = arith.constant 0 : i32
    return %arg1, %arg0, %c0_i32 : i32, i32, i32
  }
}

module attributes {stable_mosaic.version = 11 : i64} {
  func.func @_dense_stack_kernel(%arg0: i32, %arg1: i32, %arg2: memref<8x768xbf16, #tpu.memory_space<vmem>>, %arg3: memref<1x768x128xbf16, #tpu.memory_space<vmem>>, %arg4: memref<1x1x128xf32, #tpu.memory_space<vmem>>, %arg5: memref<1x8x128xbf16, #tpu.memory_space<vmem>>) attributes {dimension_semantics = [#tpu.dimension_semantics<parallel>, #tpu.dimension_semantics<arbitrary>], iteration_bounds = array<i64: 1, 1>, scalar_prefetch = 0 : i64, scratch_operands = 0 : i64, tpu.core_type = #tpu.core_type<tc>, window_params = [{transform_indices = @transform_0, window_bounds = array<i64: 8, 768>}, {transform_indices = @transform_1, window_bounds = array<i64: 1, 768, 128>}, {transform_indices = @transform_2, window_bounds = array<i64: 1, 1, 128>}, {transform_indices = @transform_3, window_bounds = array<i64: 1, 8, 128>}]} {
    %c0 = arith.constant 0 : index
    %c0_0 = arith.constant 0 : index
    %c0_1 = arith.constant 0 : index
    %0 = vector.load %arg3[%c0, %c0_0, %c0_1] : memref<1x768x128xbf16, #tpu.memory_space<vmem>>, vector<1x768x128xbf16>
    %1 = vector.shape_cast %0 : vector<1x768x128xbf16> to vector<768x128xbf16>
    %c0_2 = arith.constant 0 : index
    %c0_3 = arith.constant 0 : index
    %2 = vector.load %arg2[%c0_2, %c0_3] : memref<8x768xbf16, #tpu.memory_space<vmem>>, vector<8x768xbf16>
    %cst = arith.constant dense<0.000000e+00> : vector<8x128xf32>
    %3 = tpu.matmul %2, %1, %cst {dimension_numbers = #tpu.dot_dimension_numbers<[1], [0], [0], [1], [0, 0, 1, 1], [], []>} : vector<8x768xbf16>, vector<768x128xbf16>, vector<8x128xf32> -> vector<8x128xf32>
    %c0_4 = arith.constant 0 : index
    %c0_5 = arith.constant 0 : index
    %c0_6 = arith.constant 0 : index
    %4 = vector.load %arg4[%c0_4, %c0_5, %c0_6] : memref<1x1x128xf32, #tpu.memory_space<vmem>>, vector<1x1x128xf32>
    %5 = vector.shape_cast %4 : vector<1x1x128xf32> to vector<1x128xf32>
    %6 = vector.broadcast %5 : vector<1x128xf32> to vector<8x128xf32>
    %7 = arith.addf %3, %6 : vector<8x128xf32>
    %8 = arith.truncf %7 : vector<8x128xf32> to vector<8x128xbf16>
    %c0_7 = arith.constant 0 : index
    %c0_8 = arith.constant 0 : index
    %c0_9 = arith.constant 0 : index
    %9 = vector.load %arg5[%c0_7, %c0_8, %c0_9] : memref<1x8x128xbf16, #tpu.memory_space<vmem>>, vector<1x8x128xbf16>
    %10 = vector.shape_cast %9 : vector<1x8x128xbf16> to vector<8x128xbf16>
    %11 = vector.shape_cast %8 : vector<8x128xbf16> to vector<1x8x128xbf16>
    tpu.vector_store %arg5[%c0_7, %c0_8, %c0_9], %11 {strides = array<i32>} : memref<1x8x128xbf16, #tpu.memory_space<vmem>>, vector<1x8x128xbf16>,
    return
  }
  func.func @transform_0(%arg0: i32, %arg1: i32) -> (i32, i32) {
    %c0_i32 = arith.constant 0 : i32
    %c0_i32_0 = arith.constant 0 : i32
    return %arg0, %c0_i32 : i32, i32
  }
  func.func @transform_1(%arg0: i32, %arg1: i32) -> (i32, i32, i32) {
    %c0_i32 = arith.constant 0 : i32
    %c0_i32_0 = arith.constant 0 : i32
    %c0_i32_1 = arith.constant 0 : i32
    return %arg1, %c0_i32, %c0_i32_0 : i32, i32, i32
  }
  func.func @transform_2(%arg0: i32, %arg1: i32) -> (i32, i32, i32) {
    %c0_i32 = arith.constant 0 : i32
    %c0_i32_0 = arith.constant 0 : i32
    %c0_i32_1 = arith.constant 0 : i32
    return %arg1, %c0_i32, %c0_i32_0 : i32, i32, i32
  }
  func.func @transform_3(%arg0: i32, %arg1: i32) -> (i32, i32, i32) {
    %c0_i32 = arith.constant 0 : i32
    %c0_i32_0 = arith.constant 0 : i32
    return %arg1, %arg0, %c0_i32 : i32, i32, i32
  }
}

module attributes {stable_mosaic.version = 11 : i64} {
  func.func @_decoder_kernel(%arg0: i32, %arg1: memref<1x2x128xbf16, #tpu.memory_space<vmem>>, %arg2: memref<2x8x32xbf16, #tpu.memory_space<vmem>>, %arg3: memref<2x8x64xbf16, #tpu.memory_space<vmem>>, %arg4: memref<2x8xf32, #tpu.memory_space<vmem>>, %arg5: memref<2x2x32xf32, #tpu.memory_space<vmem>>, %arg6: memref<2x2x32xf32, #tpu.memory_space<vmem>>, %arg7: memref<32x32xbf16, #tpu.memory_space<vmem>>, %arg8: memref<32x1xf32, #tpu.memory_space<vmem>>, %arg9: memref<96x128xbf16, #tpu.memory_space<vmem>>, %arg10: memref<1x64x128xbf16, #tpu.memory_space<vmem>>, %arg11: memref<1x1x128xf32, #tpu.memory_space<vmem>>, %arg12: memref<1x2x96xbf16, #tpu.memory_space<vmem>>, %arg13: memref<1x2x8xf32, #tpu.memory_space<vmem>>, %arg14: memref<2x2x32xf32, #tpu.memory_space<vmem>>, %arg15: memref<2x2x32xf32, #tpu.memory_space<vmem>>) attributes {dimension_semantics = [#tpu.dimension_semantics<arbitrary>], iteration_bounds = array<i64: 4>, scalar_prefetch = 0 : i64, scratch_operands = 2 : i64, tpu.core_type = #tpu.core_type<tc>, window_params = [{transform_indices = @transform_0, window_bounds = array<i64: 1, 2, 128>}, {pipeline_mode = #tpu.pipeline_mode<synchronous>, transform_indices = @transform_1, window_bounds = array<i64: 2, 8, 32>}, {pipeline_mode = #tpu.pipeline_mode<synchronous>, transform_indices = @transform_2, window_bounds = array<i64: 2, 8, 64>}, {pipeline_mode = #tpu.pipeline_mode<synchronous>, transform_indices = @transform_3, window_bounds = array<i64: 2, 8>}, {pipeline_mode = #tpu.pipeline_mode<synchronous>, transform_indices = @transform_4, window_bounds = array<i64: 2, 2, 32>}, {pipeline_mode = #tpu.pipeline_mode<synchronous>, transform_indices = @transform_5, window_bounds = array<i64: 2, 2, 32>}, {pipeline_mode = #tpu.pipeline_mode<synchronous>, transform_indices = @transform_6, window_bounds = array<i64: 32, 32>}, {pipeline_mode = #tpu.pipeline_mode<synchronous>, transform_indices = @transform_7, window_bounds = array<i64: 32, 1>}, {pipeline_mode = #tpu.pipeline_mode<synchronous>, transform_indices = @transform_8, window_bounds = array<i64: 96, 128>}, {pipeline_mode = #tpu.pipeline_mode<synchronous>, transform_indices = @transform_9, window_bounds = array<i64: 1, 64, 128>}, {pipeline_mode = #tpu.pipeline_mode<synchronous>, transform_indices = @transform_10, window_bounds = array<i64: 1, 1, 128>}, {transform_indices = @transform_11, window_bounds = array<i64: 1, 2, 96>}, {transform_indices = @transform_12, window_bounds = array<i64: 1, 2, 8>}]} {
    %c0_i32 = arith.constant 0 : i32
    %0 = arith.cmpi eq, %arg0, %c0_i32 : i32
    %1 = arith.extui %0 : i1 to i32
    %c0_i32_0 = arith.constant 0 : i32
    %2 = arith.cmpi ne, %1, %c0_i32_0 : i32
    scf.if %2 {
      %c0_69 = arith.constant 0 : index
      %c0_70 = arith.constant 0 : index
      %c0_71 = arith.constant 0 : index
      %132 = vector.load %arg5[%c0_69, %c0_70, %c0_71] : memref<2x2x32xf32, #tpu.memory_space<vmem>>, vector<2x2x32xf32>
      %c0_72 = arith.constant 0 : index
      %c0_73 = arith.constant 0 : index
      %c0_74 = arith.constant 0 : index
      %133 = vector.load %arg14[%c0_72, %c0_73, %c0_74] : memref<2x2x32xf32, #tpu.memory_space<vmem>>, vector<2x2x32xf32>
      tpu.vector_store %arg14[%c0_72, %c0_73, %c0_74], %132 {strides = array<i32>} : memref<2x2x32xf32, #tpu.memory_space<vmem>>, vector<2x2x32xf32>,
      %c0_75 = arith.constant 0 : index
      %c0_76 = arith.constant 0 : index
      %c0_77 = arith.constant 0 : index
      %134 = vector.load %arg6[%c0_75, %c0_76, %c0_77] : memref<2x2x32xf32, #tpu.memory_space<vmem>>, vector<2x2x32xf32>
      %c0_78 = arith.constant 0 : index
      %c0_79 = arith.constant 0 : index
      %c0_80 = arith.constant 0 : index
      %135 = vector.load %arg15[%c0_78, %c0_79, %c0_80] : memref<2x2x32xf32, #tpu.memory_space<vmem>>, vector<2x2x32xf32>
      tpu.vector_store %arg15[%c0_78, %c0_79, %c0_80], %134 {strides = array<i32>} : memref<2x2x32xf32, #tpu.memory_space<vmem>>, vector<2x2x32xf32>,
    } else {
    }
    %c0 = arith.constant 0 : index
    %c0_1 = arith.constant 0 : index
    %c0_2 = arith.constant 0 : index
    %3 = vector.load %arg3[%c0, %c0_1, %c0_2] : memref<2x8x64xbf16, #tpu.memory_space<vmem>>, vector<2x8x64xbf16>
    %c0_3 = arith.constant 0 : index
    %c0_4 = arith.constant 0 : index
    %4 = vector.load %arg7[%c0_3, %c0_4] : memref<32x32xbf16, #tpu.memory_space<vmem>>, vector<32x32xbf16>
    %c1 = arith.constant 1 : index
    %c0_5 = arith.constant 0 : index
    %c0_6 = arith.constant 0 : index
    %5 = vector.load %arg14[%c1, %c0_5, %c0_6] : memref<2x2x32xf32, #tpu.memory_space<vmem>>, vector<1x2x32xf32>
    %6 = vector.shape_cast %5 : vector<1x2x32xf32> to vector<2x32xf32>
    %7 = arith.truncf %6 : vector<2x32xf32> to vector<2x32xbf16>
    %cst = arith.constant dense<0.000000e+00> : vector<2x32xf32>
    %8 = tpu.matmul %7, %4, %cst {dimension_numbers = #tpu.dot_dimension_numbers<[1], [0], [0], [1], [0, 0, 1, 1], [], []>} : vector<2x32xbf16>, vector<32x32xbf16>, vector<2x32xf32> -> vector<2x32xf32>
    %c0_7 = arith.constant 0 : index
    %c0_8 = arith.constant 0 : index
    %c0_9 = arith.constant 0 : index
    %9 = vector.load %arg2[%c0_7, %c0_8, %c0_9] : memref<2x8x32xbf16, #tpu.memory_space<vmem>>, vector<2x8x32xbf16>
    %10 = arith.extf %9 : vector<2x8x32xbf16> to vector<2x8x32xf32>
    %11 = vector.shape_cast %8 : vector<2x32xf32> to vector<2x1x32xf32>
    %12 = vector.broadcast %11 : vector<2x1x32xf32> to vector<2x8x32xf32>
    %13 = arith.addf %10, %12 : vector<2x8x32xf32>
    %14 = math.tanh %13 : vector<2x8x32xf32>
    %15 = vector.shape_cast %14 : vector<2x8x32xf32> to vector<16x32xf32>
    %c0_10 = arith.constant 0 : index
    %c0_11 = arith.constant 0 : index
    %16 = vector.load %arg8[%c0_10, %c0_11] : memref<32x1xf32, #tpu.memory_space<vmem>>, vector<32x1xf32>
    %cst_12 = arith.constant dense<0.000000e+00> : vector<16x1xf32>
    %17 = tpu.matmul %15, %16, %cst_12 {dimension_numbers = #tpu.dot_dimension_numbers<[1], [0], [0], [1], [0, 0, 1, 1], [], []>} : vector<16x32xf32>, vector<32x1xf32>, vector<16x1xf32> -> vector<16x1xf32>
    %18 = vector.shape_cast %17 : vector<16x1xf32> to vector<2x8xf32>
    %c0_13 = arith.constant 0 : index
    %c0_14 = arith.constant 0 : index
    %19 = vector.load %arg4[%c0_13, %c0_14] : memref<2x8xf32, #tpu.memory_space<vmem>>, vector<2x8xf32>
    %cst_15 = arith.constant 0.000000e+00 : f32
    %20 = vector.broadcast %cst_15 : f32 to vector<2x8xf32>
    %21 = arith.cmpf oeq, %19, %20 : vector<2x8xf32>
    %cst_16 = arith.constant -1.000000e+30 : f32
    %22 = vector.broadcast %cst_16 : f32 to vector<2x8xf32>
    %23 = arith.select %21, %22, %18 : vector<2x8xi1>, vector<2x8xf32>
    %cst_17 = arith.constant dense<0xFF800000> : vector<2xf32>
    %24 = vector.multi_reduction <maximumf>, %23, %cst_17 [1] : vector<2x8xf32> to vector<2xf32>
    %25 = vector.shape_cast %24 : vector<2xf32> to vector<2x1xf32>
    %26 = vector.broadcast %25 : vector<2x1xf32> to vector<2x8xf32>
    %27 = arith.subf %23, %26 : vector<2x8xf32>
    %28 = math.exp %27 : vector<2x8xf32>
    %cst_18 = arith.constant dense<0.000000e+00> : vector<2xf32>
    %29 = vector.multi_reduction <add>, %28, %cst_18 [1] : vector<2x8xf32> to vector<2xf32>
    %30 = vector.shape_cast %29 : vector<2xf32> to vector<2x1xf32>
    %31 = vector.broadcast %30 : vector<2x1xf32> to vector<2x8xf32>
    %32 = arith.divf %28, %31 : vector<2x8xf32>
    %33 = vector.shape_cast %32 : vector<2x8xf32> to vector<2x1x8xf32>
    %34 = arith.truncf %33 : vector<2x1x8xf32> to vector<2x1x8xbf16>
    "tpu.trace_start"() <{level = 10 : i32, message = "bqs,bsd->bqd"}> : () -> ()
    %cst_19 = arith.constant dense<0.000000e+00> : vector<2x1x64xf32>
    %35 = tpu.matmul %34, %3, %cst_19 {dimension_numbers = #tpu.dot_dimension_numbers<[2], [1], [1], [2], [0, 0, 0, 1, 1, 2], [0], [0]>} : vector<2x1x8xbf16>, vector<2x8x64xbf16>, vector<2x1x64xf32> -> vector<2x1x64xf32>
    "tpu.trace_stop"() : () -> ()
    %36 = vector.shape_cast %35 : vector<2x1x64xf32> to vector<2x64xf32>
    %c0_20 = arith.constant 0 : index
    %c0_21 = arith.constant 0 : index
    %c0_22 = arith.constant 0 : index
    %37 = vector.load %arg14[%c0_20, %c0_21, %c0_22] : memref<2x2x32xf32, #tpu.memory_space<vmem>>, vector<1x2x32xf32>
    %38 = vector.shape_cast %37 : vector<1x2x32xf32> to vector<2x32xf32>
    %c0_23 = arith.constant 0 : index
    %c0_24 = arith.constant 0 : index
    %c0_25 = arith.constant 0 : index
    %39 = vector.load %arg15[%c0_23, %c0_24, %c0_25] : memref<2x2x32xf32, #tpu.memory_space<vmem>>, vector<1x2x32xf32>
    %40 = vector.shape_cast %39 : vector<1x2x32xf32> to vector<2x32xf32>
    %c0_26 = arith.constant 0 : index
    %c0_27 = arith.constant 0 : index
    %41 = vector.load %arg9[%c0_26, %c0_27] : memref<96x128xbf16, #tpu.memory_space<vmem>>, vector<96x128xbf16>
    %42 = tpu.concatenate %36, %38 in 1 : vector<2x64xf32>, vector<2x32xf32> -> vector<2x96xf32>
    %c0_28 = arith.constant 0 : index
    %c0_29 = arith.constant 0 : index
    %c0_30 = arith.constant 0 : index
    %43 = vector.load %arg1[%c0_28, %c0_29, %c0_30] : memref<1x2x128xbf16, #tpu.memory_space<vmem>>, vector<1x2x128xbf16>
    %44 = vector.shape_cast %43 : vector<1x2x128xbf16> to vector<2x128xbf16>
    %45 = arith.extf %44 : vector<2x128xbf16> to vector<2x128xf32>
    %46 = arith.truncf %42 : vector<2x96xf32> to vector<2x96xbf16>
    %cst_31 = arith.constant dense<0.000000e+00> : vector<2x128xf32>
    %47 = tpu.matmul %46, %41, %cst_31 {dimension_numbers = #tpu.dot_dimension_numbers<[1], [0], [0], [1], [0, 0, 1, 1], [], []>} : vector<2x96xbf16>, vector<96x128xbf16>, vector<2x128xf32> -> vector<2x128xf32>
    %48 = arith.addf %45, %47 : vector<2x128xf32>
    %49 = vector.extract_strided_slice %48 {offsets = [0, 0], sizes = [2, 32], strides = [1, 1]} : vector<2x128xf32> to vector<2x32xf32>
    %50 = arith.negf %49 : vector<2x32xf32>
    %51 = math.exp %50 : vector<2x32xf32>
    %cst_32 = arith.constant 1.000000e+00 : f32
    %52 = vector.broadcast %cst_32 : f32 to vector<2x32xf32>
    %53 = arith.addf %52, %51 : vector<2x32xf32>
    %54 = arith.divf %52, %53 : vector<2x32xf32>
    %55 = vector.extract_strided_slice %48 {offsets = [0, 32], sizes = [2, 32], strides = [1, 1]} : vector<2x128xf32> to vector<2x32xf32>
    %56 = arith.negf %55 : vector<2x32xf32>
    %57 = math.exp %56 : vector<2x32xf32>
    %cst_33 = arith.constant 1.000000e+00 : f32
    %58 = vector.broadcast %cst_33 : f32 to vector<2x32xf32>
    %59 = arith.addf %58, %57 : vector<2x32xf32>
    %60 = arith.divf %58, %59 : vector<2x32xf32>
    %61 = vector.extract_strided_slice %48 {offsets = [0, 64], sizes = [2, 32], strides = [1, 1]} : vector<2x128xf32> to vector<2x32xf32>
    %62 = math.tanh %61 : vector<2x32xf32>
    %63 = vector.extract_strided_slice %48 {offsets = [0, 96], sizes = [2, 32], strides = [1, 1]} : vector<2x128xf32> to vector<2x32xf32>
    %64 = arith.negf %63 : vector<2x32xf32>
    %65 = math.exp %64 : vector<2x32xf32>
    %cst_34 = arith.constant 1.000000e+00 : f32
    %66 = vector.broadcast %cst_34 : f32 to vector<2x32xf32>
    %67 = arith.addf %66, %65 : vector<2x32xf32>
    %68 = arith.divf %66, %67 : vector<2x32xf32>
    %69 = arith.mulf %60, %40 : vector<2x32xf32>
    %70 = arith.mulf %54, %62 : vector<2x32xf32>
    %71 = arith.addf %69, %70 : vector<2x32xf32>
    %72 = math.tanh %71 : vector<2x32xf32>
    %73 = arith.mulf %68, %72 : vector<2x32xf32>
    %c1_35 = arith.constant 1 : index
    %c0_36 = arith.constant 0 : index
    %c0_37 = arith.constant 0 : index
    %74 = vector.load %arg14[%c1_35, %c0_36, %c0_37] : memref<2x2x32xf32, #tpu.memory_space<vmem>>, vector<1x2x32xf32>
    %75 = vector.shape_cast %74 : vector<1x2x32xf32> to vector<2x32xf32>
    %c1_38 = arith.constant 1 : index
    %c0_39 = arith.constant 0 : index
    %c0_40 = arith.constant 0 : index
    %76 = vector.load %arg15[%c1_38, %c0_39, %c0_40] : memref<2x2x32xf32, #tpu.memory_space<vmem>>, vector<1x2x32xf32>
    %77 = vector.shape_cast %76 : vector<1x2x32xf32> to vector<2x32xf32>
    %c0_41 = arith.constant 0 : index
    %c0_42 = arith.constant 0 : index
    %c0_43 = arith.constant 0 : index
    %78 = vector.load %arg10[%c0_41, %c0_42, %c0_43] : memref<1x64x128xbf16, #tpu.memory_space<vmem>>, vector<1x64x128xbf16>
    %79 = vector.shape_cast %78 : vector<1x64x128xbf16> to vector<64x128xbf16>
    %80 = tpu.concatenate %73, %75 in 1 : vector<2x32xf32>, vector<2x32xf32> -> vector<2x64xf32>
    %81 = arith.truncf %80 : vector<2x64xf32> to vector<2x64xbf16>
    %cst_44 = arith.constant dense<0.000000e+00> : vector<2x128xf32>
    %82 = tpu.matmul %81, %79, %cst_44 {dimension_numbers = #tpu.dot_dimension_numbers<[1], [0], [0], [1], [0, 0, 1, 1], [], []>} : vector<2x64xbf16>, vector<64x128xbf16>, vector<2x128xf32> -> vector<2x128xf32>
    %c0_45 = arith.constant 0 : index
    %c0_46 = arith.constant 0 : index
    %c0_47 = arith.constant 0 : index
    %83 = vector.load %arg11[%c0_45, %c0_46, %c0_47] : memref<1x1x128xf32, #tpu.memory_space<vmem>>, vector<1x1x128xf32>
    %84 = vector.shape_cast %83 : vector<1x1x128xf32> to vector<1x128xf32>
    %85 = vector.broadcast %84 : vector<1x128xf32> to vector<2x128xf32>
    %86 = arith.addf %82, %85 : vector<2x128xf32>
    %87 = vector.extract_strided_slice %86 {offsets = [0, 0], sizes = [2, 32], strides = [1, 1]} : vector<2x128xf32> to vector<2x32xf32>
    %88 = arith.negf %87 : vector<2x32xf32>
    %89 = math.exp %88 : vector<2x32xf32>
    %cst_48 = arith.constant 1.000000e+00 : f32
    %90 = vector.broadcast %cst_48 : f32 to vector<2x32xf32>
    %91 = arith.addf %90, %89 : vector<2x32xf32>
    %92 = arith.divf %90, %91 : vector<2x32xf32>
    %93 = vector.extract_strided_slice %86 {offsets = [0, 32], sizes = [2, 32], strides = [1, 1]} : vector<2x128xf32> to vector<2x32xf32>
    %94 = arith.negf %93 : vector<2x32xf32>
    %95 = math.exp %94 : vector<2x32xf32>
    %cst_49 = arith.constant 1.000000e+00 : f32
    %96 = vector.broadcast %cst_49 : f32 to vector<2x32xf32>
    %97 = arith.addf %96, %95 : vector<2x32xf32>
    %98 = arith.divf %96, %97 : vector<2x32xf32>
    %99 = vector.extract_strided_slice %86 {offsets = [0, 64], sizes = [2, 32], strides = [1, 1]} : vector<2x128xf32> to vector<2x32xf32>
    %100 = math.tanh %99 : vector<2x32xf32>
    %101 = vector.extract_strided_slice %86 {offsets = [0, 96], sizes = [2, 32], strides = [1, 1]} : vector<2x128xf32> to vector<2x32xf32>
    %102 = arith.negf %101 : vector<2x32xf32>
    %103 = math.exp %102 : vector<2x32xf32>
    %cst_50 = arith.constant 1.000000e+00 : f32
    %104 = vector.broadcast %cst_50 : f32 to vector<2x32xf32>
    %105 = arith.addf %104, %103 : vector<2x32xf32>
    %106 = arith.divf %104, %105 : vector<2x32xf32>
    %107 = arith.mulf %98, %77 : vector<2x32xf32>
    %108 = arith.mulf %92, %100 : vector<2x32xf32>
    %109 = arith.addf %107, %108 : vector<2x32xf32>
    %110 = math.tanh %109 : vector<2x32xf32>
    %111 = arith.mulf %106, %110 : vector<2x32xf32>
    %c0_51 = arith.constant 0 : index
    %c0_52 = arith.constant 0 : index
    %c0_53 = arith.constant 0 : index
    %112 = vector.load %arg14[%c0_51, %c0_52, %c0_53] : memref<2x2x32xf32, #tpu.memory_space<vmem>>, vector<1x2x32xf32>
    %113 = vector.shape_cast %112 : vector<1x2x32xf32> to vector<2x32xf32>
    %114 = vector.shape_cast %73 : vector<2x32xf32> to vector<1x2x32xf32>
    tpu.vector_store %arg14[%c0_51, %c0_52, %c0_53], %114 {strides = array<i32>} : memref<2x2x32xf32, #tpu.memory_space<vmem>>, vector<1x2x32xf32>,
    %c0_54 = arith.constant 0 : index
    %c0_55 = arith.constant 0 : index
    %c0_56 = arith.constant 0 : index
    %115 = vector.load %arg15[%c0_54, %c0_55, %c0_56] : memref<2x2x32xf32, #tpu.memory_space<vmem>>, vector<1x2x32xf32>
    %116 = vector.shape_cast %115 : vector<1x2x32xf32> to vector<2x32xf32>
    %117 = vector.shape_cast %71 : vector<2x32xf32> to vector<1x2x32xf32>
    tpu.vector_store %arg15[%c0_54, %c0_55, %c0_56], %117 {strides = array<i32>} : memref<2x2x32xf32, #tpu.memory_space<vmem>>, vector<1x2x32xf32>,
    %c1_57 = arith.constant 1 : index
    %c0_58 = arith.constant 0 : index
    %c0_59 = arith.constant 0 : index
    %118 = vector.load %arg14[%c1_57, %c0_58, %c0_59] : memref<2x2x32xf32, #tpu.memory_space<vmem>>, vector<1x2x32xf32>
    %119 = vector.shape_cast %118 : vector<1x2x32xf32> to vector<2x32xf32>
    %120 = vector.shape_cast %111 : vector<2x32xf32> to vector<1x2x32xf32>
    tpu.vector_store %arg14[%c1_57, %c0_58, %c0_59], %120 {strides = array<i32>} : memref<2x2x32xf32, #tpu.memory_space<vmem>>, vector<1x2x32xf32>,
    %c1_60 = arith.constant 1 : index
    %c0_61 = arith.constant 0 : index
    %c0_62 = arith.constant 0 : index
    %121 = vector.load %arg15[%c1_60, %c0_61, %c0_62] : memref<2x2x32xf32, #tpu.memory_space<vmem>>, vector<1x2x32xf32>
    %122 = vector.shape_cast %121 : vector<1x2x32xf32> to vector<2x32xf32>
    %123 = vector.shape_cast %109 : vector<2x32xf32> to vector<1x2x32xf32>
    tpu.vector_store %arg15[%c1_60, %c0_61, %c0_62], %123 {strides = array<i32>} : memref<2x2x32xf32, #tpu.memory_space<vmem>>, vector<1x2x32xf32>,
    %124 = tpu.concatenate %111, %36 in 1 : vector<2x32xf32>, vector<2x64xf32> -> vector<2x96xf32>
    %125 = arith.truncf %124 : vector<2x96xf32> to vector<2x96xbf16>
    %c0_63 = arith.constant 0 : index
    %c0_64 = arith.constant 0 : index
    %c0_65 = arith.constant 0 : index
    %126 = vector.load %arg12[%c0_63, %c0_64, %c0_65] : memref<1x2x96xbf16, #tpu.memory_space<vmem>>, vector<1x2x96xbf16>
    %127 = vector.shape_cast %126 : vector<1x2x96xbf16> to vector<2x96xbf16>
    %128 = vector.shape_cast %125 : vector<2x96xbf16> to vector<1x2x96xbf16>
    tpu.vector_store %arg12[%c0_63, %c0_64, %c0_65], %128 {strides = array<i32>} : memref<1x2x96xbf16, #tpu.memory_space<vmem>>, vector<1x2x96xbf16>,
    %c0_66 = arith.constant 0 : index
    %c0_67 = arith.constant 0 : index
    %c0_68 = arith.constant 0 : index
    %129 = vector.load %arg13[%c0_66, %c0_67, %c0_68] : memref<1x2x8xf32, #tpu.memory_space<vmem>>, vector<1x2x8xf32>
    %130 = vector.shape_cast %129 : vector<1x2x8xf32> to vector<2x8xf32>
    %131 = vector.shape_cast %32 : vector<2x8xf32> to vector<1x2x8xf32>
    tpu.vector_store %arg13[%c0_66, %c0_67, %c0_68], %131 {strides = array<i32>} : memref<1x2x8xf32, #tpu.memory_space<vmem>>, vector<1x2x8xf32>,
    return
  }
  func.func @transform_0(%arg0: i32) -> (i32, i32, i32) {
    %c0_i32 = arith.constant 0 : i32
    %c0_i32_0 = arith.constant 0 : i32
    %c0_i32_1 = arith.constant 0 : i32
    return %arg0, %c0_i32, %c0_i32_0 : i32, i32, i32
  }
  func.func @transform_1(%arg0: i32) -> (i32, i32, i32) {
    %c0_i32 = arith.constant 0 : i32
    %c0_i32_0 = arith.constant 0 : i32
    %c0_i32_1 = arith.constant 0 : i32
    %c0_i32_2 = arith.constant 0 : i32
    return %c0_i32, %c0_i32_0, %c0_i32_1 : i32, i32, i32
  }
  func.func @transform_2(%arg0: i32) -> (i32, i32, i32) {
    %c0_i32 = arith.constant 0 : i32
    %c0_i32_0 = arith.constant 0 : i32
    %c0_i32_1 = arith.constant 0 : i32
    %c0_i32_2 = arith.constant 0 : i32
    return %c0_i32, %c0_i32_0, %c0_i32_1 : i32, i32, i32
  }
  func.func @transform_3(%arg0: i32) -> (i32, i32) {
    %c0_i32 = arith.constant 0 : i32
    %c0_i32_0 = arith.constant 0 : i32
    %c0_i32_1 = arith.constant 0 : i32
    return %c0_i32, %c0_i32_0 : i32, i32
  }
  func.func @transform_4(%arg0: i32) -> (i32, i32, i32) {
    %c0_i32 = arith.constant 0 : i32
    %c0_i32_0 = arith.constant 0 : i32
    %c0_i32_1 = arith.constant 0 : i32
    %c0_i32_2 = arith.constant 0 : i32
    return %c0_i32, %c0_i32_0, %c0_i32_1 : i32, i32, i32
  }
  func.func @transform_5(%arg0: i32) -> (i32, i32, i32) {
    %c0_i32 = arith.constant 0 : i32
    %c0_i32_0 = arith.constant 0 : i32
    %c0_i32_1 = arith.constant 0 : i32
    %c0_i32_2 = arith.constant 0 : i32
    return %c0_i32, %c0_i32_0, %c0_i32_1 : i32, i32, i32
  }
  func.func @transform_6(%arg0: i32) -> (i32, i32) {
    %c0_i32 = arith.constant 0 : i32
    %c0_i32_0 = arith.constant 0 : i32
    %c0_i32_1 = arith.constant 0 : i32
    return %c0_i32, %c0_i32_0 : i32, i32
  }
  func.func @transform_7(%arg0: i32) -> (i32, i32) {
    %c0_i32 = arith.constant 0 : i32
    %c0_i32_0 = arith.constant 0 : i32
    %c0_i32_1 = arith.constant 0 : i32
    return %c0_i32, %c0_i32_0 : i32, i32
  }
  func.func @transform_8(%arg0: i32) -> (i32, i32) {
    %c0_i32 = arith.constant 0 : i32
    %c0_i32_0 = arith.constant 0 : i32
    %c0_i32_1 = arith.constant 0 : i32
    return %c0_i32, %c0_i32_0 : i32, i32
  }
  func.func @transform_9(%arg0: i32) -> (i32, i32, i32) {
    %c0_i32 = arith.constant 0 : i32
    %c0_i32_0 = arith.constant 0 : i32
    %c0_i32_1 = arith.constant 0 : i32
    %c0_i32_2 = arith.constant 0 : i32
    return %c0_i32, %c0_i32_0, %c0_i32_1 : i32, i32, i32
  }
  func.func @transform_10(%arg0: i32) -> (i32, i32, i32) {
    %c0_i32 = arith.constant 0 : i32
    %c0_i32_0 = arith.constant 0 : i32
    %c0_i32_1 = arith.constant 0 : i32
    %c0_i32_2 = arith.constant 0 : i32
    return %c0_i32, %c0_i32_0, %c0_i32_1 : i32, i32, i32
  }
  func.func @transform_11(%arg0: i32) -> (i32, i32, i32) {
    %c0_i32 = arith.constant 0 : i32
    %c0_i32_0 = arith.constant 0 : i32
    %c0_i32_1 = arith.constant 0 : i32
    return %arg0, %c0_i32, %c0_i32_0 : i32, i32, i32
  }
  func.func @transform_12(%arg0: i32) -> (i32, i32, i32) {
    %c0_i32 = arith.constant 0 : i32
    %c0_i32_0 = arith.constant 0 : i32
    %c0_i32_1 = arith.constant 0 : i32
    return %arg0, %c0_i32, %c0_i32_0 : i32, i32, i32
  }
}

module attributes {stable_mosaic.version = 11 : i64} {
  func.func @_dense_stack_kernel(%arg0: i32, %arg1: i32, %arg2: memref<8x96xbf16, #tpu.memory_space<vmem>>, %arg3: memref<1x96x129xbf16, #tpu.memory_space<vmem>>, %arg4: memref<1x1x129xf32, #tpu.memory_space<vmem>>, %arg5: memref<1x8x129xf32, #tpu.memory_space<vmem>>) attributes {dimension_semantics = [#tpu.dimension_semantics<parallel>, #tpu.dimension_semantics<arbitrary>], iteration_bounds = array<i64: 1, 1>, scalar_prefetch = 0 : i64, scratch_operands = 0 : i64, tpu.core_type = #tpu.core_type<tc>, window_params = [{transform_indices = @transform_0, window_bounds = array<i64: 8, 96>}, {transform_indices = @transform_1, window_bounds = array<i64: 1, 96, 129>}, {transform_indices = @transform_2, window_bounds = array<i64: 1, 1, 129>}, {transform_indices = @transform_3, window_bounds = array<i64: 1, 8, 129>}]} {
    %c0 = arith.constant 0 : index
    %c0_0 = arith.constant 0 : index
    %c0_1 = arith.constant 0 : index
    %0 = vector.load %arg3[%c0, %c0_0, %c0_1] : memref<1x96x129xbf16, #tpu.memory_space<vmem>>, vector<1x96x129xbf16>
    %1 = vector.shape_cast %0 : vector<1x96x129xbf16> to vector<96x129xbf16>
    %c0_2 = arith.constant 0 : index
    %c0_3 = arith.constant 0 : index
    %2 = vector.load %arg2[%c0_2, %c0_3] : memref<8x96xbf16, #tpu.memory_space<vmem>>, vector<8x96xbf16>
    %cst = arith.constant dense<0.000000e+00> : vector<8x129xf32>
    %3 = tpu.matmul %2, %1, %cst {dimension_numbers = #tpu.dot_dimension_numbers<[1], [0], [0], [1], [0, 0, 1, 1], [], []>} : vector<8x96xbf16>, vector<96x129xbf16>, vector<8x129xf32> -> vector<8x129xf32>
    %c0_4 = arith.constant 0 : index
    %c0_5 = arith.constant 0 : index
    %c0_6 = arith.constant 0 : index
    %4 = vector.load %arg4[%c0_4, %c0_5, %c0_6] : memref<1x1x129xf32, #tpu.memory_space<vmem>>, vector<1x1x129xf32>
    %5 = vector.shape_cast %4 : vector<1x1x129xf32> to vector<1x129xf32>
    %6 = vector.broadcast %5 : vector<1x129xf32> to vector<8x129xf32>
    %7 = arith.addf %3, %6 : vector<8x129xf32>
    %c0_7 = arith.constant 0 : index
    %c0_8 = arith.constant 0 : index
    %c0_9 = arith.constant 0 : index
    %8 = vector.load %arg5[%c0_7, %c0_8, %c0_9] : memref<1x8x129xf32, #tpu.memory_space<vmem>>, vector<1x8x129xf32>
    %9 = vector.shape_cast %8 : vector<1x8x129xf32> to vector<8x129xf32>
    %10 = vector.shape_cast %7 : vector<8x129xf32> to vector<1x8x129xf32>
    tpu.vector_store %arg5[%c0_7, %c0_8, %c0_9], %10 {strides = array<i32>} : memref<1x8x129xf32, #tpu.memory_space<vmem>>, vector<1x8x129xf32>,
    return
  }
  func.func @transform_0(%arg0: i32, %arg1: i32) -> (i32, i32) {
    %c0_i32 = arith.constant 0 : i32
    %c0_i32_0 = arith.constant 0 : i32
    return %arg0, %c0_i32 : i32, i32
  }
  func.func @transform_1(%arg0: i32, %arg1: i32) -> (i32, i32, i32) {
    %c0_i32 = arith.constant 0 : i32
    %c0_i32_0 = arith.constant 0 : i32
    %c0_i32_1 = arith.constant 0 : i32
    return %arg1, %c0_i32, %c0_i32_0 : i32, i32, i32
  }
  func.func @transform_2(%arg0: i32, %arg1: i32) -> (i32, i32, i32) {
    %c0_i32 = arith.constant 0 : i32
    %c0_i32_0 = arith.constant 0 : i32
    %c0_i32_1 = arith.constant 0 : i32
    return %arg1, %c0_i32, %c0_i32_0 : i32, i32, i32
  }
  func.func @transform_3(%arg0: i32, %arg1: i32) -> (i32, i32, i32) {
    %c0_i32 = arith.constant 0 : i32
    %c0_i32_0 = arith.constant 0 : i32
    return %arg1, %arg0, %c0_i32 : i32, i32, i32
  }
}

</mosaic_0001>

<bundles_post_ra>
// kernel: pgn_forward.10
= control target key start
LH: loop header
LB: loop body
LE: loop exit
PB: predicated region body
PF: predicated region fallthrough
CT: control target
= control target key end

     0   :  { %s561_s12 = smov 0   ;;  %s563_s13 = smov 0   ;;  %s600_s0 = inlined_call_operand.vmem [shape: bf16[16,64], index: 0, kind: input, shape index: {}]   ;;  %s601_s1 = inlined_call_operand.vmem [shape: bf16[2,64,128], index: 1, kind: input, shape index: {}]   ;;  %s602_s2 = inlined_call_operand.vmem [shape: f32[2,1,128], index: 2, kind: input, shape index: {}]   ;;  %s603_s3 = inlined_call_operand.vmem [shape: bf16[2,16,128], index: 3, kind: output, shape index: {}]  }
   0x1   :  { %s565_s14 = smov 0  }
   0x2 LB: > { %s22_s15 = sadd.s32 1, %s533_s13  ;;  %p442_p0 = scmp.ge.s32.totalorder %s537_s14, 1  ;;  %s537_s14 = sphi %s565_s14, %s13_s14   ;;  %s533_s13 = sphi %s563_s13, %s605_s13   ;;  %s529_s12 = sphi %s561_s12, %s604_s12  }
   0x3   : > { %p23_p1 = scmp.ge.s32.totalorder %s22_s15, 2  ;;  %p170_p2 = scmp.lt.s32.totalorder %s537_s14, 3 }
   0x5   : > { %s607_s15 = smov (%p23_p1, %s22_s15), 0  ;;  %p171_p3 = pnand %p442_p0, %p170_p2 }
   0x6   : > { %p212_p4 = scmp.lt.s32.totalorder (!%p171_p3), %s529_s12, 1  ;;  %v539_v0 = vmov (!%p171_p3), 0.0   ;;  %vm540_vm0 = vmmov (!%p171_p3), 0   ;;  %v514_v5 = vld [vmem:[%s600_s0] sm:$0xff] (!%p171_p3)   ;;  %vm277_vm1 = vcmask (!%p171_p3), 523264  }
   0x7   : > { %174 = sbr.rel (%p171_p3) target bundleno = 252 (0xfc), region = 32  ;;  %472 = vmatprep.subr.bf16.mxu0 (!%p171_p3), %v539_v0  ;;  %480 = vmatprep.mubr.msk.bf16.mxu0 (!%p171_p3), %vm540_vm0, %v539_v0 }
   0xe   : > { %s609_s12 = smov (!%p212_p4, %s529_s12), 1 }
   0xf   : > { %s458_s16 = sshll.u32 %s609_s12, 5  ;;  %s219_s24 = scalar_lea.vmem %s602_s2, %s609_s12 }
  0x10   : > { %s216_s19 = scalar_lea.vmem %s601_s1, %s458_s16  ;;  %v447_v6 = vld [vmem:[%s219_s24] ss:$0 sm:$0xff]  ;;  %s459_s25 = sshll.u32 %s609_s12, 3 }
  0x11   : > { %v510_v1 = vld [vmem:[%s216_s19] sm:$0xff]   ;;  %v511_v2 = vld [vmem:[%s216_s19 + $0x8] sm:$0xff]   ;;  %v512_v3 = vld [vmem:[%s216_s19 + $0x10] sm:$0xff]   ;;  %s228_s28 = scalar_lea.vmem %s603_s3, %s459_s25 }
  0x12   : > { %473 = vmatpush3.bf16.msra.mxu0 %v510_v1  ;;  %v513_v4 = vld [vmem:[%s216_s19 + $0x18] sm:$0xff]  }
  0x13   : > { %474 = vmatprep.subr.bf16.mxu0 %v539_v0 }
  0x16   : > { %475 = vmatpush3.bf16.msra.mxu0 %v511_v2 }
  0x17   : > { %476 = vmatprep.subr.bf16.mxu0 %v539_v0 }
  0x1a   : > { %477 = vmatpush3.bf16.msra.mxu0 %v512_v3 }
  0x1b   : > { %478 = vmatprep.subr.bf16.mxu0 %v539_v0 }
  0x1e   : > { %479 = vmatpush3.bf16.msra.mxu0 %v513_v4 }
  0x21   : > { %481 = vmatmul.mubr.msk.bf16.vlgmr.msra.gmra.mrb[0].mxu0 %vm277_vm1, %v514_v5 }
  0xf4   : > { %v315_v7 = vpop.f32.mrb[0].mxu0 }
  0xf5   : > { %v482_v8 = vpop.f32.mrb[1].mxu0  ;;  %v316_v10 = vadd.f32 %v447_v6, %v315_v7 }
  0xf6   : > { %v318_v9 = vpop.f32.mrb[2].mxu0 }
  0xf7   : > { %v319_v11 = vadd.f32 %v447_v6, %v318_v9  ;;  %v483_v12 = vpop.f32.mrb[3].mxu0 }
  0xf9   : > { %v465_v13 = vpack.c.bf16 %v319_v11, %v316_v10 }
  0xfb   : > { %466 = vst [vmem:[%s228_s28] sm:$0xff] %v465_v13  }
  0xfc PF: > { %s13_s14 = sadd.s32 1, %s537_s14   ;;  %s604_s12 = smov %s533_s13 }
  0xfd   : > { %p10_p5 = scmp.ge.s32.totalorder %s13_s14, 4   ;;  %s605_s13 = smov %s607_s15 }
  0xff   :  { %12 = sbr.rel (!%p10_p5) target bundleno = 2 (0x2), region = 68 }

// kernel: pgn_forward.8
= control target key start
LH: loop header
LB: loop body
LE: loop exit
PB: predicated region body
PF: predicated region fallthrough
CT: control target
= control target key end

     0   :  { %8 = vsyncpa [#allocation3], 0  ;;  %s1487_s0 = inlined_call_operand.vmem [shape: bf16[16,768], index: 0, kind: input, shape index: {}]   ;;  %s1488_s1 = inlined_call_operand.hbm [shape: bf16[2,768,128], index: 1, kind: input, shape index: {}]   ;;  %s1489_s2 = inlined_call_operand.vmem [shape: f32[2,1,128], index: 2, kind: input, shape index: {}]   ;;  %s1490_s3 = inlined_call_operand.vmem [shape: bf16[2,16,128], index: 3, kind: output, shape index: {}]  }
   0x1   :  { %10 = vsyncpa [#allocation3 + $0x1], 0  ;;  %s1294_s12 = smov 0   ;;  %s1296_s13 = smov 0  }
   0x2   :  { %s1298_s14 = smov 0   ;;  %s1300_s15 = smov 0  }
   0x3   :  { %s1302_s16 = smov 0   ;;  %s1304_s17 = smov 0  }
   0x4 LB: > { %s930_s18 = sadd.s32 4294967295, %s1269_s17   ;;  %s25_s19 = sadd.s32 1, %s1265_s16  ;;  %s1269_s17 = sphi %s1304_s17, %s16_s17   ;;  %s1265_s16 = sphi %s1302_s16, %s1497_s16   ;;  %s1261_s15 = sphi %s1300_s15, %s1496_s15   ;;  %s1257_s14 = sphi %s1298_s14, %s1495_s14   ;;  %s1253_s13 = sphi %s1296_s13, %s1494_s13   ;;  %s1249_s12 = sphi %s1294_s12, %s1493_s12  }
   0x5   : > { %p26_p0 = scmp.ge.s32.totalorder %s25_s19, 2  ;;  %s61_s20 = sadd.s32 1, %s1257_s14 }
   0x6   : > { %p68_p1 = scmp.ne.s32.totalorder %s1257_s14, %s1253_s13  ;;  %p69_p2 = scmp.eq.s32.totalorder %s1269_s17, 0 }
   0x7   : > { %s1499_s19 = smov (%p26_p0, %s25_s19), 0  ;;  %p74_p4 = scmp.ne.s32.totalorder %s1253_s13, %s1249_s12 }
   0x8   : > { %p70_p3 = por %p69_p2, %p68_p1  ;;  %s58_s21 = ssub.s32 %s1265_s16, %s1499_s19 }
   0x9   : > { %p75_p5 = scmp.eq.s32.totalorder %s930_s18, 0  ;;  %p59_p6 = scmp.eq.s32.totalorder %s58_s21, 0 }
   0xa   : > { %p1081_p8 = scmp.lt.s32.totalorder %s1269_s17, 2  ;;  %s162_s24 = sand.u32 1, %s1257_s14  }
   0xb   : > { %p1333_p7 = por %p75_p5, %p74_p4  ;;  %s1073_s25 = smul.u32 6144, %s1265_s16 }
   0xc   : > { %s1339_s23 = scalar_select %p59_p6, %s1257_s14, %s61_s20  }
   0xd   : > { %s1072_s26 = smul.u32 384, %s162_s24  ;;  %s1346_s29 = scalar_lea.hbm %s1488_s1, %s1073_s25 }
   0xe   : > { %p1348_p9 = pnand %p1081_p8, %p70_p3  ;;  %s1354_s6 = scalar_lea.sflag [#allocation3], %s162_s24 }
   0xf   : > { %s166_s4 = scalar_lea.vmem [#allocation2], %s1072_s26  ;;  %s1189_s7 = scalar_lea.hbm %s1346_s29, 6144 }
  0x10   : > { %s173_s5 = sshll.u32 %s166_s4, 4  ;;  %p1190_p10 = scmp.ne.s32.totalorder %s1346_s29, %s1189_s7  ;;  %s1352_s5 = int_to_ptr.vmem [resolvable:$true] %s173_s5 }
  0x11   : > { %p1191_p11 = pneg %p1348_p9  ;;  %s1194_s10 = scalar_lea.hbm %s1488_s1, 12288 }
  0x12   : > { %p1195_p0 = scmp.lt.u32.totalorder %s1346_s29, %s1488_s1  ;;  %p1196_p1 = scmp.lt.u32.totalorder %s1194_s10, %s1189_s7 }
  0x13   : > { %p1192_p12 = pnand %p1191_p11, %p1190_p10  ;;  %p1198_p3 = scmp.lt.u32.totalorder %s1189_s7, %s1346_s29 }
  0x14   : > { %p1197_p2 = por %p1196_p1, %p1195_p0 }
  0x15   : > { %p1193_p13 = pneg %p1192_p12 }
  0x16   : > { %p1199_p4 = por %p1198_p3, %p1197_p2 }
  0x18   : > { %p1200_p5 = pnand %p1199_p4, %p1193_p13 }
  0x1a   : > { %1203 = shalt.err (!%p1200_p5)
}
  0x1b   : > { %s1204_s18 = scalar_lea.vmem %s1352_s5, 6144  ;;  %s1271_s20 = smov [#allocation2]  }
  0x1c   : > { %p1205_p6 = scmp.ne.s32.totalorder %s1352_s5, %s1204_s18  ;;  %s1209_s21 = sshll.u32 %s1271_s20, 4  ;;  %s1210_s21 = int_to_ptr.vmem [resolvable:$false] %s1209_s21 }
  0x1d   : > { %s1211_s24 = scalar_lea.vmem %s1210_s21, 12288  ;;  %p1212_p12 = scmp.lt.s32.totalorder %s1352_s5, %s1210_s21 }
  0x1e   : > { %p1207_p8 = pnand %p1205_p6, %p1191_p11  ;;  %p1213_p0 = scmp.lt.s32.totalorder %s1211_s24, %s1204_s18 }
  0x20   : > { %p1208_p10 = pneg %p1207_p8  ;;  %p1214_p1 = por %p1213_p0, %p1212_p12 }
  0x22   : > { %p1215_p2 = pnand %p1214_p1, %p1208_p10 }
  0x24   : > { %1218 = shalt.err (!%p1215_p2)
}
  0x25   : > { %s1272_s25 = smov 64   ;;  %s1273_s26 = smov 4  }
  0x26   : > { %1080 = dma.hbm_to_vmem [thread:$0]  (!%p1348_p9), %s1346_s29, 6144, %s1352_s5, %s1354_s6, %s1272_s25, %s1272_s25, %s1273_s26  }
  0x27   : > { %p936_p11 = scmp.ge.s32.totalorder %s1269_s17, 1  ;;  %p187_p13 = scmp.lt.s32.totalorder %s1269_s17, 3 }
  0x29   : > { %p188_p3 = pnand %p936_p11, %p187_p13 }
  0x2a   : > { %s193_s27 = sand.u32 (!%p188_p3), 1, %s1253_s13  }
  0x2b   : > { %191 = sbr.rel (%p188_p3) target bundleno = 338 (0x152), region = 32  ;;  %s194_s4 = scalar_lea.sflag (!%p188_p3), [#allocation3], %s193_s27 }
  0x2c   : > { %s1074_s28 = smul.u32 (!%p188_p3), 384, %s193_s27 }
  0x2e   : > { %s1385_s7 = scalar_lea.vmem (!%p188_p3), [#allocation2], %s1074_s28 }
  0x32   : > { %1244 = dma.done.wait (%p1333_p7), %s194_s4, 6144  }
  0x33   : > { %1246 = vsyncadd (%p1333_p7), %s194_s4, 4294961152  ;;  %v1132_v0 = vld [vmem:[%s1385_s7 + $0x40] sm:$0xff]   ;;  %v1136_v4 = vld [vmem:[%s1385_s7 + $0x48] sm:$0xff]   ;;  %p240_p7 = scmp.lt.s32.totalorder %s1261_s15, 1 }
  0x34   : > { %v1133_v1 = vld [vmem:[%s1385_s7] sm:$0xff]   ;;  %1006 = vmatprep.subr.bf16.mxu0 %v1132_v0  ;;  %v1137_v5 = vld [vmem:[%s1385_s7 + $0x8] sm:$0xff]   ;;  %v1140_v8 = vld [vmem:[%s1385_s7 + $0x50] sm:$0xff]  }
  0x35   : > { %v1134_v2 = vld [vmem:[%s1385_s7 + $0xc0] sm:$0xff]   ;;  %1007 = vmatpush3.bf16.msra.mxu0 %v1133_v1  ;;  %v1138_v6 = vld [vmem:[%s1385_s7 + $0xc8] sm:$0xff]   ;;  %v1141_v9 = vld [vmem:[%s1385_s7 + $0x10] sm:$0xff]   ;;  %s1501_s15 = smov (!%p240_p7, %s1261_s15), 1 }
  0x36   : > { %v1135_v3 = vld [vmem:[%s1385_s7 + $0x80] sm:$0xff]   ;;  %1028 = vmatprep.subr.bf16.mxu1 %v1134_v2  ;;  %1008 = vmatprep.subr.bf16.mxu0 %v1136_v4  ;;  %v1139_v7 = vld [vmem:[%s1385_s7 + $0x88] sm:$0xff]   ;;  %v1142_v10 = vld [vmem:[%s1385_s7 + $0xd0] sm:$0xff]   ;;  %s242_s25 = scalar_lea.vmem %s1489_s2, %s1501_s15  ;;  %s998_s26 = sshll.u32 %s1501_s15, 3 }
  0x37   : > { %1029 = vmatpush3.bf16.msra.mxu1 %v1135_v3  ;;  %v1143_v11 = vld [vmem:[%s1385_s7 + $0x90] sm:$0xff]   ;;  %v1144_v12 = vld [vmem:[%s1385_s7 + $0x58] sm:$0xff]   ;;  %v1148_v16 = vld [vmem:[%s1385_s7 + $0x60] sm:$0xff]   ;;  %s251_s4 = scalar_lea.vmem %s1490_s3, %s998_s26 }
  0x38   : > { %1030 = vmatprep.subr.bf16.mxu1 %v1138_v6  ;;  %v1145_v13 = vld [vmem:[%s1385_s7 + $0x18] sm:$0xff]   ;;  %v1149_v17 = vld [vmem:[%s1385_s7 + $0x20] sm:$0xff]   ;;  %v1152_v20 = vld [vmem:[%s1385_s7 + $0x68] sm:$0xff]  }
  0x39   : > { %1009 = vmatpush3.bf16.msra.mxu0 %v1137_v5  ;;  %v1146_v14 = vld [vmem:[%s1385_s7 + $0xd8] sm:$0xff]   ;;  %v1150_v18 = vld [vmem:[%s1385_s7 + $0xe0] sm:$0xff]   ;;  %v1153_v21 = vld [vmem:[%s1385_s7 + $0x28] sm:$0xff]  }
  0x3a   : > { %1010 = vmatprep.subr.bf16.mxu0 %v1140_v8  ;;  %v1147_v15 = vld [vmem:[%s1385_s7 + $0x98] sm:$0xff]   ;;  %v1151_v19 = vld [vmem:[%s1385_s7 + $0xa0] sm:$0xff]   ;;  %v1154_v22 = vld [vmem:[%s1385_s7 + $0xe8] sm:$0xff]  }
  0x3b   : > { %1031 = vmatpush3.bf16.msra.mxu1 %v1139_v7  ;;  %v1155_v23 = vld [vmem:[%s1385_s7 + $0xa8] sm:$0xff]   ;;  %v1156_v24 = vld [vmem:[%s1385_s7 + $0x70] sm:$0xff]   ;;  %v1160_v28 = vld [vmem:[%s1385_s7 + $0x78] sm:$0xff]  }
  0x3c   : > { %1032 = vmatprep.subr.bf16.mxu1 %v1142_v10  ;;  %v1157_v25 = vld [vmem:[%s1385_s7 + $0x30] sm:$0xff]   ;;  %v1161_v29 = vld [vmem:[%s1385_s7 + $0x38] sm:$0xff]   ;;  %v1167_v34 = vld [vmem:[%s1385_s7 + $0x140] sm:$0xff]  }
  0x3d   : > { %1011 = vmatpush3.bf16.msra.mxu0 %v1141_v9  ;;  %v1158_v26 = vld [vmem:[%s1385_s7 + $0xf0] sm:$0xff]   ;;  %v1162_v30 = vld [vmem:[%s1385_s7 + $0xf8] sm:$0xff]   ;;  %v1168_v35 = vld [vmem:[%s1487_s0 + $0x8] ss:$24 sps:$4 sm:$0xff]  }
  0x3e   : > { %1012 = vmatprep.subr.bf16.mxu0 %v1144_v12  ;;  %v1159_v27 = vld [vmem:[%s1385_s7 + $0xb0] sm:$0xff]   ;;  %v1163_v31 = vld [vmem:[%s1487_s0] ss:$24 sps:$4 sm:$0xff]   ;;  %v1165_v32 = vld [vmem:[%s1487_s0 + $0x4] ss:$24 sps:$4 sm:$0xff]  }
  0x3f   : > { %1033 = vmatpush3.bf16.msra.mxu1 %v1143_v11  ;;  %v1166_v33 = vld [vmem:[%s1385_s7 + $0xb8] sm:$0xff]   ;;  %713 = vmatprep.mubr.bf16.mxu0 %v1165_v32  ;;  %v1170_v36 = vld [vmem:[%s1487_s0 + $0xc] ss:$24 sps:$4 sm:$0xff]   ;;  %v1174_v40 = vld [vmem:[%s1385_s7 + $0x150] sm:$0xff]  }
  0x40   : > { %1034 = vmatprep.subr.bf16.mxu1 %v1146_v14  ;;  %v1171_v37 = vld [vmem:[%s1385_s7 + $0x100] sm:$0xff]   ;;  %754 = vmatprep.mubr.bf16.mxu1 %v1170_v36  ;;  %v1172_v38 = vld [vmem:[%s1385_s7 + $0x148] sm:$0xff]   ;;  %v1175_v41 = vld [vmem:[%s1385_s7 + $0x110] sm:$0xff]  }
  0x41   : > { %1013 = vmatpush3.bf16.msra.mxu0 %v1145_v13  ;;  %v1173_v39 = vld [vmem:[%s1385_s7 + $0x108] sm:$0xff]   ;;  %v1176_v42 = vld [vmem:[%s1385_s7 + $0x158] sm:$0xff]   ;;  %v1178_v44 = vld [vmem:[%s1385_s7 + $0x160] sm:$0xff]  }
  0x42   : > { %1014 = vmatprep.subr.bf16.mxu0 %v1148_v16  ;;  %v1177_v43 = vld [vmem:[%s1385_s7 + $0x118] sm:$0xff]   ;;  %v1179_v45 = vld [vmem:[%s1385_s7 + $0x120] sm:$0xff]   ;;  %v1180_v46 = vld [vmem:[%s1385_s7 + $0x168] sm:$0xff]  }
  0x43   : > { %1035 = vmatpush3.bf16.msra.mxu1 %v1147_v15  ;;  %v1188_v47 = vld [vmem:[%s1487_s0 + $0x14] ss:$24 sps:$4 sm:$0xff]   ;;  %v1184_v51 = vld [vmem:[%s1385_s7 + $0x178] sm:$0xff]   ;;  %v1186_v53 = vld [vmem:[%s1487_s0 + $0x10] ss:$24 sps:$4 sm:$0xff]  }
  0x44   : > { %1036 = vmatprep.subr.bf16.mxu1 %v1150_v18  ;;  %v1181_v48 = vld [vmem:[%s1385_s7 + $0x128] sm:$0xff]   ;;  %v1182_v49 = vld [vmem:[%s1385_s7 + $0x170] sm:$0xff]   ;;  %v1185_v52 = vld [vmem:[%s1385_s7 + $0x138] sm:$0xff]  }
  0x45   : > { %1015 = vmatpush3.bf16.msra.mxu0 %v1149_v17  ;;  %v1183_v50 = vld [vmem:[%s1385_s7 + $0x130] sm:$0xff]   ;;  %v939_v55 = vld [vmem:[%s242_s25] ss:$0 sm:$0xff] }
  0x46   : > { %1016 = vmatprep.subr.bf16.mxu0 %v1152_v20 }
  0x47   : > { %1037 = vmatpush3.bf16.msra.mxu1 %v1151_v19 }
  0x48   : > { %1038 = vmatprep.subr.bf16.mxu1 %v1154_v22 }
  0x49   : > { %1017 = vmatpush3.bf16.msra.mxu0 %v1153_v21 }
  0x4a   : > { %1018 = vmatprep.subr.bf16.mxu0 %v1156_v24 }
  0x4b   : > { %1039 = vmatpush3.bf16.msra.mxu1 %v1155_v23 }
  0x4c   : > { %1040 = vmatprep.subr.bf16.mxu1 %v1158_v26 }
  0x4d   : > { %1019 = vmatpush3.bf16.msra.mxu0 %v1157_v25 }
  0x4e   : > { %1020 = vmatprep.subr.bf16.mxu0 %v1160_v28 }
  0x4f   : > { %1041 = vmatpush3.bf16.msra.mxu1 %v1159_v27 }
  0x50   : > { %1042 = vmatprep.subr.bf16.mxu1 %v1162_v30 }
  0x51   : > { %1021 = vmatpush3.bf16.msra.mxu0 %v1161_v29 }
  0x52   : > { %1050 = vmatprep.subr.bf16.mxu0 %v1167_v34 }
  0x53   : > { %1043 = vmatpush3.bf16.msra.mxu1 %v1166_v33 }
  0x54   : > { %714 = vmatmul.mubr.bf16.vlgmr.msra.gmra.mrb[0].mxu0 %v1163_v31 }
  0x55   : > { %1051 = vmatpush3.bf16.msra.mxu0 %v1171_v37  ;;  %795 = vmatprep.mubr.bf16.mxu0 %v1188_v47 }
  0x56   : > { %755 = vmatmul.mubr.bf16.vlgmr.msra.gmra.mrb[0].mxu1 %v1168_v35  ;;  %1052 = vmatprep.subr.bf16.mxu0 %v1172_v38 }
  0x59   : > { %1053 = vmatpush3.bf16.msra.mxu0 %v1173_v39 }
  0x5a   : > { %1054 = vmatprep.subr.bf16.mxu0 %v1174_v40 }
  0x5d   : > { %1055 = vmatpush3.bf16.msra.mxu0 %v1175_v41 }
  0x5e   : > { %1056 = vmatprep.subr.bf16.mxu0 %v1176_v42 }
  0x61   : > { %1057 = vmatpush3.bf16.msra.mxu0 %v1177_v43 }
  0x62   : > { %1058 = vmatprep.subr.bf16.mxu0 %v1178_v44 }
  0x65   : > { %1059 = vmatpush3.bf16.msra.mxu0 %v1179_v45 }
  0x66   : > { %1060 = vmatprep.subr.bf16.mxu0 %v1180_v46 }
  0x69   : > { %1061 = vmatpush3.bf16.msra.mxu0 %v1181_v48 }
  0x6a   : > { %1062 = vmatprep.subr.bf16.mxu0 %v1182_v49 }
  0x6d   : > { %1063 = vmatpush3.bf16.msra.mxu0 %v1183_v50 }
  0x6e   : > { %1064 = vmatprep.subr.bf16.mxu0 %v1184_v51 }
  0x71   : > { %1065 = vmatpush3.bf16.msra.mxu0 %v1185_v52 }
  0x74   : > { %796 = vmatmul.mubr.bf16.vlgmr.msra.gmra.mrb[4].mxu0 %v1186_v53 }
 0x127   : > { %v1022_v54 = vpop.f32.mrb[0].mxu0 }
 0x128   : > { %v1023_v56 = vpop.f32.mrb[1].mxu0 }
 0x129   : > { %v1024_v57 = vadd.f32 %v1023_v56, %v1022_v54  ;;  %v1025_v58 = vpop.f32.mrb[2].mxu0  ;;  %v1044_v59 = vpop.f32.mrb[0].mxu1 }
 0x12a   : > { %v1026_v60 = vpop.f32.mrb[3].mxu0  ;;  %v1045_v63 = vpop.f32.mrb[1].mxu1 }
 0x12b   : > { %v716_v61 = vadd.f32 %v1024_v57, %v939_v55  ;;  %v1027_v62 = vadd.f32 %v1026_v60, %v1025_v58  ;;  %v1046_v0 = vadd.f32 %v1045_v63, %v1044_v59  ;;  %v1047_v1 = vpop.f32.mrb[2].mxu1 }
 0x12c   : > { %v1048_v3 = vpop.f32.mrb[3].mxu1 }
 0x12d   : > { %v719_v2 = vadd.f32 %v1027_v62, %v939_v55  ;;  %v757_v4 = vadd.f32 %v1046_v0, %v716_v61  ;;  %v1049_v5 = vadd.f32 %v1048_v3, %v1047_v1 }
 0x12f   : > { %v760_v6 = vadd.f32 %v1049_v5, %v719_v2 }
 0x147   : > { %v1066_v7 = vpop.f32.mrb[4].mxu0 }
 0x148   : > { %v1067_v8 = vpop.f32.mrb[5].mxu0 }
 0x149   : > { %v1068_v9 = vadd.f32 %v1067_v8, %v1066_v7  ;;  %v1069_v10 = vpop.f32.mrb[6].mxu0 }
 0x14a   : > { %v1070_v11 = vpop.f32.mrb[7].mxu0 }
 0x14b   : > { %v798_v12 = vadd.f32 %v1068_v9, %v757_v4  ;;  %v1071_v13 = vadd.f32 %v1070_v11, %v1069_v10 }
 0x14d   : > { %v801_v14 = vadd.f32 %v1071_v13, %v760_v6 }
 0x14f   : > { %v1004_v15 = vpack.c.bf16 %v801_v14, %v798_v12 }
 0x151   : > { %1005 = vst [vmem:[%s251_s4] sm:$0xff] %v1004_v15  }
 0x152 PF: > { %s16_s17 = sadd.s32 1, %s1269_s17   ;;  %s1493_s12 = smov %s1253_s13 }
 0x153   : > { %p13_p9 = scmp.ge.s32.totalorder %s16_s17, 4   ;;  %s1494_s13 = smov %s1257_s14 }
 0x154   : > { %s1495_s14 = smov %s1339_s23  ;;  %s1496_s15 = smov %s1265_s16 }
 0x155   : > { %s1497_s16 = smov %s1499_s19  ;;  %15 = sbr.rel (!%p13_p9) target bundleno = 4 (0x4), region = 78 }
 0x15c   :  { %844 = vsyncpa [#allocation3], 1 }
 0x15d   :  { %846 = vsyncpa [#allocation3 + $0x1], 1 }

// kernel: pgn_forward.9
= control target key start
LH: loop header
LB: loop body
LE: loop exit
PB: predicated region body
PF: predicated region fallthrough
CT: control target
= control target key end

     0   :  { %s2056_s18 = smov 0   ;;  %s2058_s19 = smov 0   ;;  %s2377_s0 = inlined_call_operand.vmem [shape: bf16[2,8,2,128], index: 0, kind: input, shape index: {}]   ;;  %s2378_s1 = inlined_call_operand.vmem [shape: bf16[2,32,128], index: 1, kind: input, shape index: {}]   ;;  %s2379_s2 = inlined_call_operand.vmem [shape: f32[8,2,1], index: 2, kind: input, shape index: {}]   ;;  %s2380_s3 = inlined_call_operand.vmem [shape: bf16[2,8,2,32], index: 3, kind: output, shape index: {0}]   ;;  %s2381_s4 = inlined_call_operand.vmem [shape: f32[2,2,32], index: 4, kind: output, shape index: {1}]   ;;  %s2382_s5 = inlined_call_operand.vmem [shape: f32[2,2,32], index: 5, kind: output, shape index: {2}]  }
   0x1   :  { %s2060_s20 = smov 0  }
   0x2 LB: > { %s28_s21 = sadd.s32 1, %s2013_s19  ;;  %p1754_p0 = scmp.ge.s32.totalorder %s2017_s20, 1  ;;  %s2017_s20 = sphi %s2060_s20, %s16_s20   ;;  %s2013_s19 = sphi %s2058_s19, %s2384_s19   ;;  %s2009_s18 = sphi %s2056_s18, %s2383_s18  }
   0x3   : > { %p30_p1 = scmp.ge.s32.totalorder %s28_s21, 2  ;;  %p273_p2 = scmp.lt.s32.totalorder %s2017_s20, 3 }
   0x5   : > { %s2386_s21 = smov (%p30_p1, %s28_s21), 0  ;;  %p274_p3 = pnand %p1754_p0, %p273_p2 }
   0x6   : > { %p342_p4 = scmp.lt.s32.totalorder (!%p274_p3), %s2009_s18, 1  ;;  %vm403_vm0 = vcmask (!%p274_p3), 254976   ;;  %v2019_v0 = vmov (!%p274_p3), 0.0   ;;  %vm2020_vm1 = vmmov (!%p274_p3), 0   ;;  %vm429_vm2 = vcmask (!%p274_p3), 261120   ;;  %s410_s28 = smul.u32 (!%p274_p3), 7, %s2009_s18 }
   0x7   : > { %277 = sbr.rel (%p274_p3) target bundleno = 5769 (0x1689), region = 32  ;;  %1832 = vmatprep.subr.bf16.mxu0 (!%p274_p3), %v2019_v0  ;;  %1836 = vmatprep.mubr.msk.bf16.mxu0 (!%p274_p3), %vm2020_vm1, %v2019_v0  ;;  %404 = vst.msk [vmem:[#allocation2] sm:$0x3] (!%p274_p3), %vm403_vm0, %v2019_v0  ;;  %405 = vst.msk [vmem:[#allocation3] sm:$0x3] (!%p274_p3), %vm403_vm0, %v2019_v0  ;;  %v485_v13 = vlaneseq (!%p274_p3)  ;;  %v2022_v17 = vmov (!%p274_p3), 0  }
   0x8   : > { %1840 = vmatprep.subr.bf16.mxu1 (!%p274_p3), %v2019_v0  ;;  %1844 = vmatprep.mubr.msk.bf16.mxu1 (!%p274_p3), %vm2020_vm1, %v2019_v0  ;;  %v2021_v11 = vmov (!%p274_p3), 1983009808   ;;  %s1765_s8 = smul.u32 (!%p274_p3), 14, %s2009_s18  ;;  %s2023_s9 = smov (!%p274_p3), 64   ;;  %vm557_vm3 = vcmask (!%p274_p3), 253952  }
   0x9   : > { %v483_v12 = vunpack.c.l.s4 (!%p274_p3), %v2021_v11  ;;  %v486_v16 = vshrl.u32 (!%p274_p3), %v485_v13, 7  ;;  %1927 = vset.pattern.permute.xlu0 (!%p274_p3), %v2022_v17  ;;  %1928 = vset.pattern.permute.xlu1 (!%p274_p3), %v2022_v17  ;;  %s2024_s13 = smov (!%p274_p3), 32   ;;  %s2025_s14 = smov (!%p274_p3), 96  }
   0xa   : > { %s510_s12 = scalar_lea.vmem (!%p274_p3), %s2379_s2, %s1765_s8  ;;  %s1615_s24 = smul.u32 (!%p274_p3), 5, %s2009_s18 }
   0xb   : > { %v484_v15 = vunpack.c.0.s8 (!%p274_p3), %v483_v12  ;;  %v511_v22 = vld [vmem:[%s510_s12] sm:$0x3] (!%p274_p3)  ;;  %s1775_s10 = smul.u32 (!%p274_p3), 6, %s2009_s18 }
   0xc   : > { %v529_v35 = vsub.f32 (!%p274_p3), 1.0, %v511_v22 }
   0xd   : > { %v2129_v18 = vsub.s32 (!%p274_p3), %v484_v15, %v486_v16  ;;  %s1630_s15 = scalar_lea.vmem (!%p274_p3), %s2379_s2, %s1775_s10 }
   0xe   : > { %s2085_s22 = scalar_select %p342_p4, %s2009_s18, 1  ;;  %v2099_v3 = vld [vmem:[#allocation2] sm:$0x3]  ;;  %v412_v19 = vld [vmem:[#allocation3] sm:$0x3] }
   0xf   : > { %v416_v4 = vpack.c.bf16 %v2099_v3, %v2099_v3  ;;  %v488_v21 = vrot.slane %v412_v19, %v2129_v18 }
  0x10   : > { %s1807_s23 = sshll.u32 %s2085_s22, 4  ;;  %s1755_s27 = sshll.u32 %s2085_s22, 3 }
  0x11   : > { %s358_s26 = scalar_lea.vmem %s2378_s1, %s1807_s23  ;;  %s2124_s6 = scalar_lea.vmem %s2377_s0, %s1755_s27 }
  0x12   : > { %v2094_v1 = vld [vmem:[%s358_s26] sm:$0xff]   ;;  %v2097_v2 = vld [vmem:[%s358_s26 + $0x8] sm:$0xff]   ;;  %s413_s7 = scalar_lea.vmem %s2124_s6, %s410_s28  ;;  %s2156_s17 = scalar_lea.vmem %s2380_s3, %s1755_s27 }
  0x13   : > { %1833 = vmatpush3.bf16.msra.mxu0 %v2094_v1  ;;  %1841 = vmatpush3.bf16.msra.mxu1 %v2094_v1  ;;  %v414_v5 = vld [vmem:[%s413_s7] sm:$0x1]  ;;  %s556_s23 = scalar_lea.vmem %s2156_s17, %s410_s28  ;;  %s1616_s25 = scalar_lea.vmem %s2124_s6, %s1615_s24 }
  0x14   : > { %1834 = vmatprep.subr.bf16.mxu0 %v2019_v0  ;;  %1842 = vmatprep.subr.bf16.mxu1 %v2019_v0  ;;  %v415_v6 = vunpack.c.l.bf16 %v414_v5  ;;  %v1766_v55 = vld [vmem:[%s1616_s25 + $0x1] sm:$0x1]  ;;  %s1769_s26 = smul.u32 10, %s2009_s18  ;;  %s1623_s30 = scalar_lea.vmem %s2156_s17, %s1615_s24 }
  0x15   : > { %v565_v56 = vunpack.c.l.bf16 %v1766_v55  ;;  %s1625_s7 = smul.u32 3, %s2009_s18  ;;  %s1781_s24 = sshll.u32 %s2009_s18, 1 }
  0x16   : > { %s1620_s29 = scalar_lea.vmem %s2379_s2, %s1769_s26  ;;  %s1638_s27 = scalar_lea.vmem %s2379_s2, %s1781_s24 }
  0x17   : > { %1835 = vmatpush3.bf16.msra.mxu0 %v2097_v2  ;;  %1843 = vmatpush3.bf16.msra.mxu1 %v2097_v2  ;;  %s1626_s8 = scalar_lea.vmem %s2124_s6, %s1625_s7  ;;  %s1633_s16 = scalar_lea.vmem %s2156_s17, %s1625_s7 }
  0x18   : > { %1848 = vmatprep.subr.bf16.mxu0 %v2019_v0  ;;  %1856 = vmatprep.subr.bf16.mxu1 %v2019_v0  ;;  %s1640_s28 = scalar_lea.vmem %s2156_s17, %s2009_s18 }
  0x1a   : > { %1837 = vmatmul.mubr.msk.bf16.vlgmr.msra.gmra.mrb[0].mxu0 %vm429_vm2, %v416_v4 }
  0x1b   : > { %1849 = vmatpush3.bf16.msra.mxu0 %v2094_v1  ;;  %1852 = vmatprep.mubr.msk.bf16.mxu0 %vm2020_vm1, %v2019_v0 }
  0x1c   : > { %1850 = vmatprep.subr.bf16.mxu0 %v2019_v0 }
  0x1f   : > { %1851 = vmatpush3.bf16.msra.mxu0 %v2097_v2 }
  0x20   : > { %1864 = vmatprep.subr.bf16.mxu0 %v2019_v0 }
  0xed   : > { %v467_v7 = vpop.f32.mrb[0].mxu0 }
  0xee   : > { %v473_v8 = vadd.f32 %v467_v7, %v415_v6  ;;  %v1838_v9 = vpop.f32.mrb[1].mxu0 }
  0xef   : > { %v470_v10 = vpop.f32.mrb[2].mxu0 }
  0xf0   : > { %1931 = vtanh.f32 %v473_v8  ;;  %v1839_v14 = vpop.f32.mrb[3].mxu0  ;;  %v1764_v23 = vmul.f32 -1.442695, %v473_v8  ;;  %v1770_v8 = vld [vmem:[%s1620_s29 + $0x2] sm:$0x3]  ;;  %s2262_s29 = ssub.s32 4, %s2009_s18 }
  0xf1   : > { %v666_v14 = vsub.f32 1.0, %v1770_v8  ;;  %s1786_s7 = sshll.u32 %s2262_s29, 1  ;;  %s1095_s12 = scalar_lea.vmem %s2156_s17, %s2262_s29 }
  0xf2   : > { %1933 = vpow2.f32 %v1764_v23  ;;  %s1050_s11 = scalar_lea.vmem %s2379_s2, %s1786_s7 }
  0xfa   : > { %v1932_v20 = vpop.eup %1931 }
  0xfb   : > { %494 = vrot.lane.b32.xlu0 %v1932_v20, %s2023_s9 }
  0xfc   : > { %v1934_v24 = vpop.eup %1933 }
  0xfd   : > { %v477_v25 = vadd.f32 1.0, %v1934_v24 }
  0xff   : > { %489 = vrot.lane.b32.xlu0 %v488_v21, %s2024_s13  ;;  %1935 = vrcp.f32 %v477_v25 }
 0x103   : > { %514 = vperm.xlu0 %1927, %v511_v22  }
 0x109   : > { %v1936_v26 = vpop.eup %1935 }
 0x16d   : > { %v495_v27 = vpop.permute.xlu0 %494 }
 0x16e   : > { %v497_v28 = vmul.f32 %v1936_v26, %v495_v27 }
 0x170   : > { %499 = vrot.lane.b32.xlu1 %v497_v28, %s2024_s13 }
 0x171   : > { %v490_v29 = vpop.permute.xlu0 %489 }
 0x172   : > { %v492_v30 = vmul.f32 %v1936_v26, %v490_v29 }
 0x182   : > { %v515_v39 = vpop.permute.xlu0 %514 }
 0x1e2   : > { %v500_v31 = vpop.permute.xlu1 %499 }
 0x1e3   : > { %v502_v32 = vadd.f32 %v500_v31, %v492_v30 }
 0x1e5   : > { %1937 = vtanh.f32 %v502_v32  ;;  %v544_v33 = vrot.slane %v502_v32, %v2129_v18 }
 0x1e7   : > { %545 = vrot.lane.b32.xlu0 %v544_v33, %s2025_s14 }
 0x1ef   : > { %v1938_v34 = vpop.eup %1937 }
 0x1f0   : > { %505 = vrot.lane.b32.xlu1 %v1938_v34, %s2023_s9 }
 0x1f4   : > { %532 = vperm.xlu1 %1928, %v529_v35  }
 0x259   : > { %v546_v40 = vpop.permute.xlu0 %545 }
 0x25a   : > { %v548_v42 = vmul.f32 %v546_v40, %v515_v39 }
 0x262   : > { %v506_v36 = vpop.permute.xlu1 %505 }
 0x263   : > { %v508_v37 = vmul.f32 %v1936_v26, %v506_v36  ;;  %v1772_v36 = vld [vmem:[%s1626_s8 + $0x2] sm:$0x1] }
 0x265   : > { %v524_v38 = vrot.slane %v508_v37, %v2129_v18  ;;  %v700_v37 = vunpack.c.l.bf16 %v1772_v36 }
 0x267   : > { %525 = vrot.lane.b32.xlu1 %v524_v38, %s2024_s13 }
 0x273   : > { %v533_v41 = vpop.permute.xlu1 %532 }
 0x274   : > { %v549_v43 = vmul.f32 %v533_v41, %v412_v19  ;;  %v535_v48 = vmul.f32 %v533_v41, %v2099_v3 }
 0x276   : > { %v550_v44 = vadd.f32 %v549_v43, %v548_v42 }
 0x278   : > { %553 = vst.msk [vmem:[#allocation3] sm:$0x3] %vm403_vm0, %v550_v44 }
 0x27f   : > { %v2145_v45 = vld [vmem:[#allocation3] sm:$0x3] }
 0x280   : > { %v625_v46 = vrot.slane %v2145_v45, %v2129_v18 }
 0x282   : > { %626 = vrot.lane.b32.xlu0 %v625_v46, %s2024_s13 }
 0x2d9   : > { %v526_v47 = vpop.permute.xlu1 %525 }
 0x2da   : > { %v528_v49 = vmul.f32 %v526_v47, %v515_v39 }
 0x2dc   : > { %v536_v50 = vadd.f32 %v535_v48, %v528_v49 }
 0x2de   : > { %552 = vst.msk [vmem:[#allocation2] sm:$0x3] %vm403_vm0, %v536_v50  ;;  %v554_v51 = vmul.f32 %v536_v50, %v515_v39  ;;  %v1776_v50 = vld [vmem:[%s1630_s15 + $0x4] sm:$0x3]  ;;  %s1646_s15 = smul.u32 4294967293, %s2009_s18 }
 0x2e0   : > { %v555_v52 = vpack.c.bf16 %v554_v51, %v554_v51 }
 0x2e2   : > { %558 = vst.msk [vmem:[%s556_s23] sm:$0x1] %vm557_vm3, %v555_v52  ;;  %s1635_s23 = scalar_lea.vmem %s2124_s6, %s2009_s18 }
 0x2e5   : > { %v561_v53 = vld [vmem:[#allocation2] sm:$0x3] }
 0x2e6   : > { %v566_v54 = vpack.c.bf16 %v561_v53, %v561_v53 }
 0x2e8   : > { %1845 = vmatmul.mubr.msk.bf16.vlgmr.msra.gmra.mrb[0].mxu1 %vm429_vm2, %v566_v54 }
 0x2e9   : > { %1857 = vmatpush3.bf16.msra.mxu1 %v2094_v1  ;;  %1860 = vmatprep.mubr.msk.bf16.mxu1 %vm2020_vm1, %v2019_v0 }
 0x2ea   : > { %1858 = vmatprep.subr.bf16.mxu1 %v2019_v0 }
 0x2ed   : > { %1859 = vmatpush3.bf16.msra.mxu1 %v2097_v2 }
 0x2ee   : > { %1872 = vmatprep.subr.bf16.mxu1 %v2019_v0 }
 0x2f4   : > { %v627_v9 = vpop.permute.xlu0 %626 }
 0x3bb   : > { %v604_v57 = vpop.f32.mrb[0].mxu1 }
 0x3bc   : > { %v610_v58 = vadd.f32 %v604_v57, %v565_v56  ;;  %v1846_v59 = vpop.f32.mrb[1].mxu1  ;;  %v801_v56 = vsub.f32 1.0, %v1776_v50 }
 0x3bd   : > { %v607_v60 = vpop.f32.mrb[2].mxu1 }
 0x3be   : > { %1939 = vtanh.f32 %v610_v58  ;;  %v1847_v61 = vpop.f32.mrb[3].mxu1  ;;  %v1768_v63 = vmul.f32 -1.442695, %v610_v58 }
 0x3c0   : > { %1941 = vpow2.f32 %v1768_v63 }
 0x3c8   : > { %v1940_v62 = vpop.eup %1939 }
 0x3c9   : > { %631 = vrot.lane.b32.xlu1 %v1940_v62, %s2023_s9 }
 0x3ca   : > { %v1942_v3 = vpop.eup %1941 }
 0x3cb   : > { %v614_v4 = vadd.f32 1.0, %v1942_v3 }
 0x3cd   : > { %1943 = vrcp.f32 %v614_v4 }
 0x3d7   : > { %v1944_v5 = vpop.eup %1943 }
 0x3d8   : > { %v629_v10 = vmul.f32 %v1944_v5, %v627_v9 }
 0x43b   : > { %v632_v6 = vpop.permute.xlu1 %631 }
 0x43c   : > { %v634_v7 = vmul.f32 %v1944_v5, %v632_v6 }
 0x43e   : > { %636 = vrot.lane.b32.xlu1 %v634_v7, %s2024_s13 }
 0x442   : > { %651 = vperm.xlu1 %1928, %v1770_v8  }
 0x4b0   : > { %v637_v11 = vpop.permute.xlu1 %636 }
 0x4b1   : > { %v639_v12 = vadd.f32 %v637_v11, %v629_v10 }
 0x4b3   : > { %1945 = vtanh.f32 %v639_v12  ;;  %v681_v15 = vrot.slane %v639_v12, %v2129_v18 }
 0x4bd   : > { %v1946_v13 = vpop.eup %1945 }
 0x4be   : > { %642 = vrot.lane.b32.xlu0 %v1946_v13, %s2023_s9 }
 0x4c1   : > { %v652_v21 = vpop.permute.xlu1 %651 }
 0x4c2   : > { %669 = vperm.xlu0 %1927, %v666_v14  }
 0x4c6   : > { %682 = vrot.lane.b32.xlu0 %v681_v15, %s2025_s14 }
 0x530   : > { %v643_v16 = vpop.permute.xlu0 %642 }
 0x531   : > { %v645_v17 = vmul.f32 %v1944_v5, %v643_v16  ;;  %v1778_v16 = vld [vmem:[%s1635_s23 + $0x3] sm:$0x1]  ;;  %s1790_s23 = smul.u32 4294967290, %s2009_s18 }
 0x533   : > { %v661_v19 = vrot.slane %v645_v17, %v2129_v18  ;;  %v834_v17 = vunpack.c.l.bf16 %v1778_v16  ;;  %s1651_s26 = scalar_lea.vmem %s2379_s2, %s1790_s23 }
 0x535   : > { %662 = vrot.lane.b32.xlu1 %v661_v19, %s2024_s13 }
 0x541   : > { %v670_v20 = vpop.permute.xlu0 %669 }
 0x542   : > { %v686_v23 = vmul.f32 %v670_v20, %v2145_v45  ;;  %v672_v29 = vmul.f32 %v670_v20, %v561_v53 }
 0x545   : > { %v683_v22 = vpop.permute.xlu0 %682 }
 0x546   : > { %v685_v24 = vmul.f32 %v683_v22, %v652_v21 }
 0x548   : > { %v687_v25 = vadd.f32 %v686_v23, %v685_v24 }
 0x54a   : > { %689 = vst.msk [vmem:[#allocation3] sm:$0x3] %vm403_vm0, %v687_v25 }
 0x551   : > { %v2187_v26 = vld [vmem:[#allocation3] sm:$0x3] }
 0x552   : > { %v760_v27 = vrot.slane %v2187_v26, %v2129_v18 }
 0x554   : > { %761 = vrot.lane.b32.xlu0 %v760_v27, %s2024_s13 }
 0x5a7   : > { %v663_v28 = vpop.permute.xlu1 %662 }
 0x5a8   : > { %v665_v30 = vmul.f32 %v663_v28, %v652_v21 }
 0x5aa   : > { %v673_v31 = vadd.f32 %v672_v29, %v665_v30 }
 0x5ac   : > { %688 = vst.msk [vmem:[#allocation2] sm:$0x3] %vm403_vm0, %v673_v31  ;;  %v690_v32 = vmul.f32 %v673_v31, %v652_v21  ;;  %v1782_v31 = vld [vmem:[%s1638_s27 + $0x6] sm:$0x3]  ;;  %s1654_s27 = scalar_lea.vmem %s2156_s17, %s1646_s15 }
 0x5ae   : > { %v691_v33 = vpack.c.bf16 %v690_v32, %v690_v32 }
 0x5b0   : > { %1771 = vst.msk [vmem:[%s1623_s30 + $0x1] sm:$0x1] %vm557_vm3, %v691_v33  ;;  %s966_s30 = scalar_lea.vmem %s2124_s6, %s2262_s29 }
 0x5b3   : > { %v696_v34 = vld [vmem:[#allocation2] sm:$0x3] }
 0x5b4   : > { %v701_v35 = vpack.c.bf16 %v696_v34, %v696_v34 }
 0x5b6   : > { %1853 = vmatmul.mubr.msk.bf16.vlgmr.msra.gmra.mrb[4].mxu0 %vm429_vm2, %v701_v35 }
 0x5b7   : > { %1865 = vmatpush3.bf16.msra.mxu0 %v2094_v1  ;;  %1868 = vmatprep.mubr.msk.bf16.mxu0 %vm2020_vm1, %v2019_v0 }
 0x5b8   : > { %1866 = vmatprep.subr.bf16.mxu0 %v2019_v0 }
 0x5bb   : > { %1867 = vmatpush3.bf16.msra.mxu0 %v2097_v2 }
 0x5bc   : > { %1880 = vmatprep.subr.bf16.mxu0 %v2019_v0 }
 0x5c6   : > { %v762_v51 = vpop.permute.xlu0 %761 }
 0x689   : > { %v739_v38 = vpop.f32.mrb[4].mxu0 }
 0x68a   : > { %v745_v39 = vadd.f32 %v739_v38, %v700_v37  ;;  %v1854_v40 = vpop.f32.mrb[5].mxu0  ;;  %v935_v37 = vsub.f32 1.0, %v1782_v31 }
 0x68b   : > { %v742_v41 = vpop.f32.mrb[6].mxu0 }
 0x68c   : > { %1947 = vtanh.f32 %v745_v39  ;;  %v1855_v42 = vpop.f32.mrb[7].mxu0  ;;  %v1774_v44 = vmul.f32 -1.442695, %v745_v39 }
 0x68e   : > { %1949 = vpow2.f32 %v1774_v44 }
 0x696   : > { %v1948_v43 = vpop.eup %1947 }
 0x697   : > { %766 = vrot.lane.b32.xlu1 %v1948_v43, %s2023_s9 }
 0x698   : > { %v1950_v45 = vpop.eup %1949 }
 0x699   : > { %v749_v46 = vadd.f32 1.0, %v1950_v45 }
 0x69b   : > { %1951 = vrcp.f32 %v749_v46 }
 0x6a5   : > { %v1952_v47 = vpop.eup %1951 }
 0x6a6   : > { %v764_v52 = vmul.f32 %v1952_v47, %v762_v51 }
 0x709   : > { %v767_v48 = vpop.permute.xlu1 %766 }
 0x70a   : > { %v769_v49 = vmul.f32 %v1952_v47, %v767_v48 }
 0x70c   : > { %771 = vrot.lane.b32.xlu1 %v769_v49, %s2024_s13 }
 0x710   : > { %786 = vperm.xlu1 %1928, %v1776_v50  }
 0x77e   : > { %v772_v53 = vpop.permute.xlu1 %771 }
 0x77f   : > { %v774_v54 = vadd.f32 %v772_v53, %v764_v52 }
 0x781   : > { %1953 = vtanh.f32 %v774_v54  ;;  %v816_v57 = vrot.slane %v774_v54, %v2129_v18 }
 0x78b   : > { %v1954_v55 = vpop.eup %1953 }
 0x78c   : > { %777 = vrot.lane.b32.xlu0 %v1954_v55, %s2023_s9 }
 0x78f   : > { %v787_v62 = vpop.permute.xlu1 %786 }
 0x790   : > { %804 = vperm.xlu0 %1927, %v801_v56  }
 0x794   : > { %817 = vrot.lane.b32.xlu0 %v816_v57, %s2025_s14 }
 0x7fe   : > { %v778_v58 = vpop.permute.xlu0 %777 }
 0x7ff   : > { %v780_v59 = vmul.f32 %v1952_v47, %v778_v58  ;;  %v967_v58 = vld [vmem:[%s966_s30] sm:$0x1]  ;;  %s1796_s30 = smul.u32 4294967286, %s2009_s18 }
 0x801   : > { %v796_v60 = vrot.slane %v780_v59, %v2129_v18  ;;  %v968_v59 = vunpack.c.l.bf16 %v967_v58  ;;  %s1661_s10 = scalar_lea.vmem %s2379_s2, %s1796_s30 }
 0x803   : > { %797 = vrot.lane.b32.xlu1 %v796_v60, %s2024_s13 }
 0x80f   : > { %v805_v61 = vpop.permute.xlu0 %804 }
 0x810   : > { %v821_v3 = vmul.f32 %v805_v61, %v2187_v26  ;;  %v807_v9 = vmul.f32 %v805_v61, %v696_v34 }
 0x813   : > { %v818_v63 = vpop.permute.xlu0 %817 }
 0x814   : > { %v820_v4 = vmul.f32 %v818_v63, %v787_v62 }
 0x816   : > { %v822_v5 = vadd.f32 %v821_v3, %v820_v4 }
 0x818   : > { %824 = vst.msk [vmem:[#allocation3] sm:$0x3] %vm403_vm0, %v822_v5 }
 0x81f   : > { %v831_v6 = vld [vmem:[#allocation3] sm:$0x3] }
 0x820   : > { %v894_v7 = vrot.slane %v831_v6, %v2129_v18 }
 0x822   : > { %895 = vrot.lane.b32.xlu0 %v894_v7, %s2024_s13 }
 0x875   : > { %v798_v8 = vpop.permute.xlu1 %797 }
 0x876   : > { %v800_v10 = vmul.f32 %v798_v8, %v787_v62 }
 0x878   : > { %v808_v11 = vadd.f32 %v807_v9, %v800_v10 }
 0x87a   : > { %823 = vst.msk [vmem:[#allocation2] sm:$0x3] %vm403_vm0, %v808_v11  ;;  %v825_v12 = vmul.f32 %v808_v11, %v787_v62  ;;  %v1051_v11 = vld [vmem:[%s1050_s11] sm:$0x3] }
 0x87c   : > { %v826_v13 = vpack.c.bf16 %v825_v12, %v825_v12 }
 0x87e   : > { %1777 = vst.msk [vmem:[%s1633_s16 + $0x2] sm:$0x1] %vm557_vm3, %v826_v13  ;;  %s1647_s16 = scalar_lea.vmem %s2124_s6, %s1646_s15 }
 0x881   : > { %v830_v14 = vld [vmem:[#allocation2] sm:$0x3] }
 0x882   : > { %v835_v15 = vpack.c.bf16 %v830_v14, %v830_v14 }
 0x884   : > { %1861 = vmatmul.mubr.msk.bf16.vlgmr.msra.gmra.mrb[4].mxu1 %vm429_vm2, %v835_v15 }
 0x885   : > { %1873 = vmatpush3.bf16.msra.mxu1 %v2094_v1  ;;  %1876 = vmatprep.mubr.msk.bf16.mxu1 %vm2020_vm1, %v2019_v0 }
 0x886   : > { %1874 = vmatprep.subr.bf16.mxu1 %v2019_v0 }
 0x889   : > { %1875 = vmatpush3.bf16.msra.mxu1 %v2097_v2 }
 0x88a   : > { %1888 = vmatprep.subr.bf16.mxu1 %v2019_v0 }
 0x894   : > { %v896_v32 = vpop.permute.xlu0 %895 }
 0x957   : > { %v873_v19 = vpop.f32.mrb[4].mxu1 }
 0x958   : > { %v879_v20 = vadd.f32 %v873_v19, %v834_v17  ;;  %v1862_v21 = vpop.f32.mrb[5].mxu1  ;;  %v1069_v17 = vsub.f32 1.0, %v1051_v11 }
 0x959   : > { %v876_v22 = vpop.f32.mrb[6].mxu1 }
 0x95a   : > { %1955 = vtanh.f32 %v879_v20  ;;  %v1863_v23 = vpop.f32.mrb[7].mxu1  ;;  %v1780_v25 = vmul.f32 -1.442695, %v879_v20 }
 0x95c   : > { %1957 = vpow2.f32 %v1780_v25 }
 0x964   : > { %v1956_v24 = vpop.eup %1955 }
 0x965   : > { %900 = vrot.lane.b32.xlu1 %v1956_v24, %s2023_s9 }
 0x966   : > { %v1958_v26 = vpop.eup %1957 }
 0x967   : > { %v883_v27 = vadd.f32 1.0, %v1958_v26 }
 0x969   : > { %1959 = vrcp.f32 %v883_v27 }
 0x973   : > { %v1960_v28 = vpop.eup %1959 }
 0x974   : > { %v898_v33 = vmul.f32 %v1960_v28, %v896_v32 }
 0x9d7   : > { %v901_v29 = vpop.permute.xlu1 %900 }
 0x9d8   : > { %v903_v30 = vmul.f32 %v1960_v28, %v901_v29 }
 0x9da   : > { %905 = vrot.lane.b32.xlu1 %v903_v30, %s2024_s13 }
 0x9de   : > { %920 = vperm.xlu1 %1928, %v1782_v31  }
 0xa4c   : > { %v906_v34 = vpop.permute.xlu1 %905 }
 0xa4d   : > { %v908_v35 = vadd.f32 %v906_v34, %v898_v33 }
 0xa4f   : > { %1961 = vtanh.f32 %v908_v35  ;;  %v950_v38 = vrot.slane %v908_v35, %v2129_v18 }
 0xa59   : > { %v1962_v36 = vpop.eup %1961 }
 0xa5a   : > { %911 = vrot.lane.b32.xlu0 %v1962_v36, %s2023_s9 }
 0xa5d   : > { %v921_v43 = vpop.permute.xlu1 %920 }
 0xa5e   : > { %938 = vperm.xlu0 %1927, %v935_v37  }
 0xa62   : > { %951 = vrot.lane.b32.xlu0 %v950_v38, %s2025_s14 }
 0xacc   : > { %v912_v39 = vpop.permute.xlu0 %911 }
 0xacd   : > { %v914_v40 = vmul.f32 %v1960_v28, %v912_v39  ;;  %v1787_v39 = vld [vmem:[%s1647_s16 + $0x5] sm:$0x1]  ;;  %s1802_s16 = smul.u32 4294967282, %s2009_s18 }
 0xacf   : > { %v930_v41 = vrot.slane %v914_v40, %v2129_v18  ;;  %v1103_v40 = vunpack.c.l.bf16 %v1787_v39  ;;  %s1671_s24 = scalar_lea.vmem %s2379_s2, %s1802_s16 }
 0xad1   : > { %931 = vrot.lane.b32.xlu1 %v930_v41, %s2024_s13 }
 0xadd   : > { %v939_v42 = vpop.permute.xlu0 %938 }
 0xade   : > { %v955_v45 = vmul.f32 %v939_v42, %v831_v6  ;;  %v941_v51 = vmul.f32 %v939_v42, %v830_v14 }
 0xae1   : > { %v952_v44 = vpop.permute.xlu0 %951 }
 0xae2   : > { %v954_v46 = vmul.f32 %v952_v44, %v921_v43 }
 0xae4   : > { %v956_v47 = vadd.f32 %v955_v45, %v954_v46 }
 0xae6   : > { %958 = vst.msk [vmem:[#allocation3] sm:$0x3] %vm403_vm0, %v956_v47 }
 0xaed   : > { %v965_v48 = vld [vmem:[#allocation3] sm:$0x3] }
 0xaee   : > { %v1028_v49 = vrot.slane %v965_v48, %v2129_v18 }
 0xaf0   : > { %1029 = vrot.lane.b32.xlu0 %v1028_v49, %s2024_s13 }
 0xb43   : > { %v932_v50 = vpop.permute.xlu1 %931 }
 0xb44   : > { %v934_v52 = vmul.f32 %v932_v50, %v921_v43  ;;  %v1791_v50 = vld [vmem:[%s1651_s26 + $0xa] sm:$0x3] }
 0xb46   : > { %v942_v53 = vadd.f32 %v941_v51, %v934_v52 }
 0xb48   : > { %957 = vst.msk [vmem:[#allocation2] sm:$0x3] %vm403_vm0, %v942_v53  ;;  %v959_v54 = vmul.f32 %v942_v53, %v921_v43 }
 0xb4a   : > { %v960_v55 = vpack.c.bf16 %v959_v54, %v959_v54 }
 0xb4c   : > { %1783 = vst.msk [vmem:[%s1640_s28 + $0x3] sm:$0x1] %vm557_vm3, %v960_v55  ;;  %s1656_s28 = smul.u32 4294967291, %s2009_s18 }
 0xb4e   : > { %s1657_s29 = scalar_lea.vmem %s2124_s6, %s1656_s28  ;;  %s1664_s11 = scalar_lea.vmem %s2156_s17, %s1656_s28 }
 0xb4f   : > { %v964_v56 = vld [vmem:[#allocation2] sm:$0x3] }
 0xb50   : > { %v969_v57 = vpack.c.bf16 %v964_v56, %v964_v56 }
 0xb52   : > { %1869 = vmatmul.mubr.msk.bf16.vlgmr.msra.gmra.mrb[8].mxu0 %vm429_vm2, %v969_v57 }
 0xb53   : > { %1881 = vmatpush3.bf16.msra.mxu0 %v2094_v1  ;;  %1884 = vmatprep.mubr.msk.bf16.mxu0 %vm2020_vm1, %v2019_v0 }
 0xb54   : > { %1882 = vmatprep.subr.bf16.mxu0 %v2019_v0 }
 0xb57   : > { %1883 = vmatpush3.bf16.msra.mxu0 %v2097_v2 }
 0xb62   : > { %v1030_v12 = vpop.permute.xlu0 %1029 }
 0xc25   : > { %v1007_v60 = vpop.f32.mrb[8].mxu0 }
 0xc26   : > { %v1013_v61 = vadd.f32 %v1007_v60, %v968_v59  ;;  %v1870_v62 = vpop.f32.mrb[9].mxu0 }
 0xc27   : > { %v1010_v63 = vpop.f32.mrb[10].mxu0 }
 0xc28   : > { %1963 = vtanh.f32 %v1013_v61  ;;  %v1871_v3 = vpop.f32.mrb[11].mxu0  ;;  %v1785_v5 = vmul.f32 -1.442695, %v1013_v61 }
 0xc2a   : > { %1965 = vpow2.f32 %v1785_v5 }
 0xc32   : > { %v1964_v4 = vpop.eup %1963 }
 0xc33   : > { %1034 = vrot.lane.b32.xlu1 %v1964_v4, %s2023_s9 }
 0xc34   : > { %v1966_v6 = vpop.eup %1965 }
 0xc35   : > { %v1017_v7 = vadd.f32 1.0, %v1966_v6 }
 0xc37   : > { %1967 = vrcp.f32 %v1017_v7 }
 0xc41   : > { %v1968_v8 = vpop.eup %1967 }
 0xc42   : > { %v1032_v13 = vmul.f32 %v1968_v8, %v1030_v12 }
 0xca5   : > { %v1035_v9 = vpop.permute.xlu1 %1034 }
 0xca6   : > { %v1037_v10 = vmul.f32 %v1968_v8, %v1035_v9 }
 0xca8   : > { %1039 = vrot.lane.b32.xlu1 %v1037_v10, %s2024_s13 }
 0xcac   : > { %1054 = vperm.xlu1 %1928, %v1051_v11  }
 0xd1a   : > { %v1040_v14 = vpop.permute.xlu1 %1039 }
 0xd1b   : > { %v1042_v15 = vadd.f32 %v1040_v14, %v1032_v13 }
 0xd1d   : > { %1969 = vtanh.f32 %v1042_v15  ;;  %v1084_v19 = vrot.slane %v1042_v15, %v2129_v18 }
 0xd27   : > { %v1970_v16 = vpop.eup %1969 }
 0xd28   : > { %1045 = vrot.lane.b32.xlu0 %v1970_v16, %s2023_s9  ;;  %v1793_v16 = vld [vmem:[%s1657_s29 + $0x6] sm:$0x1] }
 0xd2b   : > { %v1055_v24 = vpop.permute.xlu1 %1054 }
 0xd2c   : > { %1072 = vperm.xlu0 %1927, %v1069_v17   ;;  %v1238_v17 = vunpack.c.l.bf16 %v1793_v16 }
 0xd30   : > { %1085 = vrot.lane.b32.xlu0 %v1084_v19, %s2025_s14 }
 0xd9a   : > { %v1046_v20 = vpop.permute.xlu0 %1045 }
 0xd9b   : > { %v1048_v21 = vmul.f32 %v1968_v8, %v1046_v20 }
 0xd9d   : > { %v1064_v22 = vrot.slane %v1048_v21, %v2129_v18 }
 0xd9f   : > { %1065 = vrot.lane.b32.xlu1 %v1064_v22, %s2024_s13 }
 0xdab   : > { %v1073_v23 = vpop.permute.xlu0 %1072 }
 0xdac   : > { %v1089_v26 = vmul.f32 %v1073_v23, %v965_v48  ;;  %v1075_v32 = vmul.f32 %v1073_v23, %v964_v56  ;;  %v1204_v56 = vsub.f32 1.0, %v1791_v50 }
 0xdaf   : > { %v1086_v25 = vpop.permute.xlu0 %1085 }
 0xdb0   : > { %v1088_v27 = vmul.f32 %v1086_v25, %v1055_v24 }
 0xdb2   : > { %v1090_v28 = vadd.f32 %v1089_v26, %v1088_v27 }
 0xdb4   : > { %1092 = vst.msk [vmem:[#allocation3] sm:$0x3] %vm403_vm0, %v1090_v28 }
 0xdbb   : > { %v1100_v29 = vld [vmem:[#allocation3] sm:$0x3] }
 0xdbc   : > { %v1163_v30 = vrot.slane %v1100_v29, %v2129_v18 }
 0xdbe   : > { %1164 = vrot.lane.b32.xlu0 %v1163_v30, %s2024_s13 }
 0xe11   : > { %v1066_v31 = vpop.permute.xlu1 %1065 }
 0xe12   : > { %v1068_v33 = vmul.f32 %v1066_v31, %v1055_v24  ;;  %v1797_v31 = vld [vmem:[%s1661_s10 + $0xc] sm:$0x3] }
 0xe14   : > { %v1076_v34 = vadd.f32 %v1075_v32, %v1068_v33 }
 0xe16   : > { %1091 = vst.msk [vmem:[#allocation2] sm:$0x3] %vm403_vm0, %v1076_v34  ;;  %v1093_v35 = vmul.f32 %v1076_v34, %v1055_v24 }
 0xe18   : > { %v1094_v36 = vpack.c.bf16 %v1093_v35, %v1093_v35 }
 0xe1a   : > { %1096 = vst.msk [vmem:[%s1095_s12] sm:$0x1] %vm557_vm3, %v1094_v36  ;;  %s1666_s12 = smul.u32 4294967289, %s2009_s18 }
 0xe1c   : > { %s1667_s15 = scalar_lea.vmem %s2124_s6, %s1666_s12 }
 0xe1d   : > { %v1099_v37 = vld [vmem:[#allocation2] sm:$0x3] }
 0xe1e   : > { %v1104_v38 = vpack.c.bf16 %v1099_v37, %v1099_v37 }
 0xe20   : > { %1877 = vmatmul.mubr.msk.bf16.vlgmr.msra.gmra.mrb[8].mxu1 %vm429_vm2, %v1104_v38 }
 0xe21   : > { %1889 = vmatpush3.bf16.msra.mxu1 %v2094_v1  ;;  %1892 = vmatprep.mubr.msk.bf16.mxu1 %vm2020_vm1, %v2019_v0 }
 0xe22   : > { %1890 = vmatprep.subr.bf16.mxu1 %v2019_v0 }
 0xe25   : > { %1891 = vmatpush3.bf16.msra.mxu1 %v2097_v2 }
 0xe30   : > { %v1165_v51 = vpop.permute.xlu0 %1164 }
 0xef3   : > { %v1142_v41 = vpop.f32.mrb[8].mxu1 }
 0xef4   : > { %v1148_v42 = vadd.f32 %v1142_v41, %v1103_v40  ;;  %v1878_v43 = vpop.f32.mrb[9].mxu1 }
 0xef5   : > { %v1145_v44 = vpop.f32.mrb[10].mxu1 }
 0xef6   : > { %1971 = vtanh.f32 %v1148_v42  ;;  %v1879_v45 = vpop.f32.mrb[11].mxu1  ;;  %v1789_v46 = vmul.f32 -1.442695, %v1148_v42 }
 0xef8   : > { %1973 = vpow2.f32 %v1789_v46 }
 0xf00   : > { %v1972_v1 = vpop.eup %1971 }
 0xf01   : > { %1169 = vrot.lane.b32.xlu1 %v1972_v1, %s2023_s9 }
 0xf02   : > { %v1974_v0 = vpop.eup %1973 }
 0xf03   : > { %v1152_v47 = vadd.f32 1.0, %v1974_v0 }
 0xf05   : > { %1975 = vrcp.f32 %v1152_v47 }
 0xf0f   : > { %v1976_v2 = vpop.eup %1975 }
 0xf10   : > { %v1167_v52 = vmul.f32 %v1976_v2, %v1165_v51 }
 0xf73   : > { %v1170_v48 = vpop.permute.xlu1 %1169 }
 0xf74   : > { %v1172_v49 = vmul.f32 %v1976_v2, %v1170_v48 }
 0xf76   : > { %1174 = vrot.lane.b32.xlu1 %v1172_v49, %s2024_s13 }
 0xf7a   : > { %1189 = vperm.xlu1 %1928, %v1791_v50  }
 0xfe8   : > { %v1175_v53 = vpop.permute.xlu1 %1174 }
 0xfe9   : > { %v1177_v54 = vadd.f32 %v1175_v53, %v1167_v52 }
 0xfeb   : > { %1977 = vtanh.f32 %v1177_v54  ;;  %v1219_v57 = vrot.slane %v1177_v54, %v2129_v18 }
 0xff5   : > { %v1978_v55 = vpop.eup %1977 }
 0xff6   : > { %1180 = vrot.lane.b32.xlu0 %v1978_v55, %s2023_s9  ;;  %v1799_v55 = vld [vmem:[%s1667_s15 + $0x7] sm:$0x1] }
 0xff9   : > { %v1190_v62 = vpop.permute.xlu1 %1189 }
 0xffa   : > { %1207 = vperm.xlu0 %1927, %v1204_v56   ;;  %v1373_v56 = vunpack.c.l.bf16 %v1799_v55 }
 0xffe   : > { %1220 = vrot.lane.b32.xlu0 %v1219_v57, %s2025_s14 }
0x1068   : > { %v1181_v58 = vpop.permute.xlu0 %1180 }
0x1069   : > { %v1183_v59 = vmul.f32 %v1976_v2, %v1181_v58 }
0x106b   : > { %v1199_v60 = vrot.slane %v1183_v59, %v2129_v18 }
0x106d   : > { %1200 = vrot.lane.b32.xlu1 %v1199_v60, %s2024_s13 }
0x1079   : > { %v1208_v61 = vpop.permute.xlu0 %1207 }
0x107a   : > { %v1224_v3 = vmul.f32 %v1208_v61, %v1100_v29  ;;  %v1210_v9 = vmul.f32 %v1208_v61, %v1099_v37  ;;  %v1339_v37 = vsub.f32 1.0, %v1797_v31 }
0x107d   : > { %v1221_v63 = vpop.permute.xlu0 %1220 }
0x107e   : > { %v1223_v4 = vmul.f32 %v1221_v63, %v1190_v62 }
0x1080   : > { %v1225_v5 = vadd.f32 %v1224_v3, %v1223_v4 }
0x1082   : > { %1227 = vst.msk [vmem:[#allocation3] sm:$0x3] %vm403_vm0, %v1225_v5 }
0x1089   : > { %v1235_v6 = vld [vmem:[#allocation3] sm:$0x3] }
0x108a   : > { %v1298_v7 = vrot.slane %v1235_v6, %v2129_v18 }
0x108c   : > { %1299 = vrot.lane.b32.xlu0 %v1298_v7, %s2024_s13 }
0x10df   : > { %v1201_v8 = vpop.permute.xlu1 %1200 }
0x10e0   : > { %v1203_v10 = vmul.f32 %v1201_v8, %v1190_v62  ;;  %v1803_v8 = vld [vmem:[%s1671_s24 + $0xe] sm:$0x3] }
0x10e2   : > { %v1211_v11 = vadd.f32 %v1210_v9, %v1203_v10 }
0x10e4   : > { %1226 = vst.msk [vmem:[#allocation2] sm:$0x3] %vm403_vm0, %v1211_v11  ;;  %v1228_v12 = vmul.f32 %v1211_v11, %v1190_v62 }
0x10e6   : > { %v1229_v13 = vpack.c.bf16 %v1228_v12, %v1228_v12 }
0x10e8   : > { %1792 = vst.msk [vmem:[%s1654_s27 + $0x5] sm:$0x1] %vm557_vm3, %v1229_v13 }
0x10eb   : > { %v1234_v14 = vld [vmem:[#allocation2] sm:$0x3] }
0x10ec   : > { %v1239_v15 = vpack.c.bf16 %v1234_v14, %v1234_v14 }
0x10ee   : > { %1885 = vmatmul.mubr.msk.bf16.vlgmr.msra.gmra.mrb[12].mxu0 %vm429_vm2, %v1239_v15 }
0x10fe   : > { %v1300_v32 = vpop.permute.xlu0 %1299 }
0x11c1   : > { %v1277_v19 = vpop.f32.mrb[12].mxu0 }
0x11c2   : > { %v1283_v20 = vadd.f32 %v1277_v19, %v1238_v17  ;;  %v1886_v21 = vpop.f32.mrb[13].mxu0 }
0x11c3   : > { %v1280_v22 = vpop.f32.mrb[14].mxu0 }
0x11c4   : > { %1979 = vtanh.f32 %v1283_v20  ;;  %v1887_v23 = vpop.f32.mrb[15].mxu0  ;;  %v1795_v25 = vmul.f32 -1.442695, %v1283_v20 }
0x11c6   : > { %1981 = vpow2.f32 %v1795_v25 }
0x11ce   : > { %v1980_v24 = vpop.eup %1979 }
0x11cf   : > { %1304 = vrot.lane.b32.xlu1 %v1980_v24, %s2023_s9 }
0x11d0   : > { %v1982_v26 = vpop.eup %1981 }
0x11d1   : > { %v1287_v27 = vadd.f32 1.0, %v1982_v26 }
0x11d3   : > { %1983 = vrcp.f32 %v1287_v27 }
0x11dd   : > { %v1984_v28 = vpop.eup %1983 }
0x11de   : > { %v1302_v33 = vmul.f32 %v1984_v28, %v1300_v32 }
0x1241   : > { %v1305_v29 = vpop.permute.xlu1 %1304 }
0x1242   : > { %v1307_v30 = vmul.f32 %v1984_v28, %v1305_v29 }
0x1244   : > { %1309 = vrot.lane.b32.xlu1 %v1307_v30, %s2024_s13 }
0x1248   : > { %1324 = vperm.xlu1 %1928, %v1797_v31  }
0x12b6   : > { %v1310_v34 = vpop.permute.xlu1 %1309 }
0x12b7   : > { %v1312_v35 = vadd.f32 %v1310_v34, %v1302_v33 }
0x12b9   : > { %1985 = vtanh.f32 %v1312_v35  ;;  %v1354_v38 = vrot.slane %v1312_v35, %v2129_v18 }
0x12c3   : > { %v1986_v36 = vpop.eup %1985 }
0x12c4   : > { %1315 = vrot.lane.b32.xlu0 %v1986_v36, %s2023_s9 }
0x12c7   : > { %v1325_v43 = vpop.permute.xlu1 %1324 }
0x12c8   : > { %1342 = vperm.xlu0 %1927, %v1339_v37  }
0x12cc   : > { %1355 = vrot.lane.b32.xlu0 %v1354_v38, %s2025_s14 }
0x1336   : > { %v1316_v39 = vpop.permute.xlu0 %1315 }
0x1337   : > { %v1318_v40 = vmul.f32 %v1984_v28, %v1316_v39 }
0x1339   : > { %v1334_v41 = vrot.slane %v1318_v40, %v2129_v18 }
0x133b   : > { %1335 = vrot.lane.b32.xlu1 %v1334_v41, %s2024_s13 }
0x1347   : > { %v1343_v42 = vpop.permute.xlu0 %1342 }
0x1348   : > { %v1359_v45 = vmul.f32 %v1343_v42, %v1235_v6  ;;  %v1345_v48 = vmul.f32 %v1343_v42, %v1234_v14  ;;  %v1474_v14 = vsub.f32 1.0, %v1803_v8 }
0x134b   : > { %v1356_v44 = vpop.permute.xlu0 %1355 }
0x134c   : > { %v1358_v1 = vmul.f32 %v1356_v44, %v1325_v43 }
0x134e   : > { %v1360_v46 = vadd.f32 %v1359_v45, %v1358_v1 }
0x1350   : > { %1362 = vst.msk [vmem:[#allocation3] sm:$0x3] %vm403_vm0, %v1360_v46 }
0x1357   : > { %v1370_v0 = vld [vmem:[#allocation3] sm:$0x3] }
0x1358   : > { %v1433_v47 = vrot.slane %v1370_v0, %v2129_v18 }
0x135a   : > { %1434 = vrot.lane.b32.xlu0 %v1433_v47, %s2024_s13 }
0x13ad   : > { %v1336_v2 = vpop.permute.xlu1 %1335 }
0x13ae   : > { %v1338_v49 = vmul.f32 %v1336_v2, %v1325_v43 }
0x13b0   : > { %v1346_v50 = vadd.f32 %v1345_v48, %v1338_v49 }
0x13b2   : > { %v1363_v51 = vmul.f32 %v1346_v50, %v1325_v43  ;;  %1361 = vst.msk [vmem:[#allocation2] sm:$0x3] %vm403_vm0, %v1346_v50 }
0x13b4   : > { %v1364_v52 = vpack.c.bf16 %v1363_v51, %v1363_v51 }
0x13b6   : > { %1798 = vst.msk [vmem:[%s1664_s11 + $0x6] sm:$0x1] %vm557_vm3, %v1364_v52 }
0x13b9   : > { %v1369_v53 = vld [vmem:[#allocation2] sm:$0x3] }
0x13ba   : > { %v1374_v54 = vpack.c.bf16 %v1369_v53, %v1369_v53 }
0x13bc   : > { %1893 = vmatmul.mubr.msk.bf16.vlgmr.msra.gmra.mrb[12].mxu1 %vm429_vm2, %v1374_v54 }
0x13cc   : > { %v1435_v9 = vpop.permute.xlu0 %1434 }
0x148f   : > { %v1412_v57 = vpop.f32.mrb[12].mxu1 }
0x1490   : > { %v1418_v58 = vadd.f32 %v1412_v57, %v1373_v56  ;;  %v1894_v59 = vpop.f32.mrb[13].mxu1 }
0x1491   : > { %v1415_v60 = vpop.f32.mrb[14].mxu1 }
0x1492   : > { %1987 = vtanh.f32 %v1418_v58  ;;  %v1895_v61 = vpop.f32.mrb[15].mxu1  ;;  %v1801_v63 = vmul.f32 -1.442695, %v1418_v58 }
0x1494   : > { %1989 = vpow2.f32 %v1801_v63 }
0x149c   : > { %v1988_v62 = vpop.eup %1987 }
0x149d   : > { %1439 = vrot.lane.b32.xlu1 %v1988_v62, %s2023_s9 }
0x149e   : > { %v1990_v3 = vpop.eup %1989 }
0x149f   : > { %v1422_v4 = vadd.f32 1.0, %v1990_v3 }
0x14a1   : > { %1991 = vrcp.f32 %v1422_v4 }
0x14ab   : > { %v1992_v5 = vpop.eup %1991 }
0x14ac   : > { %v1437_v10 = vmul.f32 %v1992_v5, %v1435_v9 }
0x150f   : > { %v1440_v6 = vpop.permute.xlu1 %1439 }
0x1510   : > { %v1442_v7 = vmul.f32 %v1992_v5, %v1440_v6 }
0x1512   : > { %1444 = vrot.lane.b32.xlu1 %v1442_v7, %s2024_s13 }
0x1516   : > { %1459 = vperm.xlu1 %1928, %v1803_v8  }
0x1584   : > { %v1445_v11 = vpop.permute.xlu1 %1444 }
0x1585   : > { %v1447_v12 = vadd.f32 %v1445_v11, %v1437_v10 }
0x1587   : > { %1993 = vtanh.f32 %v1447_v12  ;;  %v1489_v15 = vrot.slane %v1447_v12, %v2129_v18 }
0x1591   : > { %v1994_v13 = vpop.eup %1993 }
0x1592   : > { %1450 = vrot.lane.b32.xlu0 %v1994_v13, %s2023_s9  ;;  %s1759_s9 = sshll.u32 %s2085_s22, 1 }
0x1593   : > { %s393_s28 = scalar_lea.vmem %s2381_s4, %s1759_s9 }
0x1595   : > { %v1460_v21 = vpop.permute.xlu1 %1459 }
0x1596   : > { %1477 = vperm.xlu0 %1927, %v1474_v14  }
0x159a   : > { %1490 = vrot.lane.b32.xlu0 %v1489_v15, %s2025_s14  ;;  %s397_s14 = scalar_lea.vmem %s2382_s5, %s1759_s9 }
0x1604   : > { %v1451_v16 = vpop.permute.xlu0 %1450 }
0x1605   : > { %v1453_v17 = vmul.f32 %v1992_v5, %v1451_v16 }
0x1607   : > { %v1469_v19 = vrot.slane %v1453_v17, %v2129_v18 }
0x1609   : > { %1470 = vrot.lane.b32.xlu1 %v1469_v19, %s2024_s13  ;;  %s1674_s13 = scalar_lea.vmem %s2156_s17, %s1666_s12 }
0x1615   : > { %v1478_v20 = vpop.permute.xlu0 %1477 }
0x1616   : > { %v1494_v23 = vmul.f32 %v1478_v20, %v1370_v0  ;;  %v1480_v27 = vmul.f32 %v1478_v20, %v1369_v53 }
0x1619   : > { %v1491_v22 = vpop.permute.xlu0 %1490 }
0x161a   : > { %v1493_v24 = vmul.f32 %v1491_v22, %v1460_v21 }
0x161c   : > { %v1495_v25 = vadd.f32 %v1494_v23, %v1493_v24 }
0x161e   : > { %1497 = vst.msk [vmem:[#allocation3] sm:$0x3] %vm403_vm0, %v1495_v25 }
0x1625   : > { %v1504_v26 = vld [vmem:[#allocation3] sm:$0x3] }
0x1626   : > { %1505 = vst.msk [vmem:[%s397_s14] sm:$0x3] %vm403_vm0, %v1504_v26 }
0x167b   : > { %v1471_v18 = vpop.permute.xlu1 %1470 }
0x167c   : > { %v1473_v28 = vmul.f32 %v1471_v18, %v1460_v21 }
0x167e   : > { %v1481_v29 = vadd.f32 %v1480_v27, %v1473_v28 }
0x1680   : > { %1496 = vst.msk [vmem:[#allocation2] sm:$0x3] %vm403_vm0, %v1481_v29  ;;  %v1498_v30 = vmul.f32 %v1481_v29, %v1460_v21 }
0x1682   : > { %v1499_v31 = vpack.c.bf16 %v1498_v30, %v1498_v30 }
0x1684   : > { %1804 = vst.msk [vmem:[%s1674_s13 + $0x7] sm:$0x1] %vm557_vm3, %v1499_v31 }
0x1687   : > { %v1502_v32 = vld [vmem:[#allocation2] sm:$0x3] }
0x1688   : > { %1503 = vst.msk [vmem:[%s393_s28] sm:$0x3] %vm403_vm0, %v1502_v32 }
0x1689 PF: > { %s16_s20 = sadd.s32 1, %s2017_s20   ;;  %s2383_s18 = smov %s2013_s19 }
0x168a   : > { %p13_p5 = scmp.ge.s32.totalorder %s16_s20, 4   ;;  %s2384_s19 = smov %s2386_s21 }
0x168c   :  { %15 = sbr.rel (!%p13_p5) target bundleno = 2 (0x2), region = 120 }

// kernel: pgn_forward.13
= control target key start
LH: loop header
LB: loop body
LE: loop exit
PB: predicated region body
PF: predicated region fallthrough
CT: control target
= control target key end

     0   :  { %v156_v0 = vmov 0.0   ;;  %vm157_vm0 = vmmov 0   ;;  %vm61_vm1 = vcmask 523264   ;;  %vm114_vm2 = vcmask 257024   ;;  %s202_s1 = inlined_call_operand.vmem [shape: bf16[1,64,32], index: 1, kind: input, shape index: {}]   ;;  %s203_s0 = inlined_call_operand.vmem [shape: bf16[16,64], index: 0, kind: input, shape index: {}]   ;;  %s204_s2 = inlined_call_operand.vmem [shape: f32[1,1,32], index: 2, kind: input, shape index: {}]   ;;  %s205_s3 = inlined_call_operand.vmem [shape: bf16[1,16,32], index: 3, kind: output, shape index: {}]  }
   0x1   :  { %137 = vmatprep.subr.bf16.mxu0 %v156_v0  ;;  %v151_v1 = vld [vmem:[%s202_s1] sm:$0xff]   ;;  %145 = vmatprep.mubr.msk.bf16.mxu0 %vm157_vm0, %v156_v0  ;;  %v152_v2 = vld [vmem:[%s202_s1 + $0x8] sm:$0xff]   ;;  %v153_v3 = vld [vmem:[%s202_s1 + $0x10] sm:$0xff]  }
   0x2   :  { %138 = vmatpush3.bf16.msra.mxu0 %v151_v1  ;;  %v154_v4 = vld [vmem:[%s202_s1 + $0x18] sm:$0xff]   ;;  %v155_v5 = vld [vmem:[%s203_s0] sm:$0xff]  }
   0x3   :  { %139 = vmatprep.subr.bf16.mxu0 %v156_v0  ;;  %v121_v6 = vld [vmem:[%s204_s2] ss:$0 sm:$0xff] }
   0x6   :  { %140 = vmatpush3.bf16.msra.mxu0 %v152_v2 }
   0x7   :  { %141 = vmatprep.subr.bf16.mxu0 %v156_v0 }
   0xa   :  { %142 = vmatpush3.bf16.msra.mxu0 %v153_v3 }
   0xb   :  { %143 = vmatprep.subr.bf16.mxu0 %v156_v0 }
   0xe   :  { %144 = vmatpush3.bf16.msra.mxu0 %v154_v4 }
  0x11   :  { %146 = vmatmul.mubr.msk.bf16.vlgmr.msra.gmra.mrb[0].mxu0 %vm61_vm1, %v155_v5 }
  0xe4   :  { %v99_v7 = vpop.f32.mrb[0].mxu0 }
  0xe5   :  { %v100_v8 = vadd.f32 %v121_v6, %v99_v7  ;;  %v147_v9 = vpop.f32.mrb[1].mxu0 }
  0xe6   :  { %v102_v10 = vpop.f32.mrb[2].mxu0 }
  0xe7   :  { %v130_v11 = vpack.c.bf16 %v100_v8, %v100_v8  ;;  %v103_v12 = vadd.f32 %v121_v6, %v102_v10  ;;  %v148_v13 = vpop.f32.mrb[3].mxu0 }
  0xe9   :  { %115 = vst.msk [vmem:[%s205_s3] sm:$0xf] %vm114_vm2, %v130_v11  ;;  %v131_v14 = vpack.c.bf16 %v103_v12, %v103_v12 }
  0xeb   :  { %116 = vst.msk [vmem:[%s205_s3 + $0x4] sm:$0xf] %vm114_vm2, %v131_v14 }

// kernel: squeeze.13
= control target key start
LH: loop header
LB: loop body
LE: loop exit
PB: predicated region body
PF: predicated region fallthrough
CT: control target
= control target key end

     0   :  { %vm4_vm0 = vcmask 7168   ;;  %s122_s0 = inlined_call_operand.vmem [shape: f32[1,8,129], index: 0, kind: input, shape index: {}]   ;;  %s123_s1 = inlined_call_operand.vmem [shape: f32[4,2,129], index: 1, kind: output, shape index: {}]  }
   0x1   :  { %v74_v0 = vld [vmem:[%s122_s0 + $0x8] sm:$0xff]   ;;  %v13_v1 = vld [vmem:[%s122_s0] sm:$0xff]  }
   0x2   :  { %6 = vst.msk [vmem:[#allocation0 + $0x8] sm:$0x3] %vm4_vm0, %v74_v0   ;;  %8 = vst.msk [vmem:[#allocation0 + $0x16] sm:$0xc] %vm4_vm0, %v74_v0  }
   0x3   :  { %10 = vst.msk [vmem:[#allocation0 + $0x24] sm:$0x30] %vm4_vm0, %v74_v0   ;;  %12 = vst.msk [vmem:[#allocation0 + $0x32] sm:$0xc0] %vm4_vm0, %v74_v0  }
   0x4   :  { %14 = vst [vmem:[#allocation0] sm:$0x3] %v13_v1   ;;  %16 = vst [vmem:[#allocation0 + $0xe] sm:$0xc] %v13_v1  }
   0x5   :  { %18 = vst [vmem:[#allocation0 + $0x1c] sm:$0x30] %v13_v1   ;;  %20 = vst [vmem:[#allocation0 + $0x2a] sm:$0xc0] %v13_v1  }
   0x9   :  { %v28_v3 = vld [vmem:[#allocation0 + $0x8] sm:$0x3]  ;;  %v39_v5 = vld [vmem:[#allocation0 + $0x18] sm:$0x3] }
   0xa   :  { %75 = vst [vmem:[%s123_s1 + $0x2] sm:$0x3] %v28_v3  ;;  %v51_v7 = vld [vmem:[#allocation0 + $0x28] sm:$0x3]  ;;  %77 = vst [vmem:[%s123_s1 + $0x6] sm:$0x3] %v39_v5 }
   0xb   :  { %v24_v2 = vld [vmem:[#allocation0] sm:$0x3]  ;;  %v33_v4 = vld [vmem:[#allocation0 + $0x10] sm:$0x3]  ;;  %79 = vst [vmem:[%s123_s1 + $0xa] sm:$0x3] %v51_v7 }
   0xc   :  { %26 = vst [vmem:[%s123_s1] sm:$0x3] %v24_v2  ;;  %76 = vst [vmem:[%s123_s1 + $0x4] sm:$0x3] %v33_v4  ;;  %v45_v6 = vld [vmem:[#allocation0 + $0x20] sm:$0x3] }
   0xd   :  { %78 = vst [vmem:[%s123_s1 + $0x8] sm:$0x3] %v45_v6  ;;  %v57_v8 = vld [vmem:[#allocation0 + $0x30] sm:$0x3]  ;;  %v63_v9 = vld [vmem:[#allocation0 + $0x38] sm:$0x3] }
   0xe   :  { %80 = vst [vmem:[%s123_s1 + $0xc] sm:$0x3] %v57_v8  ;;  %81 = vst [vmem:[%s123_s1 + $0xe] sm:$0x3] %v63_v9 }

// kernel: pgn_forward.12
= control target key start
LH: loop header
LB: loop body
LE: loop exit
PB: predicated region body
PF: predicated region fallthrough
CT: control target
= control target key end

     0   :  { %s910_s1 = inlined_call_operand.vmem [shape: bf16[1,768,128], index: 1, kind: input, shape index: {}]   ;;  %s911_s0 = inlined_call_operand.vmem [shape: bf16[8,768], index: 0, kind: input, shape index: {}]   ;;  %s912_s2 = inlined_call_operand.vmem [shape: f32[1,1,128], index: 2, kind: input, shape index: {}]   ;;  %s913_s3 = inlined_call_operand.vmem [shape: bf16[1,8,128], index: 3, kind: output, shape index: {}]  }
   0x1   :  { %v677_v0 = vld [vmem:[%s910_s1 + $0x40] sm:$0xff]   ;;  %v681_v4 = vld [vmem:[%s910_s1 + $0x48] sm:$0xff]   ;;  %v685_v8 = vld [vmem:[%s910_s1 + $0x50] sm:$0xff]  }
   0x2   :  { %v678_v1 = vld [vmem:[%s910_s1] sm:$0xff]   ;;  %611 = vmatprep.subr.bf16.mxu0 %v677_v0  ;;  %v682_v5 = vld [vmem:[%s910_s1 + $0x8] sm:$0xff]   ;;  %v686_v9 = vld [vmem:[%s910_s1 + $0x10] sm:$0xff]  }
   0x3   :  { %v679_v2 = vld [vmem:[%s910_s1 + $0xc0] sm:$0xff]   ;;  %612 = vmatpush3.bf16.msra.mxu0 %v678_v1  ;;  %v683_v6 = vld [vmem:[%s910_s1 + $0xc8] sm:$0xff]   ;;  %v687_v10 = vld [vmem:[%s910_s1 + $0xd0] sm:$0xff]  }
   0x4   :  { %v680_v3 = vld [vmem:[%s910_s1 + $0x80] sm:$0xff]   ;;  %633 = vmatprep.subr.bf16.mxu1 %v679_v2  ;;  %613 = vmatprep.subr.bf16.mxu0 %v681_v4  ;;  %v684_v7 = vld [vmem:[%s910_s1 + $0x88] sm:$0xff]   ;;  %v688_v11 = vld [vmem:[%s910_s1 + $0x90] sm:$0xff]  }
   0x5   :  { %634 = vmatpush3.bf16.msra.mxu1 %v680_v3  ;;  %v689_v12 = vld [vmem:[%s910_s1 + $0x58] sm:$0xff]   ;;  %v693_v16 = vld [vmem:[%s910_s1 + $0x60] sm:$0xff]   ;;  %v697_v20 = vld [vmem:[%s910_s1 + $0x68] sm:$0xff]  }
   0x6   :  { %635 = vmatprep.subr.bf16.mxu1 %v683_v6  ;;  %v690_v13 = vld [vmem:[%s910_s1 + $0x18] sm:$0xff]   ;;  %v694_v17 = vld [vmem:[%s910_s1 + $0x20] sm:$0xff]   ;;  %v698_v21 = vld [vmem:[%s910_s1 + $0x28] sm:$0xff]  }
   0x7   :  { %614 = vmatpush3.bf16.msra.mxu0 %v682_v5  ;;  %v691_v14 = vld [vmem:[%s910_s1 + $0xd8] sm:$0xff]   ;;  %v695_v18 = vld [vmem:[%s910_s1 + $0xe0] sm:$0xff]   ;;  %v699_v22 = vld [vmem:[%s910_s1 + $0xe8] sm:$0xff]  }
   0x8   :  { %615 = vmatprep.subr.bf16.mxu0 %v685_v8  ;;  %v692_v15 = vld [vmem:[%s910_s1 + $0x98] sm:$0xff]   ;;  %v696_v19 = vld [vmem:[%s910_s1 + $0xa0] sm:$0xff]   ;;  %v700_v23 = vld [vmem:[%s910_s1 + $0xa8] sm:$0xff]  }
   0x9   :  { %636 = vmatpush3.bf16.msra.mxu1 %v684_v7  ;;  %v701_v24 = vld [vmem:[%s910_s1 + $0x70] sm:$0xff]   ;;  %v705_v28 = vld [vmem:[%s910_s1 + $0x78] sm:$0xff]   ;;  %v111_v31 = vld [vmem:[%s911_s0] sm:$0xff] }
   0xa   :  { %637 = vmatprep.subr.bf16.mxu1 %v687_v10  ;;  %v702_v25 = vld [vmem:[%s910_s1 + $0x30] sm:$0xff]   ;;  %v706_v29 = vld [vmem:[%s910_s1 + $0x38] sm:$0xff]   ;;  %v557_v32 = vcombine.low %v111_v31, %v111_v31  ;;  %v558_v33 = vcombine.high %v111_v31, %v111_v31  ;;  %v711_v35 = vld [vmem:[%s910_s1 + $0x140] sm:$0xff]  }
   0xb   :  { %616 = vmatpush3.bf16.msra.mxu0 %v686_v9  ;;  %v703_v26 = vld [vmem:[%s910_s1 + $0xf0] sm:$0xff]   ;;  %v707_v30 = vld [vmem:[%s910_s1 + $0xf8] sm:$0xff]   ;;  %v112_v36 = vld [vmem:[%s911_s0 + $0x8] sm:$0xff] }
   0xc   :  { %617 = vmatprep.subr.bf16.mxu0 %v689_v12  ;;  %v704_v27 = vld [vmem:[%s910_s1 + $0xb0] sm:$0xff]   ;;  %v710_v34 = vld [vmem:[%s910_s1 + $0xb8] sm:$0xff]   ;;  %462 = vmatprep.mubr.bf16.mxu0 %v558_v33  ;;  %v559_v37 = vcombine.low %v112_v36, %v112_v36  ;;  %v560_v38 = vcombine.high %v112_v36, %v112_v36  ;;  %v714_v39 = vld [vmem:[%s910_s1 + $0x100] sm:$0xff]  }
   0xd   :  { %638 = vmatpush3.bf16.msra.mxu1 %v688_v11  ;;  %v715_v40 = vld [vmem:[%s910_s1 + $0x148] sm:$0xff]   ;;  %v717_v42 = vld [vmem:[%s910_s1 + $0x150] sm:$0xff]   ;;  %v719_v44 = vld [vmem:[%s910_s1 + $0x158] sm:$0xff]  }
   0xe   :  { %639 = vmatprep.subr.bf16.mxu1 %v691_v14  ;;  %502 = vmatprep.mubr.bf16.mxu1 %v560_v38  ;;  %v716_v41 = vld [vmem:[%s910_s1 + $0x108] sm:$0xff]   ;;  %v718_v43 = vld [vmem:[%s910_s1 + $0x110] sm:$0xff]   ;;  %v720_v45 = vld [vmem:[%s910_s1 + $0x118] sm:$0xff]  }
   0xf   :  { %618 = vmatpush3.bf16.msra.mxu0 %v690_v13  ;;  %v721_v46 = vld [vmem:[%s910_s1 + $0x160] sm:$0xff]   ;;  %v113_v48 = vld [vmem:[%s911_s0 + $0x10] sm:$0xff]  ;;  %v723_v49 = vld [vmem:[%s910_s1 + $0x168] sm:$0xff]  }
  0x10   :  { %619 = vmatprep.subr.bf16.mxu0 %v693_v16  ;;  %v722_v47 = vld [vmem:[%s910_s1 + $0x120] sm:$0xff]   ;;  %v562_v50 = vcombine.high %v113_v48, %v113_v48  ;;  %v724_v51 = vld [vmem:[%s910_s1 + $0x128] sm:$0xff]   ;;  %v725_v52 = vld [vmem:[%s910_s1 + $0x170] sm:$0xff]   ;;  %v561_v56 = vcombine.low %v113_v48, %v113_v48 }
  0x11   :  { %640 = vmatpush3.bf16.msra.mxu1 %v692_v15  ;;  %v726_v53 = vld [vmem:[%s910_s1 + $0x130] sm:$0xff]   ;;  %v727_v54 = vld [vmem:[%s910_s1 + $0x178] sm:$0xff]   ;;  %v556_v58 = vld [vmem:[%s912_s2] ss:$0 sm:$0xff] }
  0x12   :  { %641 = vmatprep.subr.bf16.mxu1 %v695_v18  ;;  %v728_v55 = vld [vmem:[%s910_s1 + $0x138] sm:$0xff]  }
  0x13   :  { %620 = vmatpush3.bf16.msra.mxu0 %v694_v17 }
  0x14   :  { %621 = vmatprep.subr.bf16.mxu0 %v697_v20 }
  0x15   :  { %642 = vmatpush3.bf16.msra.mxu1 %v696_v19 }
  0x16   :  { %643 = vmatprep.subr.bf16.mxu1 %v699_v22 }
  0x17   :  { %622 = vmatpush3.bf16.msra.mxu0 %v698_v21 }
  0x18   :  { %623 = vmatprep.subr.bf16.mxu0 %v701_v24 }
  0x19   :  { %644 = vmatpush3.bf16.msra.mxu1 %v700_v23 }
  0x1a   :  { %645 = vmatprep.subr.bf16.mxu1 %v703_v26 }
  0x1b   :  { %624 = vmatpush3.bf16.msra.mxu0 %v702_v25 }
  0x1c   :  { %625 = vmatprep.subr.bf16.mxu0 %v705_v28 }
  0x1d   :  { %646 = vmatpush3.bf16.msra.mxu1 %v704_v27 }
  0x1e   :  { %647 = vmatprep.subr.bf16.mxu1 %v707_v30 }
  0x1f   :  { %626 = vmatpush3.bf16.msra.mxu0 %v706_v29 }
  0x20   :  { %655 = vmatprep.subr.bf16.mxu0 %v711_v35 }
  0x21   :  { %648 = vmatpush3.bf16.msra.mxu1 %v710_v34 }
  0x22   :  { %463 = vmatmul.mubr.bf16.vlgmr.msra.gmra.mrb[0].mxu0 %v557_v32 }
  0x23   :  { %656 = vmatpush3.bf16.msra.mxu0 %v714_v39  ;;  %542 = vmatprep.mubr.bf16.mxu0 %v562_v50 }
  0x24   :  { %503 = vmatmul.mubr.bf16.vlgmr.msra.gmra.mrb[0].mxu1 %v559_v37  ;;  %657 = vmatprep.subr.bf16.mxu0 %v715_v40 }
  0x27   :  { %658 = vmatpush3.bf16.msra.mxu0 %v716_v41 }
  0x28   :  { %659 = vmatprep.subr.bf16.mxu0 %v717_v42 }
  0x2b   :  { %660 = vmatpush3.bf16.msra.mxu0 %v718_v43 }
  0x2c   :  { %661 = vmatprep.subr.bf16.mxu0 %v719_v44 }
  0x2f   :  { %662 = vmatpush3.bf16.msra.mxu0 %v720_v45 }
  0x30   :  { %663 = vmatprep.subr.bf16.mxu0 %v721_v46 }
  0x33   :  { %664 = vmatpush3.bf16.msra.mxu0 %v722_v47 }
  0x34   :  { %665 = vmatprep.subr.bf16.mxu0 %v723_v49 }
  0x37   :  { %666 = vmatpush3.bf16.msra.mxu0 %v724_v51 }
  0x38   :  { %667 = vmatprep.subr.bf16.mxu0 %v725_v52 }
  0x3b   :  { %668 = vmatpush3.bf16.msra.mxu0 %v726_v53 }
  0x3c   :  { %669 = vmatprep.subr.bf16.mxu0 %v727_v54 }
  0x3f   :  { %670 = vmatpush3.bf16.msra.mxu0 %v728_v55 }
  0x42   :  { %543 = vmatmul.mubr.bf16.vlgmr.msra.gmra.mrb[4].mxu0 %v561_v56 }
  0xf5   :  { %v627_v57 = vpop.f32.mrb[0].mxu0 }
  0xf6   :  { %v628_v59 = vpop.f32.mrb[1].mxu0 }
  0xf7   :  { %v629_v60 = vadd.f32 %v628_v59, %v627_v57  ;;  %v630_v61 = vpop.f32.mrb[2].mxu0  ;;  %v649_v62 = vpop.f32.mrb[0].mxu1 }
  0xf8   :  { %v631_v63 = vpop.f32.mrb[3].mxu0  ;;  %v650_v0 = vpop.f32.mrb[1].mxu1 }
  0xf9   :  { %v465_v1 = vadd.f32 %v629_v60, %v556_v58  ;;  %v651_v2 = vadd.f32 %v650_v0, %v649_v62  ;;  %v652_v3 = vpop.f32.mrb[2].mxu1 }
  0xfa   :  { %v653_v4 = vpop.f32.mrb[3].mxu1 }
  0xfb   :  { %v505_v5 = vadd.f32 %v651_v2, %v465_v1 }
 0x115   :  { %v671_v6 = vpop.f32.mrb[4].mxu0 }
 0x116   :  { %v672_v7 = vpop.f32.mrb[5].mxu0 }
 0x117   :  { %v673_v8 = vadd.f32 %v672_v7, %v671_v6  ;;  %v674_v9 = vpop.f32.mrb[6].mxu0 }
 0x118   :  { %v675_v10 = vpop.f32.mrb[7].mxu0 }
 0x119   :  { %v545_v11 = vadd.f32 %v673_v8, %v505_v5 }
 0x11b   :  { %v550_v12 = vpack.c.bf16 %v545_v11, %v545_v11 }
 0x11d   :  { %551 = vst [vmem:[%s913_s3] sm:$0xf] %v550_v12 }

// kernel: pgn_forward.15
= control target key start
LH: loop header
LB: loop body
LE: loop exit
PB: predicated region body
PF: predicated region fallthrough
CT: control target
= control target key end

     0   :  { %v184_v1 = vmov 0   ;;  %vm100_vm0 = vcmask 785408   ;;  %v30_v14 = vlaneseq  ;;  %vm146_vm1 = vcmask 7168   ;;  %s253_s1 = inlined_call_operand.vmem [shape: bf16[1,96,129], index: 1, kind: input, shape index: {}]   ;;  %s254_s0 = inlined_call_operand.vmem [shape: bf16[8,96], index: 0, kind: input, shape index: {}]   ;;  %s255_s2 = inlined_call_operand.vmem [shape: f32[1,1,129], index: 2, kind: input, shape index: {}]   ;;  %s256_s3 = inlined_call_operand.vmem [shape: f32[1,8,129], index: 3, kind: output, shape index: {}]  }
   0x1   :  { %v166_v0 = vld [vmem:[%s253_s1 + $0x4] ss:$8 sps:$4 sm:$0xff]   ;;  %136 = vmatprep.mubr.bf16.mxu0 %v184_v1  ;;  %v168_v2 = vld [vmem:[%s253_s1] ss:$8 sps:$4 sm:$0xff]   ;;  %v169_v3 = vld [vmem:[%s253_s1 + $0x14] ss:$8 sps:$4 sm:$0xff]  }
   0x2   :  { %104 = vmatprep.subr.bf16.mxu0 %v166_v0  ;;  %v171_v4 = vld [vmem:[%s253_s1 + $0x10] ss:$8 sps:$4 sm:$0xff]   ;;  %v172_v5 = vld [vmem:[%s253_s1 + $0x24] ss:$8 sps:$4 sm:$0xff]   ;;  %v174_v6 = vld [vmem:[%s253_s1 + $0x20] ss:$8 sps:$4 sm:$0xff]  }
   0x3   :  { %105 = vmatpush1.bf16.msra.mxu0 %v168_v2  ;;  %v175_v7 = vld [vmem:[%s253_s1 + $0x34] ss:$8 sps:$4 sm:$0xff]   ;;  %v177_v8 = vld [vmem:[%s253_s1 + $0x30] ss:$8 sps:$4 sm:$0xff]   ;;  %v178_v9 = vld [vmem:[%s253_s1 + $0x44] ss:$8 sps:$4 sm:$0xff]  }
   0x4   :  { %106 = vmatprep.subr.bf16.mxu0 %v169_v3  ;;  %v180_v10 = vld [vmem:[%s253_s1 + $0x40] ss:$8 sps:$4 sm:$0xff]   ;;  %v181_v11 = vld [vmem:[%s253_s1 + $0x54] ss:$8 sps:$4 sm:$0xff]   ;;  %v183_v12 = vld [vmem:[%s253_s1 + $0x50] ss:$8 sps:$4 sm:$0xff]  }
   0x5   :  { %v27_v13 = vld [vmem:[%s254_s0] sm:$0xf]  ;;  %v31_v15 = vshrl.u32 %v30_v14, 7 }
   0x6   :  { %v28_v17 = vld [vmem:[%s255_s2] sm:$0x3] }
   0x7   :  { %107 = vmatpush1.bf16.msra.mxu0 %v171_v4  ;;  %v32_v16 = vsub.s32 0, %v31_v15  ;;  %v36_v18 = vsub.s32 1, %v31_v15 }
   0x8   :  { %108 = vmatprep.subr.bf16.mxu0 %v172_v5 }
   0x9   :  { %v33_v19 = vrot.slane %v28_v17, %v32_v16  ;;  %v37_v20 = vrot.slane %v28_v17, %v36_v18 }
   0xb   :  { %109 = vmatpush1.bf16.msra.mxu0 %v174_v6 }
   0xc   :  { %110 = vmatprep.subr.bf16.mxu0 %v175_v7 }
   0xf   :  { %111 = vmatpush1.bf16.msra.mxu0 %v177_v8 }
  0x10   :  { %112 = vmatprep.subr.bf16.mxu0 %v178_v9 }
  0x13   :  { %113 = vmatpush1.bf16.msra.mxu0 %v180_v10 }
  0x14   :  { %114 = vmatprep.subr.bf16.mxu0 %v181_v11 }
  0x17   :  { %115 = vmatpush1.bf16.msra.mxu0 %v183_v12 }
  0x1a   :  { %164 = vmatmul.mubr.msk.bf16.vlgmr.msra.gmra.mrb[0].mxu0 %vm100_vm0, %v27_v13 }
  0xed   :  { %v138_v21 = vpop.f32.mrb[0].mxu0 }
  0xee   :  { %v139_v22 = vadd.f32 %v138_v21, %v33_v19  ;;  %v140_v23 = vpop.f32.mrb[1].mxu0 }
  0xef   :  { %v141_v24 = vadd.f32 %v140_v23, %v37_v20  ;;  %v142_v25 = vpop.f32.mrb[2].mxu0 }
  0xf0   :  { %145 = vst [vmem:[%s256_s3] sm:$0xff] %v139_v22  ;;  %v143_v26 = vpop.f32.mrb[3].mxu0 }
  0xf1   :  { %147 = vst.msk [vmem:[%s256_s3 + $0x8] sm:$0xff] %vm146_vm1, %v141_v24 }

// kernel: pgn_forward.14
= control target key start
LH: loop header
LB: loop body
LE: loop exit
PB: predicated region body
PF: predicated region fallthrough
CT: control target
= control target key end

     0   :  { %s1420_s21 = smov 0   ;;  %s1608_s0 = inlined_call_operand.vmem [shape: bf16[4,2,128], index: 0, kind: input, shape index: {}]   ;;  %s1609_s1 = inlined_call_operand.vmem [shape: bf16[2,8,32], index: 1, kind: input, shape index: {}]   ;;  %s1610_s2 = inlined_call_operand.vmem [shape: bf16[2,8,64], index: 2, kind: input, shape index: {}]   ;;  %s1611_s3 = inlined_call_operand.vmem [shape: f32[2,8], index: 3, kind: input, shape index: {}]   ;;  %s1612_s4 = inlined_call_operand.vmem [shape: f32[2,2,32], index: 4, kind: input, shape index: {}]   ;;  %s1613_s5 = inlined_call_operand.vmem [shape: f32[2,2,32], index: 5, kind: input, shape index: {}]   ;;  %s1614_s6 = inlined_call_operand.vmem [shape: bf16[32,32], index: 6, kind: input, shape index: {}]   ;;  %s1615_s7 = inlined_call_operand.vmem [shape: f32[32,1], index: 7, kind: input, shape index: {}]   ;;  %s1616_s8 = inlined_call_operand.vmem [shape: bf16[96,128], index: 8, kind: input, shape index: {}]   ;;  %s1617_s9 = inlined_call_operand.vmem [shape: bf16[1,64,128], index: 9, kind: input, shape index: {}]   ;;  %s1618_s10 = inlined_call_operand.vmem [shape: f32[1,1,128], index: 10, kind: input, shape index: {}]   ;;  %s1619_s11 = inlined_call_operand.vmem [shape: bf16[4,2,96], index: 11, kind: output, shape index: {0}]   ;;  %s1620_s12 = inlined_call_operand.vmem [shape: f32[4,2,8], index: 12, kind: output, shape index: {1}]  }
   0x1 LB: > { %s1158_s22 = sadd.s32 4294967295, %s1345_s21   ;;  %p1162_p0 = scmp.ge.s32.totalorder %s1345_s21, 1  ;;  %s1345_s21 = sphi %s1420_s21, %s23_s21  }
   0x2   : > { %p363_p1 = scmp.lt.s32.totalorder %s1345_s21, 5 }
   0x4   : > { %p364_p2 = pnand %p1162_p0, %p363_p1 }
   0x5   : > { %p405_p3 = scmp.lt.s32.totalorder (!%p364_p2), %s1158_s22, 3  ;;  %p1164_p4 = scmp.ne.s32.totalorder (!%p364_p2), %s1158_s22, 0 }
   0x6   : > { %367 = sbr.rel (%p364_p2) target bundleno = 2566 (0xa06), region = 64 }
   0xd   : > { %s1428_s23 = scalar_select %p405_p3, %s1158_s22, 3 }
   0xe   : > { %419 = sbr.rel (%p1164_p4) target bundleno = 21 (0x15), region = 68  ;;  %v420_v0 = vld [vmem:[%s1612_s4] sm:$0x3] (!%p1164_p4)  ;;  %vm422_vm0 = vcmask (!%p1164_p4), 254976   ;;  %v421_v1 = vld [vmem:[%s1612_s4 + $0x2] sm:$0x3] (!%p1164_p4) }
   0xf   : > { %s407_s26 = scalar_lea.vmem %s1608_s0, %s1428_s23  ;;  %s410_s29 = scalar_lea.vmem %s1619_s11, %s1428_s23  ;;  %423 = vst.msk [vmem:[#allocation2] sm:$0x3] (!%p1164_p4), %vm422_vm0, %v420_v0  ;;  %424 = vst.msk [vmem:[#allocation2 + $0x2] sm:$0x3] (!%p1164_p4), %vm422_vm0, %v421_v1  ;;  %v425_v2 = vld [vmem:[%s1613_s5] sm:$0x3] (!%p1164_p4) }
  0x10   : > { %s1163_s30 = sshll.u32 %s1428_s23, 1  ;;  %v426_v3 = vld [vmem:[%s1613_s5 + $0x2] sm:$0x3] (!%p1164_p4)  ;;  %427 = vst.msk [vmem:[#allocation3] sm:$0x3] (!%p1164_p4), %vm422_vm0, %v425_v2 }
  0x11   : > { %s1442_s15 = scalar_lea.vmem %s1620_s12, %s1163_s30  ;;  %428 = vst.msk [vmem:[#allocation3 + $0x2] sm:$0x3] (!%p1164_p4), %vm422_vm0, %v426_v3 }
  0x15 PF: > { %v1303_v4 = vld [vmem:[%s1614_s6] sm:$0xff]   ;;  %v1347_v5 = vmov 0.0   ;;  %v1304_v6 = vld [vmem:[%s1614_s6 + $0x8] sm:$0xff]   ;;  %vm1348_vm1 = vmmov 0   ;;  %vm450_vm2 = vcmask 261120   ;;  %v537_v11 = vld [vmem:[%s1615_s7 + $0x10] sm:$0xff]  ;;  %v502_v17 = vlaneseq }
  0x16   : > { %1219 = vmatprep.subr.bf16.mxu0 %v1347_v5  ;;  %1223 = vmatprep.mubr.msk.bf16.mxu0 %vm1348_vm1, %v1347_v5  ;;  %v436_v7 = vld [vmem:[#allocation2 + $0x2] sm:$0x3]  ;;  %v536_v10 = vld [vmem:[%s1615_s7 + $0x8] sm:$0xff]  ;;  %v538_v13 = vld [vmem:[%s1615_s7 + $0x18] sm:$0xff]  ;;  %v1349_v15 = vmov 1966171168  }
  0x17   : > { %1220 = vmatpush3.bf16.msra.mxu0 %v1303_v4  ;;  %v437_v8 = vpack.c.bf16 %v436_v7, %v436_v7  ;;  %v535_v9 = vld [vmem:[%s1615_s7] sm:$0xff]  ;;  %v1282_v14 = vpack.c.bf16 %v538_v13, %v537_v11  ;;  %v500_v16 = vunpack.c.l.s4 %v1349_v15  ;;  %v1483_v19 = vshrl.u32 %v502_v17, 7  ;;  %s1351_s18 = smov 64   ;;  %v1308_v11 = vld [vmem:[%s1616_s8 + $0x18] sm:$0xff]   ;;  %v1310_v13 = vld [vmem:[%s1616_s8 + $0x28] sm:$0xff]   ;;  %s1352_s17 = smov 32  }
  0x18   : > { %1221 = vmatprep.subr.bf16.mxu0 %v1347_v5  ;;  %v1278_v12 = vpack.c.bf16 %v536_v10, %v535_v9  ;;  %v1191_v22 = vld [vmem:[%s1609_s1] sm:$0xff]   ;;  %v1350_v39 = vmov 0   ;;  %v631_v42 = vand.u32 127, %v502_v17  ;;  %vm640_vm3 = vcmask 1041409   ;;  %v1306_v9 = vld [vmem:[%s1616_s8 + $0x8] sm:$0xff]   ;;  %v1307_v10 = vld [vmem:[%s1616_s8 + $0x10] sm:$0xff]  }
  0x19   : > { %v501_v18 = vunpack.c.0.s8 %v500_v16  ;;  %v523_v24 = vsub.s32 0, %v1483_v19  ;;  %v1192_v27 = vunpack.c.l.bf16 %v1191_v22  ;;  %v1193_v31 = vunpack.c.h.bf16 %v1191_v22  ;;  %1302 = vset.pattern.permute.xlu0 %v1350_v39  ;;  %v620_v45 = vld [vmem:[%s1611_s3] sm:$0x3]  ;;  %v430_v57 = vld [vmem:[%s1610_s2 + $0x4] sm:$0xf]  ;;  %s1354_s16 = smov 96  }
  0x1a   : > { %1279 = vmatprep.subr.bf16.mxu1 %v1278_v12  ;;  %v634_v44 = vsub.s32 %v631_v42, %v1483_v19  ;;  %vm621_vm4 = vcmp.eq.f32.partialorder %v620_v45, 0.0  ;;  %vm644_vm5 = vcmask 58368   ;;  %vm687_vm6 = vcmask 1043456   ;;  %v429_v58 = vld [vmem:[%s1610_s2] sm:$0xf] }
  0x1b   : > { %1222 = vmatpush3.bf16.msra.mxu0 %v1304_v6  ;;  %1281 = vmatpush3.bf16.msra.mxu1 %v1278_v12  ;;  %v1486_v20 = vsub.s32 %v501_v18, %v1483_v19  ;;  %v735_v59 = vsel %vm687_vm6, %v430_v57, 0  ;;  %v689_v60 = vsel %vm687_vm6, %v429_v58, 0  ;;  %v777_v61 = vld [vmem:[#allocation2] sm:$0x3]  ;;  %vm683_vm7 = vcmask 64512  }
  0x1c   : > { %1244 = vmatprep.subr.bf16.mxu0 %v1347_v5  ;;  %1283 = vmatprep.subr.bf16.mxu1 %v1282_v14  ;;  %v1305_v4 = vld [vmem:[%s1616_s8] sm:$0xff]   ;;  %vm800_vm8 = vcmask 523264   ;;  %vm841_vm9 = vcmask 785408   ;;  %vm1051_vm10 = vcmask 254976   ;;  %vm1080_vm11 = vcmask 778240  }
  0x1d   : > { %v1309_v12 = vld [vmem:[%s1616_s8 + $0x20] sm:$0xff]  }
  0x1e   : > { %1224 = vmatmul.mubr.msk.bf16.vlgmr.msra.gmra.mrb[0].mxu0 %vm450_vm2, %v437_v8 }
  0x1f   : > { %1246 = vmatprep.mubr.msk.bf16.mxu0 %vm1348_vm1, %v1347_v5  ;;  %1285 = vmatpush3.bf16.msra.mxu1 %v1282_v14  ;;  %v1180_v14 = vld.sshfl [vmem:[#allocation3] sm:$0x3 pattern:$0x76325410] }
  0x20   : > { %1238 = vmatprep.subr.bf16.mxu1 %v1347_v5  ;;  %1245 = vmatpush3.bf16.msra.mxu0 %v735_v59 }
  0x21   : > { %1266 = vmatprep.subr.bf16.mxu0 %v1347_v5 }
  0xf1   : > { %v488_v21 = vpop.f32.mrb[0].mxu0 }
  0xf2   : > { %v505_v23 = vrot.slane %v488_v21, %v1486_v20  ;;  %v1225_v25 = vpop.f32.mrb[1].mxu0 }
  0xf3   : > { %v491_v26 = vpop.f32.mrb[2].mxu0 }
  0xf4   : > { %v506_v28 = vcombine.high %v505_v23, %v505_v23  ;;  %v513_v29 = vrot.slane %v505_v23, %v1486_v20  ;;  %v1226_v30 = vpop.f32.mrb[3].mxu0 }
  0xf6   : > { %v520_v32 = vrot.slane %v506_v28, %v1486_v20  ;;  %v524_v33 = vrot.slane %v513_v29, %v523_v24  ;;  %v802_v29 = vld [vmem:[%s407_s26] sm:$0x1] }
  0xf7   : > { %v803_v30 = vunpack.c.l.bf16 %v802_v29 }
  0xf8   : > { %v528_v34 = vrot.slane %v520_v32, %v523_v24  ;;  %v531_v35 = vadd.f32 %v1192_v27, %v524_v33 }
  0xfa   : > { %v532_v36 = vadd.f32 %v1193_v31, %v528_v34  ;;  %1315 = vtanh.f32 %v531_v35 }
  0xfc   : > { %1317 = vtanh.f32 %v532_v36 }
 0x104   : > { %v1316_v37 = vpop.eup %1315 }
 0x105   : > { %1235 = vmatprep.mubr.msk.f32.mxu1 %vm450_vm2, %v1316_v37 }
 0x106   : > { %v1318_v38 = vpop.eup %1317 }
 0x107   : > { %1236 = vmatmul.mubr.msk.f32.vlgmr.msra.gmra.mrb[0].mxu1 %vm450_vm2, %v1318_v38 }
 0x108   : > { %1240 = vmatprep.mubr.msk.bf16.mxu1 %vm1348_vm1, %v1347_v5  ;;  %1239 = vmatpush3.bf16.msra.mxu1 %v689_v60 }
 0x109   : > { %1250 = vmatprep.subr.bf16.mxu1 %v1347_v5 }
 0x1da   : > { %v1237_v40 = vpop.f32.mrb[0].mxu1 }
 0x1db   : > { %v611_v41 = vpop.f32.mrb[1].mxu1 }
 0x1dc   : > { %625 = vperm.xlu0 %1302, %v611_v41  }
 0x1e0   : > { %628 = vperm.xlu0 %1302, %v1237_v40  }
 0x1e4   : > { %797 = vrot.lane.b32.xlu0 %v777_v61, %s1351_s18 }
 0x1e8   : > { %901 = vrot.lane.b32.xlu0 %v1180_v14, %s1352_s17 }
 0x25b   : > { %v626_v43 = vpop.permute.xlu0 %625 }
 0x25c   : > { %v635_v47 = vrot.slane %v626_v43, %v634_v44 }
 0x25f   : > { %v629_v46 = vpop.permute.xlu0 %628 }
 0x260   : > { %v639_v48 = vrot.slane %v629_v46, %v634_v44 }
 0x262   : > { %v641_v49 = vsel %vm640_vm3, %v639_v48, %v635_v47  ;;  %v921_v47 = vld [vmem:[#allocation2 + $0x2] sm:$0x3] }
 0x263   : > { %v643_v50 = vsel %vm621_vm4, -1e+30, %v641_v49  ;;  %v798_v17 = vpop.permute.xlu0 %797  ;;  %v1311_v48 = vld [vmem:[%s1617_s9] sm:$0xff]   ;;  %v1312_v49 = vld [vmem:[%s1617_s9 + $0x8] sm:$0xff]  }
 0x264   : > { %v645_v51 = vsel %vm644_vm5, %v643_v50, -inf }
 0x265   : > { %646 = vmax.xlane.f32.xlu1 %v645_v51 }
 0x267   : > { %v902_v43 = vpop.permute.xlu0 %901 }
 0x2f2   : > { %v647_v52 = vpop.xlane.xlu1 %646 }
 0x2f3   : > { %v648_v53 = vsub.f32 %v643_v50, %v647_v52  ;;  %v1313_v50 = vld [vmem:[%s1617_s9 + $0x10] sm:$0xff]   ;;  %v1314_v52 = vld [vmem:[%s1617_s9 + $0x18] sm:$0xff]  }
 0x2f5   : > { %v649_v54 = vmul.f32 1.442695, %v648_v53  ;;  %v1353_v53 = vmov 1983009808  }
 0x2f7   : > { %1319 = vpow2.f32 %v649_v54  ;;  %v934_v54 = vunpack.c.l.s4 %v1353_v53 }
 0x301   : > { %v1320_v55 = vpop.eup %1319 }
 0x302   : > { %v651_v56 = vsel %vm644_vm5, %v1320_v55, 0.0 }
 0x303   : > { %652 = vadd.xlane.f32.xlu1 %v651_v56  ;;  %v935_v56 = vunpack.c.0.s8 %v934_v54 }
 0x305   : > { %v938_v58 = vsub.s32 %v935_v56, %v1483_v19 }
 0x390   : > { %v653_v62 = vpop.xlane.xlu1 %652 }
 0x391   : > { %1321 = vrcp.f32 %v653_v62 }
 0x39b   : > { %v1322_v63 = vpop.eup %1321 }
 0x39c   : > { %v655_v0 = vmul.f32 %v1322_v63, %v1320_v55  ;;  %v923_v55 = vld [vmem:[#allocation3 + $0x2] sm:$0x3] }
 0x39e   : > { %v663_v1 = vrot.slane %v655_v0, %v1486_v20  ;;  %1082 = vst.msk [vmem:[%s1442_s15] sm:$0x3] %vm644_vm5, %v655_v0  ;;  %v1181_v0 = vld [vmem:[%s1618_s10] ss:$0 sm:$0xff] }
 0x3a0   : > { %v671_v2 = vrot.slane %v663_v1, %v1486_v20  ;;  %v664_v3 = vcombine.high %v663_v1, %v663_v1 }
 0x3a2   : > { %v681_v6 = vpack.c.bf16 %v671_v2, %v671_v2  ;;  %v678_v7 = vrot.slane %v664_v3, %v1486_v20 }
 0x3a4   : > { %1241 = vmatmul.mubr.msk.bf16.vlgmr.msra.gmra.mrb[4].mxu1 %vm683_vm7, %v681_v6  ;;  %v682_v8 = vpack.c.bf16 %v678_v7, %v678_v7 }
 0x3a5   : > { %1251 = vmatpush3.bf16.msra.mxu1 %v1305_v4  ;;  %1262 = vmatprep.mubr.msk.bf16.mxu1 %vm1348_vm1, %v1347_v5 }
 0x3a6   : > { %1247 = vmatmul.mubr.msk.bf16.vlgmr.msra.gmra.mrb[4].mxu0 %vm683_vm7, %v682_v8  ;;  %1252 = vmatprep.subr.bf16.mxu1 %v1347_v5 }
 0x3a7   : > { %1274 = vmatprep.mubr.msk.bf16.mxu0 %vm1348_vm1, %v1347_v5  ;;  %1267 = vmatpush3.bf16.msra.mxu0 %v1311_v48 }
 0x3a8   : > { %1268 = vmatprep.subr.bf16.mxu0 %v1347_v5 }
 0x3a9   : > { %1253 = vmatpush3.bf16.msra.mxu1 %v1306_v9 }
 0x3aa   : > { %1254 = vmatprep.subr.bf16.mxu1 %v1347_v5 }
 0x3ab   : > { %1269 = vmatpush3.bf16.msra.mxu0 %v1312_v49 }
 0x3ac   : > { %1270 = vmatprep.subr.bf16.mxu0 %v1347_v5 }
 0x3ad   : > { %1255 = vmatpush3.bf16.msra.mxu1 %v1307_v10 }
 0x3ae   : > { %1256 = vmatprep.subr.bf16.mxu1 %v1347_v5 }
 0x3af   : > { %1271 = vmatpush3.bf16.msra.mxu0 %v1313_v50 }
 0x3b0   : > { %1272 = vmatprep.subr.bf16.mxu0 %v1347_v5 }
 0x3b1   : > { %1257 = vmatpush3.bf16.msra.mxu1 %v1308_v11 }
 0x3b2   : > { %1258 = vmatprep.subr.bf16.mxu1 %v1347_v5 }
 0x3b3   : > { %1273 = vmatpush3.bf16.msra.mxu0 %v1314_v52 }
 0x3b5   : > { %1259 = vmatpush3.bf16.msra.mxu1 %v1309_v12 }
 0x3b6   : > { %1260 = vmatprep.subr.bf16.mxu1 %v1347_v5 }
 0x3b9   : > { %1261 = vmatpush3.bf16.msra.mxu1 %v1310_v13 }
 0x477   : > { %v725_v15 = vpop.f32.mrb[4].mxu1 }
 0x478   : > { %v1242_v16 = vpop.f32.mrb[5].mxu1 }
 0x479   : > { %v728_v18 = vpop.f32.mrb[6].mxu1  ;;  %v771_v20 = vpop.f32.mrb[4].mxu0 }
 0x47a   : > { %v793_v21 = vrot.slane %v771_v20, 7  ;;  %v1243_v22 = vpop.f32.mrb[7].mxu1  ;;  %v1248_v23 = vpop.f32.mrb[5].mxu0 }
 0x47b   : > { %v774_v24 = vpop.f32.mrb[6].mxu0 }
 0x47c   : > { %v1549_v25 = vsel %vm640_vm3, %v793_v21, %v725_v15  ;;  %v1249_v26 = vpop.f32.mrb[7].mxu0 }
 0x47d   : > { %v801_v27 = vsel %vm800_vm8, %v1549_v25, %v798_v17 }
 0x47e   : > { %v804_v28 = vpack.c.bf16 %v801_v27, %v801_v27 }
 0x480   : > { %1263 = vmatmul.mubr.msk.bf16.vlgmr.msra.gmra.mrb[8].mxu1 %vm841_vm9, %v804_v28 }
 0x553   : > { %v879_v31 = vpop.f32.mrb[8].mxu1 }
 0x554   : > { %v885_v32 = vadd.f32 %v879_v31, %v803_v30  ;;  %v1264_v33 = vpop.f32.mrb[9].mxu1 }
 0x555   : > { %v882_v34 = vpop.f32.mrb[10].mxu1 }
 0x556   : > { %1323 = vtanh.f32 %v885_v32  ;;  %v1265_v35 = vpop.f32.mrb[11].mxu1  ;;  %v1179_v37 = vmul.f32 -1.442695, %v885_v32 }
 0x558   : > { %1325 = vpow2.f32 %v1179_v37 }
 0x560   : > { %v1324_v36 = vpop.eup %1323 }
 0x561   : > { %906 = vrot.lane.b32.xlu1 %v1324_v36, %s1351_s18 }
 0x562   : > { %v1326_v38 = vpop.eup %1325 }
 0x563   : > { %v889_v39 = vadd.f32 1.0, %v1326_v38 }
 0x565   : > { %1327 = vrcp.f32 %v889_v39  ;;  %944 = vrot.lane.b32.xlu1 %v921_v47, %s1352_s17 }
 0x569   : > { %1031 = vrot.lane.b32.xlu1 %v923_v55, %s1352_s17 }
 0x56f   : > { %v1328_v40 = vpop.eup %1327 }
 0x570   : > { %v904_v44 = vmul.f32 %v1328_v40, %v902_v43 }
 0x5d3   : > { %v907_v41 = vpop.permute.xlu1 %906 }
 0x5d4   : > { %v909_v42 = vmul.f32 %v1328_v40, %v907_v41 }
 0x5d6   : > { %911 = vrot.lane.b32.xlu0 %v909_v42, %s1352_s17 }
 0x5d7   : > { %v945_v61 = vpop.permute.xlu1 %944 }
 0x5db   : > { %v1032_v13 = vpop.permute.xlu1 %1031 }
 0x648   : > { %v912_v45 = vpop.permute.xlu0 %911 }
 0x649   : > { %v1560_v46 = vadd.f32 %v912_v45, %v904_v44 }
 0x64b   : > { %1329 = vtanh.f32 %v1560_v46  ;;  %v1060_v22 = vrot.slane %v1560_v46, %v938_v58 }
 0x655   : > { %v1330_v51 = vpop.eup %1329 }
 0x656   : > { %917 = vrot.lane.b32.xlu0 %v1330_v51, %s1351_s18 }
 0x6c8   : > { %v918_v57 = vpop.permute.xlu0 %917 }
 0x6c9   : > { %v920_v59 = vmul.f32 %v1328_v40, %v918_v57 }
 0x6cb   : > { %v939_v60 = vrot.slane %v920_v59, %v938_v58 }
 0x6cd   : > { %940 = vrot.lane.b32.xlu0 %v939_v60, %s1352_s17 }
 0x73f   : > { %v941_v5 = vpop.permute.xlu0 %940 }
 0x740   : > { %v947_v62 = vsel %vm450_vm2, %v941_v5, %v945_v61  ;;  %1052 = vst.msk [vmem:[#allocation2] sm:$0x3] %vm1051_vm10, %v941_v5 }
 0x741   : > { %v948_v63 = vpack.c.bf16 %v947_v62, %v947_v62 }
 0x743   : > { %1275 = vmatmul.mubr.msk.bf16.vlgmr.msra.gmra.mrb[8].mxu0 %vm800_vm8, %v948_v63 }
 0x816   : > { %v1017_v1 = vpop.f32.mrb[8].mxu0 }
 0x817   : > { %v1018_v19 = vadd.f32 %v1181_v0, %v1017_v1  ;;  %v1276_v2 = vpop.f32.mrb[9].mxu0 }
 0x818   : > { %v1020_v3 = vpop.f32.mrb[10].mxu0 }
 0x819   : > { %1331 = vtanh.f32 %v1018_v19  ;;  %v1277_v4 = vpop.f32.mrb[11].mxu0  ;;  %v1187_v7 = vmul.f32 -1.442695, %v1018_v19 }
 0x81b   : > { %1333 = vpow2.f32 %v1187_v7 }
 0x823   : > { %v1332_v6 = vpop.eup %1331 }
 0x824   : > { %1036 = vrot.lane.b32.xlu0 %v1332_v6, %s1351_s18 }
 0x825   : > { %v1334_v8 = vpop.eup %1333 }
 0x826   : > { %v1026_v9 = vadd.f32 1.0, %v1334_v8 }
 0x828   : > { %1335 = vrcp.f32 %v1026_v9 }
 0x832   : > { %v1336_v10 = vpop.eup %1335 }
 0x833   : > { %v1034_v14 = vmul.f32 %v1336_v10, %v1032_v13 }
 0x896   : > { %v1037_v11 = vpop.permute.xlu0 %1036 }
 0x897   : > { %v1039_v12 = vmul.f32 %v1336_v10, %v1037_v11 }
 0x899   : > { %1041 = vrot.lane.b32.xlu0 %v1039_v12, %s1352_s17 }
 0x90b   : > { %v1042_v15 = vpop.permute.xlu0 %1041 }
 0x90c   : > { %v1044_v16 = vadd.f32 %v1042_v15, %v1034_v14 }
 0x90e   : > { %1337 = vtanh.f32 %v1044_v16 }
 0x918   : > { %v1338_v17 = vpop.eup %1337 }
 0x919   : > { %1047 = vrot.lane.b32.xlu1 %v1338_v17, %s1351_s18 }
 0x91d   : > { %1075 = vrot.lane.b32.xlu1 %v1549_v25, %s1352_s17 }
 0x921   : > { %1071 = vrot.lane.b32.xlu1 %v1044_v16, %s1354_s16 }
 0x98b   : > { %v1048_v18 = vpop.permute.xlu1 %1047 }
 0x98c   : > { %v1050_v20 = vmul.f32 %v1336_v10, %v1048_v18 }
 0x98e   : > { %1066 = vrot.lane.b32.xlu0 %v1050_v20, %s1352_s17 }
 0x98f   : > { %v1076_v21 = vpop.permute.xlu1 %1075 }
 0x992   : > { %1061 = vrot.lane.b32.xlu0 %v1060_v22, %s1354_s16 }
 0x993   : > { %v1072_v23 = vpop.permute.xlu1 %1071 }
 0x994   : > { %1074 = vst.msk [vmem:[#allocation3 + $0x2] sm:$0x3] %vm1051_vm10, %v1072_v23 }
 0xa00   : > { %v1067_v24 = vpop.permute.xlu0 %1066 }
 0xa01   : > { %1069 = vst.msk [vmem:[#allocation2 + $0x2] sm:$0x3] %vm1051_vm10, %v1067_v24  ;;  %v1078_v25 = vsel %vm450_vm2, %v1067_v24, %v1076_v21 }
 0xa02   : > { %v1079_v26 = vpack.c.bf16 %v1078_v25, %v1078_v25 }
 0xa04   : > { %1081 = vst.msk [vmem:[%s410_s29] sm:$0x1] %vm1080_vm11, %v1079_v26  ;;  %v1062_v27 = vpop.permute.xlu0 %1061 }
 0xa05   : > { %1064 = vst.msk [vmem:[#allocation3] sm:$0x3] %vm1051_vm10, %v1062_v27 }
 0xa06 PF: > { %s23_s21 = sadd.s32 1, %s1345_s21  }
 0xa07   : > { %p20_p5 = scmp.ge.s32.totalorder %s23_s21, 6  }
 0xa09   :  { %22 = sbr.rel (!%p20_p5) target bundleno = 1 (0x1), region = 112 }

</bundles_post_ra>
